<compile_context>
chip_gen: v7x
topology: tpu7x:2x2x1
jax: 0.10.0
libtpu: 0.0.40
codegen_flags: <defaults>
</compile_context>

<pallas_src>
import jax
import jax.numpy as jnp
from jax import lax
from jax.experimental import pallas as pl
from jax.experimental.pallas import tpu as pltpu

# ---- model hyper-parameters (small, consistent with the module) -------------
B, T = 4, 8          # batch, sequence length
BP = 8               # batch padded to one sublane tile inside the kernel
E = 8                # embedding_dim  (module default is 3; 8 chosen for layout)
H = 32               # hidden_size
V = 20               # token vocab size
L = 8                # label vocab size (incl. BOS / EOS / PAD tags)
PAD_TOKEN = 0        # token_vocab padding index (nn.Embedding padding_idx)
PAD_TAG, BOS_TAG, EOS_TAG = 0, 6, 7
NEG = -10000.0

H2, H4, H6, H8 = 2 * H, 4 * H, 6 * H, 8 * H

# row offsets inside the packed constant inputs (all 8-sublane aligned)
ROW_P = 0                    # (T*BP, B*T) padded time-major permutation
ROW_EMBP = 64                # (V, 8H)  emb @ Wih (gate-major, dir-minor columns)
ROW_WHH = 88                 # (2H, 8H) block-diagonal recurrent weights
ROW_BIAS = 152               # (1, 8H)  bih + bhh, both directions
WIDE_ROWS = 160

ROW_FCW = 0                  # (2H, L)  fc weight ([h_f | h_b] -> labels)
ROW_TRT = 64                 # (L, L)   transitions transposed: trT[cur, prev]
ROW_BOS = 72                 # (1, L)   trans[BOS, :]
ROW_EOS = 80                 # (1, L)   trans[:, EOS]
ROW_FCB = 88                 # (1, L)   fc bias
SMALL_ROWS = 96

_VMEM = pl.BlockSpec(memory_space=pltpu.MemorySpace.VMEM)


# =============================================================================
# Fused kernel: embedding + BiLSTM + Linear + CRF Viterbi decode
# =============================================================================
def bilstm_crf_kernel(tok_ref, wide_ref, small_ref, score_ref, path_ref,
                      pg, hs_f, hs_b):
    f32 = jnp.float32

    # --- embedding gather + hoisted input projections (one-hot matmuls) ------
    tok = tok_ref[...]                                             # (B, T, 1) int32
    onehot = (tok == lax.broadcasted_iota(jnp.int32, (B, T, V), 2)).astype(f32)
    onehot_bm = onehot.reshape(B * T, V)                           # batch-major rows
    perm = wide_ref[ROW_P:ROW_P + T * BP, 0:B * T]                 # (T*BP, B*T)
    onehot_tm = jnp.dot(perm, onehot_bm,
                        preferred_element_type=f32)                # padded time-major
    emb_proj = wide_ref[ROW_EMBP:ROW_EMBP + V, :]                  # (V, 8H)
    pre = jnp.dot(onehot_tm, emb_proj,
                  preferred_element_type=f32)                      # (T*BP, 8H)
    pg[...] = pre.reshape(T, BP, H8)

    # valid-token mask (1 for real non-pad tokens; padded batch rows are 0)
    mask3 = (jnp.sum(onehot_tm, axis=1, keepdims=True)
             - onehot_tm[:, 0:1]).reshape(T, BP, 1)                # (T, BP, 1)

    # --- fused fwd/bwd LSTM recurrence, fully unrolled ------------------------
    whh = wide_ref[ROW_WHH:ROW_WHH + H2, :]                        # (2H, 8H) block-diag
    bias = wide_ref[ROW_BIAS:ROW_BIAS + 1, :]                      # (1, 8H)
    lane = lax.broadcasted_iota(jnp.int32, (BP, H8), 1)
    fwd_lane = (lane & H) == 0                                     # even H-blocks = fwd

    h_cat = jnp.zeros((BP, H2), f32)                               # [h_f | h_b]
    c_cat = jnp.zeros((BP, H2), f32)
    # TODO(synk): padded timesteps are processed in both directions (zero inputs).
    for t in range(T):
        tb = T - 1 - t
        # fwd gate columns from step t, bwd gate columns from step T-1-t
        pre_cat = jnp.where(fwd_lane, pg[t], pg[tb])               # (BP, 8H)
        g_all = pre_cat + jnp.dot(h_cat, whh,
                                  preferred_element_type=f32) + bias
        s_all = jax.nn.sigmoid(g_all)                              # full-slab EUP
        t_all = jnp.tanh(g_all)
        i_cat = s_all[:, 0:H2]                                     # [i_f | i_b]
        f_cat = s_all[:, H2:H4]                                    # [f_f | f_b]
        g_cat = t_all[:, H4:H6]                                    # [g_f | g_b]
        o_cat = s_all[:, H6:H8]                                    # [o_f | o_b]
        c_cat = f_cat * c_cat + i_cat * g_cat
        h_cat = o_cat * jnp.tanh(c_cat)
        hs_f[t] = h_cat[:, 0:H]                                    # aligned tile store
        hs_b[tb] = h_cat[:, H:H2]

    # --- output projection: one (T*BP, 2H) x (2H, L) matmul -------------------
    hs_cat = jnp.concatenate([hs_f[...].reshape(T * BP, H),
                              hs_b[...].reshape(T * BP, H)], axis=1)
    fc_w = small_ref[ROW_FCW:ROW_FCW + H2, :]
    fc_b = small_ref[ROW_FCB:ROW_FCB + 1, :]
    em3 = (jnp.dot(hs_cat, fc_w, preferred_element_type=f32)
           + fc_b).reshape(T, BP, L)

    # --- CRF Viterbi DP (max-plus), alphas lane-resident ----------------------
    trT = small_ref[ROW_TRT:ROW_TRT + L, :]                        # trT[cur, prev]
    from_bos = small_ref[ROW_BOS:ROW_BOS + 1, :]
    to_eos = small_ref[ROW_EOS:ROW_EOS + 1, :]

    trT_b = trT[None, :, :]                                        # hoisted broadcast
    prev_iota = lax.broadcasted_iota(jnp.int32, (BP, L, L), 2)     # hoisted
    alphas = from_bos + em3[0]                                     # (BP, L)
    bp = []                                                        # bp[t-1]: (BP, L)
    for t in range(1, T):
        stat = em3[t][:, :, None] + trT_b                          # off the DP chain
        cand = alphas[:, None, :] + stat                           # (BP, cur, prev)
        max_scores = jnp.max(cand, axis=2)                         # (BP, L)
        argmax = jnp.min(
            jnp.where(cand == max_scores[:, :, None], prev_iota, L),
            axis=2).astype(jnp.int32)                              # low-index tie
        bp.append(argmax)
        alphas = jnp.where(mask3[t] > 0.0, max_scores, alphas)

    end_scores = alphas + to_eos                                   # (BP, L)
    best_score = jnp.max(end_scores, axis=1, keepdims=True)        # (BP, 1)
    lane_l = lax.broadcasted_iota(jnp.int32, (BP, L), 1)
    final_tags = jnp.min(jnp.where(end_scores == best_score, lane_l, L),
                         axis=1, keepdims=True).astype(jnp.int32)  # (BP, 1)
    lengths = jnp.sum(mask3, axis=0).astype(jnp.int32)             # (BP, 1)

    # --- backtrace, fully unrolled; path held in vregs, single (B,T) store ----
    col_iota = lax.broadcasted_iota(jnp.int32, (BP, T), 1)
    path = jnp.full((BP, T), PAD_TAG, jnp.int32)
    cur = final_tags
    for t in range(T - 1, -1, -1):
        tp1 = min(t + 1, T - 1)
        bp_t = bp[tp1 - 1]                                         # (BP, L)
        looked = jnp.sum(jnp.where(lane_l == cur, bp_t, 0),
                         axis=1, keepdims=True).astype(jnp.int32)  # (BP, 1)
        is_last = (t == lengths - 1)
        is_mid = (t < lengths - 1)
        cur = jnp.where(is_last, final_tags, jnp.where(is_mid, looked, cur))
        val = jnp.where(t < lengths, cur, PAD_TAG)                 # (BP, 1)
        path = jnp.where(col_iota == t, val, path)

    score_ref[...] = best_score[0:B, :]
    path_ref[...] = path[0:B, :]


# =============================================================================
# Parameter init (deterministic, mirrors the PyTorch module's __init__ shapes)
# =============================================================================
def init_params(key):
    ks = jax.random.split(key, 12)
    u = lambda k, shape, b: jax.random.uniform(k, shape, jnp.float32, -b, b)

    emb = jax.random.normal(ks[0], (V, E), jnp.float32)
    emb = emb.at[PAD_TOKEN].set(0.0)                               # padding_idx row = 0

    kb = 1.0 / float(H) ** 0.5
    wih_f = u(ks[1], (4 * H, E), kb); whh_f = u(ks[2], (4 * H, H), kb)
    bih_f = u(ks[3], (4 * H,), kb);   bhh_f = u(ks[4], (4 * H,), kb)
    wih_b = u(ks[5], (4 * H, E), kb); whh_b = u(ks[6], (4 * H, H), kb)
    bih_b = u(ks[7], (4 * H,), kb);   bhh_b = u(ks[8], (4 * H,), kb)

    kf = 1.0 / float(2 * H) ** 0.5
    fc_w = u(ks[9], (L, 2 * H), kf); fc_b = u(ks[10], (L,), kf)

    # CRF transitions with BOS/EOS/PAD constraints
    trans = jax.random.uniform(ks[11], (L, L), jnp.float32, -0.1, 0.1)
    trans = trans.at[:, BOS_TAG].set(NEG)
    trans = trans.at[EOS_TAG, :].set(NEG)
    trans = trans.at[PAD_TAG, :].set(NEG)
    trans = trans.at[:, PAD_TAG].set(NEG)
    trans = trans.at[PAD_TAG, EOS_TAG].set(0.0)
    trans = trans.at[PAD_TAG, PAD_TAG].set(0.0)

    return dict(emb=emb, wih_f=wih_f, whh_f=whh_f, bih_f=bih_f, bhh_f=bhh_f,
                wih_b=wih_b, whh_b=whh_b, bih_b=bih_b, bhh_b=bhh_b,
                fc_w=fc_w, fc_b=fc_b, trans=trans)


# =============================================================================
# Constant packing (all of this constant-folds under jit; no runtime ops)
# =============================================================================
def pack_constants(p):
    f32 = jnp.float32

    def gate_cols(w_f, w_b):           # (4H, K) x2 -> (K, 8H) gate-major/dir-minor
        blocks = []
        for gi in range(4):            # PyTorch gate order: i, f, g, o
            blocks.append(w_f[gi * H:(gi + 1) * H, :].T)
            blocks.append(w_b[gi * H:(gi + 1) * H, :].T)
        return jnp.concatenate(blocks, axis=1)

    wih_cat = gate_cols(p["wih_f"], p["wih_b"])                    # (E, 8H)
    emb_proj = jnp.dot(p["emb"], wih_cat)                          # (V, 8H)

    whh_bd = jnp.zeros((H2, H8), f32)                              # block-diag recurrent
    for gi in range(4):
        whh_bd = whh_bd.at[0:H, 2 * gi * H:2 * gi * H + H].set(
            p["whh_f"][gi * H:(gi + 1) * H, :].T)
        whh_bd = whh_bd.at[H:H2, 2 * gi * H + H:2 * (gi + 1) * H].set(
            p["whh_b"][gi * H:(gi + 1) * H, :].T)

    bsum_f = p["bih_f"] + p["bhh_f"]
    bsum_b = p["bih_b"] + p["bhh_b"]
    b_cat = jnp.concatenate(
        [jnp.concatenate([bsum_f[gi * H:(gi + 1) * H],
                          bsum_b[gi * H:(gi + 1) * H]]) for gi in range(4)])

    # padded time-major permutation: row t*BP + b  <-  column b*T + t  (b < B)
    rows = (jnp.arange(T)[:, None] * BP + jnp.arange(B)[None, :]).reshape(-1)
    cols = (jnp.arange(B)[None, :] * T + jnp.arange(T)[:, None]).reshape(-1)
    perm = jnp.zeros((T * BP, B * T), f32).at[rows, cols].set(1.0)

    wide = jnp.zeros((WIDE_ROWS, H8), f32)
    wide = wide.at[ROW_P:ROW_P + T * BP, 0:B * T].set(perm)
    wide = wide.at[ROW_EMBP:ROW_EMBP + V, :].set(emb_proj)
    wide = wide.at[ROW_WHH:ROW_WHH + H2, :].set(whh_bd)
    wide = wide.at[ROW_BIAS, :].set(b_cat)

    trans = p["trans"]
    smalls = jnp.zeros((SMALL_ROWS, L), f32)
    smalls = smalls.at[ROW_FCW:ROW_FCW + H2, :].set(p["fc_w"].T)
    smalls = smalls.at[ROW_TRT:ROW_TRT + L, :].set(trans.T)
    smalls = smalls.at[ROW_BOS, :].set(trans[BOS_TAG, :])
    smalls = smalls.at[ROW_EOS, :].set(trans[:, EOS_TAG])
    smalls = smalls.at[ROW_FCB, :].set(p["fc_b"])
    return wide, smalls


# =============================================================================
# Forward wrapper (tokens enter batch-first; only a free trailing-dim reshape)
# =============================================================================
def bilstm_crf_forward(tokens, params):
    wide, smalls = pack_constants(params)          # jit constants (params closed over)
    tok3 = tokens[:, :, None].astype(jnp.int32)    # (B, T, 1) — layout-only reshape

    score, path = pl.pallas_call(
        bilstm_crf_kernel,
        out_shape=(jax.ShapeDtypeStruct((B, 1), jnp.float32),
                   jax.ShapeDtypeStruct((B, T), jnp.int32)),
        in_specs=[_VMEM, _VMEM, _VMEM],
        out_specs=(_VMEM, _VMEM),
        scratch_shapes=[pltpu.VMEM((T, BP, H8), jnp.float32),      # pre-gates
                        pltpu.VMEM((T, BP, H), jnp.float32),       # fwd hiddens
                        pltpu.VMEM((T, BP, H), jnp.float32)],      # bwd hiddens
    )(tok3, wide, smalls)

    # score: (B,) float32 ; path: (B, T) int32, padded with PAD_TAG past length
    return score[:, 0], path


if __name__ == "__main__":
    key = jax.random.PRNGKey(0)
    pkey, tkey = jax.random.split(key)
    params = init_params(pkey)

    # deterministic token ids with trailing padding
    seq_lens = jnp.array([8, 6, 5, 3], dtype=jnp.int32)
    toks = jax.random.randint(tkey, (B, T), 1, V, dtype=jnp.int32)
    pos = jnp.arange(T)[None, :]
    tokens = jnp.where(pos < seq_lens[:, None], toks, PAD_TOKEN)

    fwd = jax.jit(lambda t: bilstm_crf_forward(t, params))
    score, path = fwd(tokens)
    jax.block_until_ready((score, path))
    print("KERNEL_OK")
</pallas_src>

<mosaic_0001>
module attributes {stable_mosaic.version = 11 : i64} {
  func.func @bilstm_crf_kernel(%arg0: memref<4x8x1xi32, #tpu.memory_space<vmem>>, %arg1: memref<160x256xf32, #tpu.memory_space<vmem>>, %arg2: memref<96x8xf32, #tpu.memory_space<vmem>>, %arg3: memref<4x1xf32, #tpu.memory_space<vmem>>, %arg4: memref<4x8xi32, #tpu.memory_space<vmem>>, %arg5: memref<8x8x256xf32, #tpu.memory_space<vmem>>, %arg6: memref<8x8x32xf32, #tpu.memory_space<vmem>>, %arg7: memref<8x8x32xf32, #tpu.memory_space<vmem>>) attributes {dimension_semantics = [], scalar_prefetch = 0 : i64, scratch_operands = 3 : i64, tpu.core_type = #tpu.core_type<tc>} {
    %c0 = arith.constant 0 : index
    %c0_0 = arith.constant 0 : index
    %c0_1 = arith.constant 0 : index
    %0 = vector.load %arg0[%c0, %c0_0, %c0_1] : memref<4x8x1xi32, #tpu.memory_space<vmem>>, vector<4x8x1xi32>
    %1 = tpu.iota {dimensions = array<i32: 2>} : vector<4x8x20xi32>
    %2 = vector.broadcast %0 : vector<4x8x1xi32> to vector<4x8x20xi32>
    %3 = arith.cmpi eq, %2, %1 : vector<4x8x20xi32>
    %4 = arith.extui %3 : vector<4x8x20xi1> to vector<4x8x20xi32>
    %5 = arith.sitofp %4 : vector<4x8x20xi32> to vector<4x8x20xf32>
    %6 = vector.shape_cast %5 : vector<4x8x20xf32> to vector<32x20xf32>
    %c0_2 = arith.constant 0 : index
    %c0_3 = arith.constant 0 : index
    %7 = vector.load %arg1[%c0_2, %c0_3] : memref<160x256xf32, #tpu.memory_space<vmem>>, vector<64x32xf32>
    %cst = arith.constant dense<0.000000e+00> : vector<64x20xf32>
    %8 = tpu.matmul %7, %6, %cst {dimension_numbers = #tpu.dot_dimension_numbers<[1], [0], [0], [1], [0, 0, 1, 1], [], []>} : vector<64x32xf32>, vector<32x20xf32>, vector<64x20xf32> -> vector<64x20xf32>
    %c64 = arith.constant 64 : index
    %c0_4 = arith.constant 0 : index
    %9 = vector.load %arg1[%c64, %c0_4] : memref<160x256xf32, #tpu.memory_space<vmem>>, vector<20x256xf32>
    %cst_5 = arith.constant dense<0.000000e+00> : vector<64x256xf32>
    %10 = tpu.matmul %8, %9, %cst_5 {dimension_numbers = #tpu.dot_dimension_numbers<[1], [0], [0], [1], [0, 0, 1, 1], [], []>} : vector<64x20xf32>, vector<20x256xf32>, vector<64x256xf32> -> vector<64x256xf32>
    %11 = vector.shape_cast %10 : vector<64x256xf32> to vector<8x8x256xf32>
    %c0_6 = arith.constant 0 : index
    %c0_7 = arith.constant 0 : index
    %c0_8 = arith.constant 0 : index
    %12 = vector.load %arg5[%c0_6, %c0_7, %c0_8] : memref<8x8x256xf32, #tpu.memory_space<vmem>>, vector<8x8x256xf32>
    tpu.vector_store %arg5[%c0_6, %c0_7, %c0_8], %11 {strides = array<i32>} : memref<8x8x256xf32, #tpu.memory_space<vmem>>, vector<8x8x256xf32>,
    %cst_9 = arith.constant dense<0.000000e+00> : vector<64xf32>
    %13 = vector.multi_reduction <add>, %8, %cst_9 [1] : vector<64x20xf32> to vector<64xf32>
    %14 = vector.shape_cast %13 : vector<64xf32> to vector<64x1xf32>
    %15 = vector.extract_strided_slice %8 {offsets = [0, 0], sizes = [64, 1], strides = [1, 1]} : vector<64x20xf32> to vector<64x1xf32>
    %16 = arith.subf %14, %15 : vector<64x1xf32>
    %17 = vector.shape_cast %16 : vector<64x1xf32> to vector<8x8x1xf32>
    %c88 = arith.constant 88 : index
    %c0_10 = arith.constant 0 : index
    %18 = vector.load %arg1[%c88, %c0_10] : memref<160x256xf32, #tpu.memory_space<vmem>>, vector<64x256xf32>
    %c152 = arith.constant 152 : index
    %c0_11 = arith.constant 0 : index
    %19 = vector.load %arg1[%c152, %c0_11] : memref<160x256xf32, #tpu.memory_space<vmem>>, vector<1x256xf32>
    %20 = tpu.iota {dimensions = array<i32: 1>} : vector<8x256xi32>
    %c32_i32 = arith.constant 32 : i32
    %21 = vector.broadcast %c32_i32 : i32 to vector<8x256xi32>
    %22 = arith.andi %20, %21 : vector<8x256xi32>
    %c0_i32 = arith.constant 0 : i32
    %23 = vector.broadcast %c0_i32 : i32 to vector<8x256xi32>
    %24 = arith.cmpi eq, %22, %23 : vector<8x256xi32>
    %cst_12 = arith.constant 0.000000e+00 : f32
    %25 = vector.broadcast %cst_12 : f32 to vector<8x64xf32>
    %cst_13 = arith.constant 0.000000e+00 : f32
    %26 = vector.broadcast %cst_13 : f32 to vector<8x64xf32>
    %c0_14 = arith.constant 0 : index
    %c0_15 = arith.constant 0 : index
    %c0_16 = arith.constant 0 : index
    %27 = vector.load %arg5[%c0_14, %c0_15, %c0_16] : memref<8x8x256xf32, #tpu.memory_space<vmem>>, vector<1x8x256xf32>
    %28 = vector.shape_cast %27 : vector<1x8x256xf32> to vector<8x256xf32>
    %c7 = arith.constant 7 : index
    %c0_17 = arith.constant 0 : index
    %c0_18 = arith.constant 0 : index
    %29 = vector.load %arg5[%c7, %c0_17, %c0_18] : memref<8x8x256xf32, #tpu.memory_space<vmem>>, vector<1x8x256xf32>
    %30 = vector.shape_cast %29 : vector<1x8x256xf32> to vector<8x256xf32>
    %31 = arith.select %24, %28, %30 : vector<8x256xi1>, vector<8x256xf32>
    %cst_19 = arith.constant dense<0.000000e+00> : vector<8x256xf32>
    %32 = tpu.matmul %25, %18, %cst_19 {dimension_numbers = #tpu.dot_dimension_numbers<[1], [0], [0], [1], [0, 0, 1, 1], [], []>} : vector<8x64xf32>, vector<64x256xf32>, vector<8x256xf32> -> vector<8x256xf32>
    %33 = arith.addf %31, %32 : vector<8x256xf32>
    %34 = vector.broadcast %19 : vector<1x256xf32> to vector<8x256xf32>
    %35 = arith.addf %33, %34 : vector<8x256xf32>
    %36 = arith.negf %35 : vector<8x256xf32>
    %37 = math.exp %36 : vector<8x256xf32>
    %cst_20 = arith.constant 1.000000e+00 : f32
    %38 = vector.broadcast %cst_20 : f32 to vector<8x256xf32>
    %39 = arith.addf %38, %37 : vector<8x256xf32>
    %40 = arith.divf %38, %39 : vector<8x256xf32>
    %41 = math.tanh %35 : vector<8x256xf32>
    %42 = vector.extract_strided_slice %40 {offsets = [0, 0], sizes = [8, 64], strides = [1, 1]} : vector<8x256xf32> to vector<8x64xf32>
    %43 = vector.extract_strided_slice %40 {offsets = [0, 64], sizes = [8, 64], strides = [1, 1]} : vector<8x256xf32> to vector<8x64xf32>
    %44 = vector.extract_strided_slice %41 {offsets = [0, 128], sizes = [8, 64], strides = [1, 1]} : vector<8x256xf32> to vector<8x64xf32>
    %45 = vector.extract_strided_slice %40 {offsets = [0, 192], sizes = [8, 64], strides = [1, 1]} : vector<8x256xf32> to vector<8x64xf32>
    %46 = arith.mulf %43, %26 : vector<8x64xf32>
    %47 = arith.mulf %42, %44 : vector<8x64xf32>
    %48 = arith.addf %46, %47 : vector<8x64xf32>
    %49 = math.tanh %48 : vector<8x64xf32>
    %50 = arith.mulf %45, %49 : vector<8x64xf32>
    %51 = vector.extract_strided_slice %50 {offsets = [0, 0], sizes = [8, 32], strides = [1, 1]} : vector<8x64xf32> to vector<8x32xf32>
    %c0_21 = arith.constant 0 : index
    %c0_22 = arith.constant 0 : index
    %c0_23 = arith.constant 0 : index
    %52 = vector.load %arg6[%c0_21, %c0_22, %c0_23] : memref<8x8x32xf32, #tpu.memory_space<vmem>>, vector<1x8x32xf32>
    %53 = vector.shape_cast %52 : vector<1x8x32xf32> to vector<8x32xf32>
    %54 = vector.shape_cast %51 : vector<8x32xf32> to vector<1x8x32xf32>
    tpu.vector_store %arg6[%c0_21, %c0_22, %c0_23], %54 {strides = array<i32>} : memref<8x8x32xf32, #tpu.memory_space<vmem>>, vector<1x8x32xf32>,
    %55 = vector.extract_strided_slice %50 {offsets = [0, 32], sizes = [8, 32], strides = [1, 1]} : vector<8x64xf32> to vector<8x32xf32>
    %c7_24 = arith.constant 7 : index
    %c0_25 = arith.constant 0 : index
    %c0_26 = arith.constant 0 : index
    %56 = vector.load %arg7[%c7_24, %c0_25, %c0_26] : memref<8x8x32xf32, #tpu.memory_space<vmem>>, vector<1x8x32xf32>
    %57 = vector.shape_cast %56 : vector<1x8x32xf32> to vector<8x32xf32>
    %58 = vector.shape_cast %55 : vector<8x32xf32> to vector<1x8x32xf32>
    tpu.vector_store %arg7[%c7_24, %c0_25, %c0_26], %58 {strides = array<i32>} : memref<8x8x32xf32, #tpu.memory_space<vmem>>, vector<1x8x32xf32>,
    %c1 = arith.constant 1 : index
    %c0_27 = arith.constant 0 : index
    %c0_28 = arith.constant 0 : index
    %59 = vector.load %arg5[%c1, %c0_27, %c0_28] : memref<8x8x256xf32, #tpu.memory_space<vmem>>, vector<1x8x256xf32>
    %60 = vector.shape_cast %59 : vector<1x8x256xf32> to vector<8x256xf32>
    %c6 = arith.constant 6 : index
    %c0_29 = arith.constant 0 : index
    %c0_30 = arith.constant 0 : index
    %61 = vector.load %arg5[%c6, %c0_29, %c0_30] : memref<8x8x256xf32, #tpu.memory_space<vmem>>, vector<1x8x256xf32>
    %62 = vector.shape_cast %61 : vector<1x8x256xf32> to vector<8x256xf32>
    %63 = arith.select %24, %60, %62 : vector<8x256xi1>, vector<8x256xf32>
    %cst_31 = arith.constant dense<0.000000e+00> : vector<8x256xf32>
    %64 = tpu.matmul %50, %18, %cst_31 {dimension_numbers = #tpu.dot_dimension_numbers<[1], [0], [0], [1], [0, 0, 1, 1], [], []>} : vector<8x64xf32>, vector<64x256xf32>, vector<8x256xf32> -> vector<8x256xf32>
    %65 = arith.addf %63, %64 : vector<8x256xf32>
    %66 = vector.broadcast %19 : vector<1x256xf32> to vector<8x256xf32>
    %67 = arith.addf %65, %66 : vector<8x256xf32>
    %68 = arith.negf %67 : vector<8x256xf32>
    %69 = math.exp %68 : vector<8x256xf32>
    %cst_32 = arith.constant 1.000000e+00 : f32
    %70 = vector.broadcast %cst_32 : f32 to vector<8x256xf32>
    %71 = arith.addf %70, %69 : vector<8x256xf32>
    %72 = arith.divf %70, %71 : vector<8x256xf32>
    %73 = math.tanh %67 : vector<8x256xf32>
    %74 = vector.extract_strided_slice %72 {offsets = [0, 0], sizes = [8, 64], strides = [1, 1]} : vector<8x256xf32> to vector<8x64xf32>
    %75 = vector.extract_strided_slice %72 {offsets = [0, 64], sizes = [8, 64], strides = [1, 1]} : vector<8x256xf32> to vector<8x64xf32>
    %76 = vector.extract_strided_slice %73 {offsets = [0, 128], sizes = [8, 64], strides = [1, 1]} : vector<8x256xf32> to vector<8x64xf32>
    %77 = vector.extract_strided_slice %72 {offsets = [0, 192], sizes = [8, 64], strides = [1, 1]} : vector<8x256xf32> to vector<8x64xf32>
    %78 = arith.mulf %75, %48 : vector<8x64xf32>
    %79 = arith.mulf %74, %76 : vector<8x64xf32>
    %80 = arith.addf %78, %79 : vector<8x64xf32>
    %81 = math.tanh %80 : vector<8x64xf32>
    %82 = arith.mulf %77, %81 : vector<8x64xf32>
    %83 = vector.extract_strided_slice %82 {offsets = [0, 0], sizes = [8, 32], strides = [1, 1]} : vector<8x64xf32> to vector<8x32xf32>
    %c1_33 = arith.constant 1 : index
    %c0_34 = arith.constant 0 : index
    %c0_35 = arith.constant 0 : index
    %84 = vector.load %arg6[%c1_33, %c0_34, %c0_35] : memref<8x8x32xf32, #tpu.memory_space<vmem>>, vector<1x8x32xf32>
    %85 = vector.shape_cast %84 : vector<1x8x32xf32> to vector<8x32xf32>
    %86 = vector.shape_cast %83 : vector<8x32xf32> to vector<1x8x32xf32>
    tpu.vector_store %arg6[%c1_33, %c0_34, %c0_35], %86 {strides = array<i32>} : memref<8x8x32xf32, #tpu.memory_space<vmem>>, vector<1x8x32xf32>,
    %87 = vector.extract_strided_slice %82 {offsets = [0, 32], sizes = [8, 32], strides = [1, 1]} : vector<8x64xf32> to vector<8x32xf32>
    %c6_36 = arith.constant 6 : index
    %c0_37 = arith.constant 0 : index
    %c0_38 = arith.constant 0 : index
    %88 = vector.load %arg7[%c6_36, %c0_37, %c0_38] : memref<8x8x32xf32, #tpu.memory_space<vmem>>, vector<1x8x32xf32>
    %89 = vector.shape_cast %88 : vector<1x8x32xf32> to vector<8x32xf32>
    %90 = vector.shape_cast %87 : vector<8x32xf32> to vector<1x8x32xf32>
    tpu.vector_store %arg7[%c6_36, %c0_37, %c0_38], %90 {strides = array<i32>} : memref<8x8x32xf32, #tpu.memory_space<vmem>>, vector<1x8x32xf32>,
    %c2 = arith.constant 2 : index
    %c0_39 = arith.constant 0 : index
    %c0_40 = arith.constant 0 : index
    %91 = vector.load %arg5[%c2, %c0_39, %c0_40] : memref<8x8x256xf32, #tpu.memory_space<vmem>>, vector<1x8x256xf32>
    %92 = vector.shape_cast %91 : vector<1x8x256xf32> to vector<8x256xf32>
    %c5 = arith.constant 5 : index
    %c0_41 = arith.constant 0 : index
    %c0_42 = arith.constant 0 : index
    %93 = vector.load %arg5[%c5, %c0_41, %c0_42] : memref<8x8x256xf32, #tpu.memory_space<vmem>>, vector<1x8x256xf32>
    %94 = vector.shape_cast %93 : vector<1x8x256xf32> to vector<8x256xf32>
    %95 = arith.select %24, %92, %94 : vector<8x256xi1>, vector<8x256xf32>
    %cst_43 = arith.constant dense<0.000000e+00> : vector<8x256xf32>
    %96 = tpu.matmul %82, %18, %cst_43 {dimension_numbers = #tpu.dot_dimension_numbers<[1], [0], [0], [1], [0, 0, 1, 1], [], []>} : vector<8x64xf32>, vector<64x256xf32>, vector<8x256xf32> -> vector<8x256xf32>
    %97 = arith.addf %95, %96 : vector<8x256xf32>
    %98 = vector.broadcast %19 : vector<1x256xf32> to vector<8x256xf32>
    %99 = arith.addf %97, %98 : vector<8x256xf32>
    %100 = arith.negf %99 : vector<8x256xf32>
    %101 = math.exp %100 : vector<8x256xf32>
    %cst_44 = arith.constant 1.000000e+00 : f32
    %102 = vector.broadcast %cst_44 : f32 to vector<8x256xf32>
    %103 = arith.addf %102, %101 : vector<8x256xf32>
    %104 = arith.divf %102, %103 : vector<8x256xf32>
    %105 = math.tanh %99 : vector<8x256xf32>
    %106 = vector.extract_strided_slice %104 {offsets = [0, 0], sizes = [8, 64], strides = [1, 1]} : vector<8x256xf32> to vector<8x64xf32>
    %107 = vector.extract_strided_slice %104 {offsets = [0, 64], sizes = [8, 64], strides = [1, 1]} : vector<8x256xf32> to vector<8x64xf32>
    %108 = vector.extract_strided_slice %105 {offsets = [0, 128], sizes = [8, 64], strides = [1, 1]} : vector<8x256xf32> to vector<8x64xf32>
    %109 = vector.extract_strided_slice %104 {offsets = [0, 192], sizes = [8, 64], strides = [1, 1]} : vector<8x256xf32> to vector<8x64xf32>
    %110 = arith.mulf %107, %80 : vector<8x64xf32>
    %111 = arith.mulf %106, %108 : vector<8x64xf32>
    %112 = arith.addf %110, %111 : vector<8x64xf32>
    %113 = math.tanh %112 : vector<8x64xf32>
    %114 = arith.mulf %109, %113 : vector<8x64xf32>
    %115 = vector.extract_strided_slice %114 {offsets = [0, 0], sizes = [8, 32], strides = [1, 1]} : vector<8x64xf32> to vector<8x32xf32>
    %c2_45 = arith.constant 2 : index
    %c0_46 = arith.constant 0 : index
    %c0_47 = arith.constant 0 : index
    %116 = vector.load %arg6[%c2_45, %c0_46, %c0_47] : memref<8x8x32xf32, #tpu.memory_space<vmem>>, vector<1x8x32xf32>
    %117 = vector.shape_cast %116 : vector<1x8x32xf32> to vector<8x32xf32>
    %118 = vector.shape_cast %115 : vector<8x32xf32> to vector<1x8x32xf32>
    tpu.vector_store %arg6[%c2_45, %c0_46, %c0_47], %118 {strides = array<i32>} : memref<8x8x32xf32, #tpu.memory_space<vmem>>, vector<1x8x32xf32>,
    %119 = vector.extract_strided_slice %114 {offsets = [0, 32], sizes = [8, 32], strides = [1, 1]} : vector<8x64xf32> to vector<8x32xf32>
    %c5_48 = arith.constant 5 : index
    %c0_49 = arith.constant 0 : index
    %c0_50 = arith.constant 0 : index
    %120 = vector.load %arg7[%c5_48, %c0_49, %c0_50] : memref<8x8x32xf32, #tpu.memory_space<vmem>>, vector<1x8x32xf32>
    %121 = vector.shape_cast %120 : vector<1x8x32xf32> to vector<8x32xf32>
    %122 = vector.shape_cast %119 : vector<8x32xf32> to vector<1x8x32xf32>
    tpu.vector_store %arg7[%c5_48, %c0_49, %c0_50], %122 {strides = array<i32>} : memref<8x8x32xf32, #tpu.memory_space<vmem>>, vector<1x8x32xf32>,
    %c3 = arith.constant 3 : index
    %c0_51 = arith.constant 0 : index
    %c0_52 = arith.constant 0 : index
    %123 = vector.load %arg5[%c3, %c0_51, %c0_52] : memref<8x8x256xf32, #tpu.memory_space<vmem>>, vector<1x8x256xf32>
    %124 = vector.shape_cast %123 : vector<1x8x256xf32> to vector<8x256xf32>
    %c4 = arith.constant 4 : index
    %c0_53 = arith.constant 0 : index
    %c0_54 = arith.constant 0 : index
    %125 = vector.load %arg5[%c4, %c0_53, %c0_54] : memref<8x8x256xf32, #tpu.memory_space<vmem>>, vector<1x8x256xf32>
    %126 = vector.shape_cast %125 : vector<1x8x256xf32> to vector<8x256xf32>
    %127 = arith.select %24, %124, %126 : vector<8x256xi1>, vector<8x256xf32>
    %cst_55 = arith.constant dense<0.000000e+00> : vector<8x256xf32>
    %128 = tpu.matmul %114, %18, %cst_55 {dimension_numbers = #tpu.dot_dimension_numbers<[1], [0], [0], [1], [0, 0, 1, 1], [], []>} : vector<8x64xf32>, vector<64x256xf32>, vector<8x256xf32> -> vector<8x256xf32>
    %129 = arith.addf %127, %128 : vector<8x256xf32>
    %130 = vector.broadcast %19 : vector<1x256xf32> to vector<8x256xf32>
    %131 = arith.addf %129, %130 : vector<8x256xf32>
    %132 = arith.negf %131 : vector<8x256xf32>
    %133 = math.exp %132 : vector<8x256xf32>
    %cst_56 = arith.constant 1.000000e+00 : f32
    %134 = vector.broadcast %cst_56 : f32 to vector<8x256xf32>
    %135 = arith.addf %134, %133 : vector<8x256xf32>
    %136 = arith.divf %134, %135 : vector<8x256xf32>
    %137 = math.tanh %131 : vector<8x256xf32>
    %138 = vector.extract_strided_slice %136 {offsets = [0, 0], sizes = [8, 64], strides = [1, 1]} : vector<8x256xf32> to vector<8x64xf32>
    %139 = vector.extract_strided_slice %136 {offsets = [0, 64], sizes = [8, 64], strides = [1, 1]} : vector<8x256xf32> to vector<8x64xf32>
    %140 = vector.extract_strided_slice %137 {offsets = [0, 128], sizes = [8, 64], strides = [1, 1]} : vector<8x256xf32> to vector<8x64xf32>
    %141 = vector.extract_strided_slice %136 {offsets = [0, 192], sizes = [8, 64], strides = [1, 1]} : vector<8x256xf32> to vector<8x64xf32>
    %142 = arith.mulf %139, %112 : vector<8x64xf32>
    %143 = arith.mulf %138, %140 : vector<8x64xf32>
    %144 = arith.addf %142, %143 : vector<8x64xf32>
    %145 = math.tanh %144 : vector<8x64xf32>
    %146 = arith.mulf %141, %145 : vector<8x64xf32>
    %147 = vector.extract_strided_slice %146 {offsets = [0, 0], sizes = [8, 32], strides = [1, 1]} : vector<8x64xf32> to vector<8x32xf32>
    %c3_57 = arith.constant 3 : index
    %c0_58 = arith.constant 0 : index
    %c0_59 = arith.constant 0 : index
    %148 = vector.load %arg6[%c3_57, %c0_58, %c0_59] : memref<8x8x32xf32, #tpu.memory_space<vmem>>, vector<1x8x32xf32>
    %149 = vector.shape_cast %148 : vector<1x8x32xf32> to vector<8x32xf32>
    %150 = vector.shape_cast %147 : vector<8x32xf32> to vector<1x8x32xf32>
    tpu.vector_store %arg6[%c3_57, %c0_58, %c0_59], %150 {strides = array<i32>} : memref<8x8x32xf32, #tpu.memory_space<vmem>>, vector<1x8x32xf32>,
    %151 = vector.extract_strided_slice %146 {offsets = [0, 32], sizes = [8, 32], strides = [1, 1]} : vector<8x64xf32> to vector<8x32xf32>
    %c4_60 = arith.constant 4 : index
    %c0_61 = arith.constant 0 : index
    %c0_62 = arith.constant 0 : index
    %152 = vector.load %arg7[%c4_60, %c0_61, %c0_62] : memref<8x8x32xf32, #tpu.memory_space<vmem>>, vector<1x8x32xf32>
    %153 = vector.shape_cast %152 : vector<1x8x32xf32> to vector<8x32xf32>
    %154 = vector.shape_cast %151 : vector<8x32xf32> to vector<1x8x32xf32>
    tpu.vector_store %arg7[%c4_60, %c0_61, %c0_62], %154 {strides = array<i32>} : memref<8x8x32xf32, #tpu.memory_space<vmem>>, vector<1x8x32xf32>,
    %c4_63 = arith.constant 4 : index
    %c0_64 = arith.constant 0 : index
    %c0_65 = arith.constant 0 : index
    %155 = vector.load %arg5[%c4_63, %c0_64, %c0_65] : memref<8x8x256xf32, #tpu.memory_space<vmem>>, vector<1x8x256xf32>
    %156 = vector.shape_cast %155 : vector<1x8x256xf32> to vector<8x256xf32>
    %c3_66 = arith.constant 3 : index
    %c0_67 = arith.constant 0 : index
    %c0_68 = arith.constant 0 : index
    %157 = vector.load %arg5[%c3_66, %c0_67, %c0_68] : memref<8x8x256xf32, #tpu.memory_space<vmem>>, vector<1x8x256xf32>
    %158 = vector.shape_cast %157 : vector<1x8x256xf32> to vector<8x256xf32>
    %159 = arith.select %24, %156, %158 : vector<8x256xi1>, vector<8x256xf32>
    %cst_69 = arith.constant dense<0.000000e+00> : vector<8x256xf32>
    %160 = tpu.matmul %146, %18, %cst_69 {dimension_numbers = #tpu.dot_dimension_numbers<[1], [0], [0], [1], [0, 0, 1, 1], [], []>} : vector<8x64xf32>, vector<64x256xf32>, vector<8x256xf32> -> vector<8x256xf32>
    %161 = arith.addf %159, %160 : vector<8x256xf32>
    %162 = vector.broadcast %19 : vector<1x256xf32> to vector<8x256xf32>
    %163 = arith.addf %161, %162 : vector<8x256xf32>
    %164 = arith.negf %163 : vector<8x256xf32>
    %165 = math.exp %164 : vector<8x256xf32>
    %cst_70 = arith.constant 1.000000e+00 : f32
    %166 = vector.broadcast %cst_70 : f32 to vector<8x256xf32>
    %167 = arith.addf %166, %165 : vector<8x256xf32>
    %168 = arith.divf %166, %167 : vector<8x256xf32>
    %169 = math.tanh %163 : vector<8x256xf32>
    %170 = vector.extract_strided_slice %168 {offsets = [0, 0], sizes = [8, 64], strides = [1, 1]} : vector<8x256xf32> to vector<8x64xf32>
    %171 = vector.extract_strided_slice %168 {offsets = [0, 64], sizes = [8, 64], strides = [1, 1]} : vector<8x256xf32> to vector<8x64xf32>
    %172 = vector.extract_strided_slice %169 {offsets = [0, 128], sizes = [8, 64], strides = [1, 1]} : vector<8x256xf32> to vector<8x64xf32>
    %173 = vector.extract_strided_slice %168 {offsets = [0, 192], sizes = [8, 64], strides = [1, 1]} : vector<8x256xf32> to vector<8x64xf32>
    %174 = arith.mulf %171, %144 : vector<8x64xf32>
    %175 = arith.mulf %170, %172 : vector<8x64xf32>
    %176 = arith.addf %174, %175 : vector<8x64xf32>
    %177 = math.tanh %176 : vector<8x64xf32>
    %178 = arith.mulf %173, %177 : vector<8x64xf32>
    %179 = vector.extract_strided_slice %178 {offsets = [0, 0], sizes = [8, 32], strides = [1, 1]} : vector<8x64xf32> to vector<8x32xf32>
    %c4_71 = arith.constant 4 : index
    %c0_72 = arith.constant 0 : index
    %c0_73 = arith.constant 0 : index
    %180 = vector.load %arg6[%c4_71, %c0_72, %c0_73] : memref<8x8x32xf32, #tpu.memory_space<vmem>>, vector<1x8x32xf32>
    %181 = vector.shape_cast %180 : vector<1x8x32xf32> to vector<8x32xf32>
    %182 = vector.shape_cast %179 : vector<8x32xf32> to vector<1x8x32xf32>
    tpu.vector_store %arg6[%c4_71, %c0_72, %c0_73], %182 {strides = array<i32>} : memref<8x8x32xf32, #tpu.memory_space<vmem>>, vector<1x8x32xf32>,
    %183 = vector.extract_strided_slice %178 {offsets = [0, 32], sizes = [8, 32], strides = [1, 1]} : vector<8x64xf32> to vector<8x32xf32>
    %c3_74 = arith.constant 3 : index
    %c0_75 = arith.constant 0 : index
    %c0_76 = arith.constant 0 : index
    %184 = vector.load %arg7[%c3_74, %c0_75, %c0_76] : memref<8x8x32xf32, #tpu.memory_space<vmem>>, vector<1x8x32xf32>
    %185 = vector.shape_cast %184 : vector<1x8x32xf32> to vector<8x32xf32>
    %186 = vector.shape_cast %183 : vector<8x32xf32> to vector<1x8x32xf32>
    tpu.vector_store %arg7[%c3_74, %c0_75, %c0_76], %186 {strides = array<i32>} : memref<8x8x32xf32, #tpu.memory_space<vmem>>, vector<1x8x32xf32>,
    %c5_77 = arith.constant 5 : index
    %c0_78 = arith.constant 0 : index
    %c0_79 = arith.constant 0 : index
    %187 = vector.load %arg5[%c5_77, %c0_78, %c0_79] : memref<8x8x256xf32, #tpu.memory_space<vmem>>, vector<1x8x256xf32>
    %188 = vector.shape_cast %187 : vector<1x8x256xf32> to vector<8x256xf32>
    %c2_80 = arith.constant 2 : index
    %c0_81 = arith.constant 0 : index
    %c0_82 = arith.constant 0 : index
    %189 = vector.load %arg5[%c2_80, %c0_81, %c0_82] : memref<8x8x256xf32, #tpu.memory_space<vmem>>, vector<1x8x256xf32>
    %190 = vector.shape_cast %189 : vector<1x8x256xf32> to vector<8x256xf32>
    %191 = arith.select %24, %188, %190 : vector<8x256xi1>, vector<8x256xf32>
    %cst_83 = arith.constant dense<0.000000e+00> : vector<8x256xf32>
    %192 = tpu.matmul %178, %18, %cst_83 {dimension_numbers = #tpu.dot_dimension_numbers<[1], [0], [0], [1], [0, 0, 1, 1], [], []>} : vector<8x64xf32>, vector<64x256xf32>, vector<8x256xf32> -> vector<8x256xf32>
    %193 = arith.addf %191, %192 : vector<8x256xf32>
    %194 = vector.broadcast %19 : vector<1x256xf32> to vector<8x256xf32>
    %195 = arith.addf %193, %194 : vector<8x256xf32>
    %196 = arith.negf %195 : vector<8x256xf32>
    %197 = math.exp %196 : vector<8x256xf32>
    %cst_84 = arith.constant 1.000000e+00 : f32
    %198 = vector.broadcast %cst_84 : f32 to vector<8x256xf32>
    %199 = arith.addf %198, %197 : vector<8x256xf32>
    %200 = arith.divf %198, %199 : vector<8x256xf32>
    %201 = math.tanh %195 : vector<8x256xf32>
    %202 = vector.extract_strided_slice %200 {offsets = [0, 0], sizes = [8, 64], strides = [1, 1]} : vector<8x256xf32> to vector<8x64xf32>
    %203 = vector.extract_strided_slice %200 {offsets = [0, 64], sizes = [8, 64], strides = [1, 1]} : vector<8x256xf32> to vector<8x64xf32>
    %204 = vector.extract_strided_slice %201 {offsets = [0, 128], sizes = [8, 64], strides = [1, 1]} : vector<8x256xf32> to vector<8x64xf32>
    %205 = vector.extract_strided_slice %200 {offsets = [0, 192], sizes = [8, 64], strides = [1, 1]} : vector<8x256xf32> to vector<8x64xf32>
    %206 = arith.mulf %203, %176 : vector<8x64xf32>
    %207 = arith.mulf %202, %204 : vector<8x64xf32>
    %208 = arith.addf %206, %207 : vector<8x64xf32>
    %209 = math.tanh %208 : vector<8x64xf32>
    %210 = arith.mulf %205, %209 : vector<8x64xf32>
    %211 = vector.extract_strided_slice %210 {offsets = [0, 0], sizes = [8, 32], strides = [1, 1]} : vector<8x64xf32> to vector<8x32xf32>
    %c5_85 = arith.constant 5 : index
    %c0_86 = arith.constant 0 : index
    %c0_87 = arith.constant 0 : index
    %212 = vector.load %arg6[%c5_85, %c0_86, %c0_87] : memref<8x8x32xf32, #tpu.memory_space<vmem>>, vector<1x8x32xf32>
    %213 = vector.shape_cast %212 : vector<1x8x32xf32> to vector<8x32xf32>
    %214 = vector.shape_cast %211 : vector<8x32xf32> to vector<1x8x32xf32>
    tpu.vector_store %arg6[%c5_85, %c0_86, %c0_87], %214 {strides = array<i32>} : memref<8x8x32xf32, #tpu.memory_space<vmem>>, vector<1x8x32xf32>,
    %215 = vector.extract_strided_slice %210 {offsets = [0, 32], sizes = [8, 32], strides = [1, 1]} : vector<8x64xf32> to vector<8x32xf32>
    %c2_88 = arith.constant 2 : index
    %c0_89 = arith.constant 0 : index
    %c0_90 = arith.constant 0 : index
    %216 = vector.load %arg7[%c2_88, %c0_89, %c0_90] : memref<8x8x32xf32, #tpu.memory_space<vmem>>, vector<1x8x32xf32>
    %217 = vector.shape_cast %216 : vector<1x8x32xf32> to vector<8x32xf32>
    %218 = vector.shape_cast %215 : vector<8x32xf32> to vector<1x8x32xf32>
    tpu.vector_store %arg7[%c2_88, %c0_89, %c0_90], %218 {strides = array<i32>} : memref<8x8x32xf32, #tpu.memory_space<vmem>>, vector<1x8x32xf32>,
    %c6_91 = arith.constant 6 : index
    %c0_92 = arith.constant 0 : index
    %c0_93 = arith.constant 0 : index
    %219 = vector.load %arg5[%c6_91, %c0_92, %c0_93] : memref<8x8x256xf32, #tpu.memory_space<vmem>>, vector<1x8x256xf32>
    %220 = vector.shape_cast %219 : vector<1x8x256xf32> to vector<8x256xf32>
    %c1_94 = arith.constant 1 : index
    %c0_95 = arith.constant 0 : index
    %c0_96 = arith.constant 0 : index
    %221 = vector.load %arg5[%c1_94, %c0_95, %c0_96] : memref<8x8x256xf32, #tpu.memory_space<vmem>>, vector<1x8x256xf32>
    %222 = vector.shape_cast %221 : vector<1x8x256xf32> to vector<8x256xf32>
    %223 = arith.select %24, %220, %222 : vector<8x256xi1>, vector<8x256xf32>
    %cst_97 = arith.constant dense<0.000000e+00> : vector<8x256xf32>
    %224 = tpu.matmul %210, %18, %cst_97 {dimension_numbers = #tpu.dot_dimension_numbers<[1], [0], [0], [1], [0, 0, 1, 1], [], []>} : vector<8x64xf32>, vector<64x256xf32>, vector<8x256xf32> -> vector<8x256xf32>
    %225 = arith.addf %223, %224 : vector<8x256xf32>
    %226 = vector.broadcast %19 : vector<1x256xf32> to vector<8x256xf32>
    %227 = arith.addf %225, %226 : vector<8x256xf32>
    %228 = arith.negf %227 : vector<8x256xf32>
    %229 = math.exp %228 : vector<8x256xf32>
    %cst_98 = arith.constant 1.000000e+00 : f32
    %230 = vector.broadcast %cst_98 : f32 to vector<8x256xf32>
    %231 = arith.addf %230, %229 : vector<8x256xf32>
    %232 = arith.divf %230, %231 : vector<8x256xf32>
    %233 = math.tanh %227 : vector<8x256xf32>
    %234 = vector.extract_strided_slice %232 {offsets = [0, 0], sizes = [8, 64], strides = [1, 1]} : vector<8x256xf32> to vector<8x64xf32>
    %235 = vector.extract_strided_slice %232 {offsets = [0, 64], sizes = [8, 64], strides = [1, 1]} : vector<8x256xf32> to vector<8x64xf32>
    %236 = vector.extract_strided_slice %233 {offsets = [0, 128], sizes = [8, 64], strides = [1, 1]} : vector<8x256xf32> to vector<8x64xf32>
    %237 = vector.extract_strided_slice %232 {offsets = [0, 192], sizes = [8, 64], strides = [1, 1]} : vector<8x256xf32> to vector<8x64xf32>
    %238 = arith.mulf %235, %208 : vector<8x64xf32>
    %239 = arith.mulf %234, %236 : vector<8x64xf32>
    %240 = arith.addf %238, %239 : vector<8x64xf32>
    %241 = math.tanh %240 : vector<8x64xf32>
    %242 = arith.mulf %237, %241 : vector<8x64xf32>
    %243 = vector.extract_strided_slice %242 {offsets = [0, 0], sizes = [8, 32], strides = [1, 1]} : vector<8x64xf32> to vector<8x32xf32>
    %c6_99 = arith.constant 6 : index
    %c0_100 = arith.constant 0 : index
    %c0_101 = arith.constant 0 : index
    %244 = vector.load %arg6[%c6_99, %c0_100, %c0_101] : memref<8x8x32xf32, #tpu.memory_space<vmem>>, vector<1x8x32xf32>
    %245 = vector.shape_cast %244 : vector<1x8x32xf32> to vector<8x32xf32>
    %246 = vector.shape_cast %243 : vector<8x32xf32> to vector<1x8x32xf32>
    tpu.vector_store %arg6[%c6_99, %c0_100, %c0_101], %246 {strides = array<i32>} : memref<8x8x32xf32, #tpu.memory_space<vmem>>, vector<1x8x32xf32>,
    %247 = vector.extract_strided_slice %242 {offsets = [0, 32], sizes = [8, 32], strides = [1, 1]} : vector<8x64xf32> to vector<8x32xf32>
    %c1_102 = arith.constant 1 : index
    %c0_103 = arith.constant 0 : index
    %c0_104 = arith.constant 0 : index
    %248 = vector.load %arg7[%c1_102, %c0_103, %c0_104] : memref<8x8x32xf32, #tpu.memory_space<vmem>>, vector<1x8x32xf32>
    %249 = vector.shape_cast %248 : vector<1x8x32xf32> to vector<8x32xf32>
    %250 = vector.shape_cast %247 : vector<8x32xf32> to vector<1x8x32xf32>
    tpu.vector_store %arg7[%c1_102, %c0_103, %c0_104], %250 {strides = array<i32>} : memref<8x8x32xf32, #tpu.memory_space<vmem>>, vector<1x8x32xf32>,
    %c7_105 = arith.constant 7 : index
    %c0_106 = arith.constant 0 : index
    %c0_107 = arith.constant 0 : index
    %251 = vector.load %arg5[%c7_105, %c0_106, %c0_107] : memref<8x8x256xf32, #tpu.memory_space<vmem>>, vector<1x8x256xf32>
    %252 = vector.shape_cast %251 : vector<1x8x256xf32> to vector<8x256xf32>
    %c0_108 = arith.constant 0 : index
    %c0_109 = arith.constant 0 : index
    %c0_110 = arith.constant 0 : index
    %253 = vector.load %arg5[%c0_108, %c0_109, %c0_110] : memref<8x8x256xf32, #tpu.memory_space<vmem>>, vector<1x8x256xf32>
    %254 = vector.shape_cast %253 : vector<1x8x256xf32> to vector<8x256xf32>
    %255 = arith.select %24, %252, %254 : vector<8x256xi1>, vector<8x256xf32>
    %cst_111 = arith.constant dense<0.000000e+00> : vector<8x256xf32>
    %256 = tpu.matmul %242, %18, %cst_111 {dimension_numbers = #tpu.dot_dimension_numbers<[1], [0], [0], [1], [0, 0, 1, 1], [], []>} : vector<8x64xf32>, vector<64x256xf32>, vector<8x256xf32> -> vector<8x256xf32>
    %257 = arith.addf %255, %256 : vector<8x256xf32>
    %258 = vector.broadcast %19 : vector<1x256xf32> to vector<8x256xf32>
    %259 = arith.addf %257, %258 : vector<8x256xf32>
    %260 = arith.negf %259 : vector<8x256xf32>
    %261 = math.exp %260 : vector<8x256xf32>
    %cst_112 = arith.constant 1.000000e+00 : f32
    %262 = vector.broadcast %cst_112 : f32 to vector<8x256xf32>
    %263 = arith.addf %262, %261 : vector<8x256xf32>
    %264 = arith.divf %262, %263 : vector<8x256xf32>
    %265 = math.tanh %259 : vector<8x256xf32>
    %266 = vector.extract_strided_slice %264 {offsets = [0, 0], sizes = [8, 64], strides = [1, 1]} : vector<8x256xf32> to vector<8x64xf32>
    %267 = vector.extract_strided_slice %264 {offsets = [0, 64], sizes = [8, 64], strides = [1, 1]} : vector<8x256xf32> to vector<8x64xf32>
    %268 = vector.extract_strided_slice %265 {offsets = [0, 128], sizes = [8, 64], strides = [1, 1]} : vector<8x256xf32> to vector<8x64xf32>
    %269 = vector.extract_strided_slice %264 {offsets = [0, 192], sizes = [8, 64], strides = [1, 1]} : vector<8x256xf32> to vector<8x64xf32>
    %270 = arith.mulf %267, %240 : vector<8x64xf32>
    %271 = arith.mulf %266, %268 : vector<8x64xf32>
    %272 = arith.addf %270, %271 : vector<8x64xf32>
    %273 = math.tanh %272 : vector<8x64xf32>
    %274 = arith.mulf %269, %273 : vector<8x64xf32>
    %275 = vector.extract_strided_slice %274 {offsets = [0, 0], sizes = [8, 32], strides = [1, 1]} : vector<8x64xf32> to vector<8x32xf32>
    %c7_113 = arith.constant 7 : index
    %c0_114 = arith.constant 0 : index
    %c0_115 = arith.constant 0 : index
    %276 = vector.load %arg6[%c7_113, %c0_114, %c0_115] : memref<8x8x32xf32, #tpu.memory_space<vmem>>, vector<1x8x32xf32>
    %277 = vector.shape_cast %276 : vector<1x8x32xf32> to vector<8x32xf32>
    %278 = vector.shape_cast %275 : vector<8x32xf32> to vector<1x8x32xf32>
    tpu.vector_store %arg6[%c7_113, %c0_114, %c0_115], %278 {strides = array<i32>} : memref<8x8x32xf32, #tpu.memory_space<vmem>>, vector<1x8x32xf32>,
    %279 = vector.extract_strided_slice %274 {offsets = [0, 32], sizes = [8, 32], strides = [1, 1]} : vector<8x64xf32> to vector<8x32xf32>
    %c0_116 = arith.constant 0 : index
    %c0_117 = arith.constant 0 : index
    %c0_118 = arith.constant 0 : index
    %280 = vector.load %arg7[%c0_116, %c0_117, %c0_118] : memref<8x8x32xf32, #tpu.memory_space<vmem>>, vector<1x8x32xf32>
    %281 = vector.shape_cast %280 : vector<1x8x32xf32> to vector<8x32xf32>
    %282 = vector.shape_cast %279 : vector<8x32xf32> to vector<1x8x32xf32>
    tpu.vector_store %arg7[%c0_116, %c0_117, %c0_118], %282 {strides = array<i32>} : memref<8x8x32xf32, #tpu.memory_space<vmem>>, vector<1x8x32xf32>,
    %c0_119 = arith.constant 0 : index
    %c0_120 = arith.constant 0 : index
    %c0_121 = arith.constant 0 : index
    %283 = vector.load %arg6[%c0_119, %c0_120, %c0_121] : memref<8x8x32xf32, #tpu.memory_space<vmem>>, vector<8x8x32xf32>
    %284 = vector.shape_cast %283 : vector<8x8x32xf32> to vector<64x32xf32>
    %c0_122 = arith.constant 0 : index
    %c0_123 = arith.constant 0 : index
    %c0_124 = arith.constant 0 : index
    %285 = vector.load %arg7[%c0_122, %c0_123, %c0_124] : memref<8x8x32xf32, #tpu.memory_space<vmem>>, vector<8x8x32xf32>
    %286 = vector.shape_cast %285 : vector<8x8x32xf32> to vector<64x32xf32>
    %287 = tpu.concatenate %284, %286 in 1 : vector<64x32xf32>, vector<64x32xf32> -> vector<64x64xf32>
    %c0_125 = arith.constant 0 : index
    %c0_126 = arith.constant 0 : index
    %288 = vector.load %arg2[%c0_125, %c0_126] : memref<96x8xf32, #tpu.memory_space<vmem>>, vector<64x8xf32>
    %c88_127 = arith.constant 88 : index
    %c0_128 = arith.constant 0 : index
    %289 = vector.load %arg2[%c88_127, %c0_128] : memref<96x8xf32, #tpu.memory_space<vmem>>, vector<1x8xf32>
    %cst_129 = arith.constant dense<0.000000e+00> : vector<64x8xf32>
    %290 = tpu.matmul %287, %288, %cst_129 {dimension_numbers = #tpu.dot_dimension_numbers<[1], [0], [0], [1], [0, 0, 1, 1], [], []>} : vector<64x64xf32>, vector<64x8xf32>, vector<64x8xf32> -> vector<64x8xf32>
    %291 = vector.broadcast %289 : vector<1x8xf32> to vector<64x8xf32>
    %292 = arith.addf %290, %291 : vector<64x8xf32>
    %293 = vector.shape_cast %292 : vector<64x8xf32> to vector<8x8x8xf32>
    %c64_130 = arith.constant 64 : index
    %c0_131 = arith.constant 0 : index
    %294 = vector.load %arg2[%c64_130, %c0_131] : memref<96x8xf32, #tpu.memory_space<vmem>>, vector<8x8xf32>
    %c72 = arith.constant 72 : index
    %c0_132 = arith.constant 0 : index
    %295 = vector.load %arg2[%c72, %c0_132] : memref<96x8xf32, #tpu.memory_space<vmem>>, vector<1x8xf32>
    %c80 = arith.constant 80 : index
    %c0_133 = arith.constant 0 : index
    %296 = vector.load %arg2[%c80, %c0_133] : memref<96x8xf32, #tpu.memory_space<vmem>>, vector<1x8xf32>
    %297 = vector.shape_cast %294 : vector<8x8xf32> to vector<1x8x8xf32>
    %298 = tpu.iota {dimensions = array<i32: 2>} : vector<8x8x8xi32>
    %299 = vector.extract_strided_slice %293 {offsets = [0, 0, 0], sizes = [1, 8, 8], strides = [1, 1, 1]} : vector<8x8x8xf32> to vector<1x8x8xf32>
    %300 = vector.shape_cast %299 : vector<1x8x8xf32> to vector<8x8xf32>
    %301 = vector.broadcast %295 : vector<1x8xf32> to vector<8x8xf32>
    %302 = arith.addf %301, %300 : vector<8x8xf32>
    %303 = vector.extract_strided_slice %293 {offsets = [1, 0, 0], sizes = [1, 8, 8], strides = [1, 1, 1]} : vector<8x8x8xf32> to vector<1x8x8xf32>
    %304 = vector.shape_cast %303 : vector<1x8x8xf32> to vector<8x8xf32>
    %305 = vector.shape_cast %304 : vector<8x8xf32> to vector<8x8x1xf32>
    %306 = vector.broadcast %305 : vector<8x8x1xf32> to vector<8x8x8xf32>
    %307 = vector.broadcast %297 : vector<1x8x8xf32> to vector<8x8x8xf32>
    %308 = arith.addf %306, %307 : vector<8x8x8xf32>
    %309 = vector.shape_cast %302 : vector<8x8xf32> to vector<8x1x8xf32>
    %310 = vector.broadcast %309 : vector<8x1x8xf32> to vector<8x8x8xf32>
    %311 = arith.addf %310, %308 : vector<8x8x8xf32>
    %cst_134 = arith.constant dense<0xFF800000> : vector<8x8xf32>
    %312 = vector.multi_reduction <maximumf>, %311, %cst_134 [2] : vector<8x8x8xf32> to vector<8x8xf32>
    %313 = vector.shape_cast %312 : vector<8x8xf32> to vector<8x8x1xf32>
    %314 = vector.broadcast %313 : vector<8x8x1xf32> to vector<8x8x8xf32>
    %315 = arith.cmpf oeq, %311, %314 : vector<8x8x8xf32>
    %c8_i32 = arith.constant 8 : i32
    %316 = vector.broadcast %c8_i32 : i32 to vector<8x8x8xi32>
    %317 = arith.select %315, %298, %316 : vector<8x8x8xi1>, vector<8x8x8xi32>
    %cst_135 = arith.constant dense<2147483647> : vector<8x8xi32>
    %318 = vector.multi_reduction <minsi>, %317, %cst_135 [2] : vector<8x8x8xi32> to vector<8x8xi32>
    %319 = vector.extract_strided_slice %17 {offsets = [1, 0, 0], sizes = [1, 8, 1], strides = [1, 1, 1]} : vector<8x8x1xf32> to vector<1x8x1xf32>
    %320 = vector.shape_cast %319 : vector<1x8x1xf32> to vector<8x1xf32>
    %cst_136 = arith.constant 0.000000e+00 : f32
    %321 = vector.broadcast %cst_136 : f32 to vector<8x1xf32>
    %322 = arith.cmpf ogt, %320, %321 : vector<8x1xf32>
    %323 = vector.shape_cast %322 : vector<8x1xi1> to vector<8x1xi1>
    %324 = vector.broadcast %323 : vector<8x1xi1> to vector<8x8xi1>
    %325 = arith.select %324, %312, %302 : vector<8x8xi1>, vector<8x8xf32>
    %326 = vector.extract_strided_slice %293 {offsets = [2, 0, 0], sizes = [1, 8, 8], strides = [1, 1, 1]} : vector<8x8x8xf32> to vector<1x8x8xf32>
    %327 = vector.shape_cast %326 : vector<1x8x8xf32> to vector<8x8xf32>
    %328 = vector.shape_cast %327 : vector<8x8xf32> to vector<8x8x1xf32>
    %329 = vector.broadcast %328 : vector<8x8x1xf32> to vector<8x8x8xf32>
    %330 = vector.broadcast %297 : vector<1x8x8xf32> to vector<8x8x8xf32>
    %331 = arith.addf %329, %330 : vector<8x8x8xf32>
    %332 = vector.shape_cast %325 : vector<8x8xf32> to vector<8x1x8xf32>
    %333 = vector.broadcast %332 : vector<8x1x8xf32> to vector<8x8x8xf32>
    %334 = arith.addf %333, %331 : vector<8x8x8xf32>
    %cst_137 = arith.constant dense<0xFF800000> : vector<8x8xf32>
    %335 = vector.multi_reduction <maximumf>, %334, %cst_137 [2] : vector<8x8x8xf32> to vector<8x8xf32>
    %336 = vector.shape_cast %335 : vector<8x8xf32> to vector<8x8x1xf32>
    %337 = vector.broadcast %336 : vector<8x8x1xf32> to vector<8x8x8xf32>
    %338 = arith.cmpf oeq, %334, %337 : vector<8x8x8xf32>
    %c8_i32_138 = arith.constant 8 : i32
    %339 = vector.broadcast %c8_i32_138 : i32 to vector<8x8x8xi32>
    %340 = arith.select %338, %298, %339 : vector<8x8x8xi1>, vector<8x8x8xi32>
    %cst_139 = arith.constant dense<2147483647> : vector<8x8xi32>
    %341 = vector.multi_reduction <minsi>, %340, %cst_139 [2] : vector<8x8x8xi32> to vector<8x8xi32>
    %342 = vector.extract_strided_slice %17 {offsets = [2, 0, 0], sizes = [1, 8, 1], strides = [1, 1, 1]} : vector<8x8x1xf32> to vector<1x8x1xf32>
    %343 = vector.shape_cast %342 : vector<1x8x1xf32> to vector<8x1xf32>
    %cst_140 = arith.constant 0.000000e+00 : f32
    %344 = vector.broadcast %cst_140 : f32 to vector<8x1xf32>
    %345 = arith.cmpf ogt, %343, %344 : vector<8x1xf32>
    %346 = vector.shape_cast %345 : vector<8x1xi1> to vector<8x1xi1>
    %347 = vector.broadcast %346 : vector<8x1xi1> to vector<8x8xi1>
    %348 = arith.select %347, %335, %325 : vector<8x8xi1>, vector<8x8xf32>
    %349 = vector.extract_strided_slice %293 {offsets = [3, 0, 0], sizes = [1, 8, 8], strides = [1, 1, 1]} : vector<8x8x8xf32> to vector<1x8x8xf32>
    %350 = vector.shape_cast %349 : vector<1x8x8xf32> to vector<8x8xf32>
    %351 = vector.shape_cast %350 : vector<8x8xf32> to vector<8x8x1xf32>
    %352 = vector.broadcast %351 : vector<8x8x1xf32> to vector<8x8x8xf32>
    %353 = vector.broadcast %297 : vector<1x8x8xf32> to vector<8x8x8xf32>
    %354 = arith.addf %352, %353 : vector<8x8x8xf32>
    %355 = vector.shape_cast %348 : vector<8x8xf32> to vector<8x1x8xf32>
    %356 = vector.broadcast %355 : vector<8x1x8xf32> to vector<8x8x8xf32>
    %357 = arith.addf %356, %354 : vector<8x8x8xf32>
    %cst_141 = arith.constant dense<0xFF800000> : vector<8x8xf32>
    %358 = vector.multi_reduction <maximumf>, %357, %cst_141 [2] : vector<8x8x8xf32> to vector<8x8xf32>
    %359 = vector.shape_cast %358 : vector<8x8xf32> to vector<8x8x1xf32>
    %360 = vector.broadcast %359 : vector<8x8x1xf32> to vector<8x8x8xf32>
    %361 = arith.cmpf oeq, %357, %360 : vector<8x8x8xf32>
    %c8_i32_142 = arith.constant 8 : i32
    %362 = vector.broadcast %c8_i32_142 : i32 to vector<8x8x8xi32>
    %363 = arith.select %361, %298, %362 : vector<8x8x8xi1>, vector<8x8x8xi32>
    %cst_143 = arith.constant dense<2147483647> : vector<8x8xi32>
    %364 = vector.multi_reduction <minsi>, %363, %cst_143 [2] : vector<8x8x8xi32> to vector<8x8xi32>
    %365 = vector.extract_strided_slice %17 {offsets = [3, 0, 0], sizes = [1, 8, 1], strides = [1, 1, 1]} : vector<8x8x1xf32> to vector<1x8x1xf32>
    %366 = vector.shape_cast %365 : vector<1x8x1xf32> to vector<8x1xf32>
    %cst_144 = arith.constant 0.000000e+00 : f32
    %367 = vector.broadcast %cst_144 : f32 to vector<8x1xf32>
    %368 = arith.cmpf ogt, %366, %367 : vector<8x1xf32>
    %369 = vector.shape_cast %368 : vector<8x1xi1> to vector<8x1xi1>
    %370 = vector.broadcast %369 : vector<8x1xi1> to vector<8x8xi1>
    %371 = arith.select %370, %358, %348 : vector<8x8xi1>, vector<8x8xf32>
    %372 = vector.extract_strided_slice %293 {offsets = [4, 0, 0], sizes = [1, 8, 8], strides = [1, 1, 1]} : vector<8x8x8xf32> to vector<1x8x8xf32>
    %373 = vector.shape_cast %372 : vector<1x8x8xf32> to vector<8x8xf32>
    %374 = vector.shape_cast %373 : vector<8x8xf32> to vector<8x8x1xf32>
    %375 = vector.broadcast %374 : vector<8x8x1xf32> to vector<8x8x8xf32>
    %376 = vector.broadcast %297 : vector<1x8x8xf32> to vector<8x8x8xf32>
    %377 = arith.addf %375, %376 : vector<8x8x8xf32>
    %378 = vector.shape_cast %371 : vector<8x8xf32> to vector<8x1x8xf32>
    %379 = vector.broadcast %378 : vector<8x1x8xf32> to vector<8x8x8xf32>
    %380 = arith.addf %379, %377 : vector<8x8x8xf32>
    %cst_145 = arith.constant dense<0xFF800000> : vector<8x8xf32>
    %381 = vector.multi_reduction <maximumf>, %380, %cst_145 [2] : vector<8x8x8xf32> to vector<8x8xf32>
    %382 = vector.shape_cast %381 : vector<8x8xf32> to vector<8x8x1xf32>
    %383 = vector.broadcast %382 : vector<8x8x1xf32> to vector<8x8x8xf32>
    %384 = arith.cmpf oeq, %380, %383 : vector<8x8x8xf32>
    %c8_i32_146 = arith.constant 8 : i32
    %385 = vector.broadcast %c8_i32_146 : i32 to vector<8x8x8xi32>
    %386 = arith.select %384, %298, %385 : vector<8x8x8xi1>, vector<8x8x8xi32>
    %cst_147 = arith.constant dense<2147483647> : vector<8x8xi32>
    %387 = vector.multi_reduction <minsi>, %386, %cst_147 [2] : vector<8x8x8xi32> to vector<8x8xi32>
    %388 = vector.extract_strided_slice %17 {offsets = [4, 0, 0], sizes = [1, 8, 1], strides = [1, 1, 1]} : vector<8x8x1xf32> to vector<1x8x1xf32>
    %389 = vector.shape_cast %388 : vector<1x8x1xf32> to vector<8x1xf32>
    %cst_148 = arith.constant 0.000000e+00 : f32
    %390 = vector.broadcast %cst_148 : f32 to vector<8x1xf32>
    %391 = arith.cmpf ogt, %389, %390 : vector<8x1xf32>
    %392 = vector.shape_cast %391 : vector<8x1xi1> to vector<8x1xi1>
    %393 = vector.broadcast %392 : vector<8x1xi1> to vector<8x8xi1>
    %394 = arith.select %393, %381, %371 : vector<8x8xi1>, vector<8x8xf32>
    %395 = vector.extract_strided_slice %293 {offsets = [5, 0, 0], sizes = [1, 8, 8], strides = [1, 1, 1]} : vector<8x8x8xf32> to vector<1x8x8xf32>
    %396 = vector.shape_cast %395 : vector<1x8x8xf32> to vector<8x8xf32>
    %397 = vector.shape_cast %396 : vector<8x8xf32> to vector<8x8x1xf32>
    %398 = vector.broadcast %397 : vector<8x8x1xf32> to vector<8x8x8xf32>
    %399 = vector.broadcast %297 : vector<1x8x8xf32> to vector<8x8x8xf32>
    %400 = arith.addf %398, %399 : vector<8x8x8xf32>
    %401 = vector.shape_cast %394 : vector<8x8xf32> to vector<8x1x8xf32>
    %402 = vector.broadcast %401 : vector<8x1x8xf32> to vector<8x8x8xf32>
    %403 = arith.addf %402, %400 : vector<8x8x8xf32>
    %cst_149 = arith.constant dense<0xFF800000> : vector<8x8xf32>
    %404 = vector.multi_reduction <maximumf>, %403, %cst_149 [2] : vector<8x8x8xf32> to vector<8x8xf32>
    %405 = vector.shape_cast %404 : vector<8x8xf32> to vector<8x8x1xf32>
    %406 = vector.broadcast %405 : vector<8x8x1xf32> to vector<8x8x8xf32>
    %407 = arith.cmpf oeq, %403, %406 : vector<8x8x8xf32>
    %c8_i32_150 = arith.constant 8 : i32
    %408 = vector.broadcast %c8_i32_150 : i32 to vector<8x8x8xi32>
    %409 = arith.select %407, %298, %408 : vector<8x8x8xi1>, vector<8x8x8xi32>
    %cst_151 = arith.constant dense<2147483647> : vector<8x8xi32>
    %410 = vector.multi_reduction <minsi>, %409, %cst_151 [2] : vector<8x8x8xi32> to vector<8x8xi32>
    %411 = vector.extract_strided_slice %17 {offsets = [5, 0, 0], sizes = [1, 8, 1], strides = [1, 1, 1]} : vector<8x8x1xf32> to vector<1x8x1xf32>
    %412 = vector.shape_cast %411 : vector<1x8x1xf32> to vector<8x1xf32>
    %cst_152 = arith.constant 0.000000e+00 : f32
    %413 = vector.broadcast %cst_152 : f32 to vector<8x1xf32>
    %414 = arith.cmpf ogt, %412, %413 : vector<8x1xf32>
    %415 = vector.shape_cast %414 : vector<8x1xi1> to vector<8x1xi1>
    %416 = vector.broadcast %415 : vector<8x1xi1> to vector<8x8xi1>
    %417 = arith.select %416, %404, %394 : vector<8x8xi1>, vector<8x8xf32>
    %418 = vector.extract_strided_slice %293 {offsets = [6, 0, 0], sizes = [1, 8, 8], strides = [1, 1, 1]} : vector<8x8x8xf32> to vector<1x8x8xf32>
    %419 = vector.shape_cast %418 : vector<1x8x8xf32> to vector<8x8xf32>
    %420 = vector.shape_cast %419 : vector<8x8xf32> to vector<8x8x1xf32>
    %421 = vector.broadcast %420 : vector<8x8x1xf32> to vector<8x8x8xf32>
    %422 = vector.broadcast %297 : vector<1x8x8xf32> to vector<8x8x8xf32>
    %423 = arith.addf %421, %422 : vector<8x8x8xf32>
    %424 = vector.shape_cast %417 : vector<8x8xf32> to vector<8x1x8xf32>
    %425 = vector.broadcast %424 : vector<8x1x8xf32> to vector<8x8x8xf32>
    %426 = arith.addf %425, %423 : vector<8x8x8xf32>
    %cst_153 = arith.constant dense<0xFF800000> : vector<8x8xf32>
    %427 = vector.multi_reduction <maximumf>, %426, %cst_153 [2] : vector<8x8x8xf32> to vector<8x8xf32>
    %428 = vector.shape_cast %427 : vector<8x8xf32> to vector<8x8x1xf32>
    %429 = vector.broadcast %428 : vector<8x8x1xf32> to vector<8x8x8xf32>
    %430 = arith.cmpf oeq, %426, %429 : vector<8x8x8xf32>
    %c8_i32_154 = arith.constant 8 : i32
    %431 = vector.broadcast %c8_i32_154 : i32 to vector<8x8x8xi32>
    %432 = arith.select %430, %298, %431 : vector<8x8x8xi1>, vector<8x8x8xi32>
    %cst_155 = arith.constant dense<2147483647> : vector<8x8xi32>
    %433 = vector.multi_reduction <minsi>, %432, %cst_155 [2] : vector<8x8x8xi32> to vector<8x8xi32>
    %434 = vector.extract_strided_slice %17 {offsets = [6, 0, 0], sizes = [1, 8, 1], strides = [1, 1, 1]} : vector<8x8x1xf32> to vector<1x8x1xf32>
    %435 = vector.shape_cast %434 : vector<1x8x1xf32> to vector<8x1xf32>
    %cst_156 = arith.constant 0.000000e+00 : f32
    %436 = vector.broadcast %cst_156 : f32 to vector<8x1xf32>
    %437 = arith.cmpf ogt, %435, %436 : vector<8x1xf32>
    %438 = vector.shape_cast %437 : vector<8x1xi1> to vector<8x1xi1>
    %439 = vector.broadcast %438 : vector<8x1xi1> to vector<8x8xi1>
    %440 = arith.select %439, %427, %417 : vector<8x8xi1>, vector<8x8xf32>
    %441 = vector.extract_strided_slice %293 {offsets = [7, 0, 0], sizes = [1, 8, 8], strides = [1, 1, 1]} : vector<8x8x8xf32> to vector<1x8x8xf32>
    %442 = vector.shape_cast %441 : vector<1x8x8xf32> to vector<8x8xf32>
    %443 = vector.shape_cast %442 : vector<8x8xf32> to vector<8x8x1xf32>
    %444 = vector.broadcast %443 : vector<8x8x1xf32> to vector<8x8x8xf32>
    %445 = vector.broadcast %297 : vector<1x8x8xf32> to vector<8x8x8xf32>
    %446 = arith.addf %444, %445 : vector<8x8x8xf32>
    %447 = vector.shape_cast %440 : vector<8x8xf32> to vector<8x1x8xf32>
    %448 = vector.broadcast %447 : vector<8x1x8xf32> to vector<8x8x8xf32>
    %449 = arith.addf %448, %446 : vector<8x8x8xf32>
    %cst_157 = arith.constant dense<0xFF800000> : vector<8x8xf32>
    %450 = vector.multi_reduction <maximumf>, %449, %cst_157 [2] : vector<8x8x8xf32> to vector<8x8xf32>
    %451 = vector.shape_cast %450 : vector<8x8xf32> to vector<8x8x1xf32>
    %452 = vector.broadcast %451 : vector<8x8x1xf32> to vector<8x8x8xf32>
    %453 = arith.cmpf oeq, %449, %452 : vector<8x8x8xf32>
    %c8_i32_158 = arith.constant 8 : i32
    %454 = vector.broadcast %c8_i32_158 : i32 to vector<8x8x8xi32>
    %455 = arith.select %453, %298, %454 : vector<8x8x8xi1>, vector<8x8x8xi32>
    %cst_159 = arith.constant dense<2147483647> : vector<8x8xi32>
    %456 = vector.multi_reduction <minsi>, %455, %cst_159 [2] : vector<8x8x8xi32> to vector<8x8xi32>
    %457 = vector.extract_strided_slice %17 {offsets = [7, 0, 0], sizes = [1, 8, 1], strides = [1, 1, 1]} : vector<8x8x1xf32> to vector<1x8x1xf32>
    %458 = vector.shape_cast %457 : vector<1x8x1xf32> to vector<8x1xf32>
    %cst_160 = arith.constant 0.000000e+00 : f32
    %459 = vector.broadcast %cst_160 : f32 to vector<8x1xf32>
    %460 = arith.cmpf ogt, %458, %459 : vector<8x1xf32>
    %461 = vector.shape_cast %460 : vector<8x1xi1> to vector<8x1xi1>
    %462 = vector.broadcast %461 : vector<8x1xi1> to vector<8x8xi1>
    %463 = arith.select %462, %450, %440 : vector<8x8xi1>, vector<8x8xf32>
    %464 = vector.broadcast %296 : vector<1x8xf32> to vector<8x8xf32>
    %465 = arith.addf %463, %464 : vector<8x8xf32>
    %cst_161 = arith.constant dense<0xFF800000> : vector<8xf32>
    %466 = vector.multi_reduction <maximumf>, %465, %cst_161 [1] : vector<8x8xf32> to vector<8xf32>
    %467 = vector.shape_cast %466 : vector<8xf32> to vector<8x1xf32>
    %468 = tpu.iota {dimensions = array<i32: 1>} : vector<8x8xi32>
    %469 = vector.broadcast %467 : vector<8x1xf32> to vector<8x8xf32>
    %470 = arith.cmpf oeq, %465, %469 : vector<8x8xf32>
    %c8_i32_162 = arith.constant 8 : i32
    %471 = vector.broadcast %c8_i32_162 : i32 to vector<8x8xi32>
    %472 = arith.select %470, %468, %471 : vector<8x8xi1>, vector<8x8xi32>
    %cst_163 = arith.constant dense<2147483647> : vector<8xi32>
    %473 = vector.multi_reduction <minsi>, %472, %cst_163 [1] : vector<8x8xi32> to vector<8xi32>
    %474 = vector.shape_cast %473 : vector<8xi32> to vector<8x1xi32>
    %cst_164 = arith.constant dense<0.000000e+00> : vector<8x1xf32>
    %475 = vector.multi_reduction <add>, %17, %cst_164 [0] : vector<8x8x1xf32> to vector<8x1xf32>
    %476 = arith.fptosi %475 : vector<8x1xf32> to vector<8x1xi32>
    %477 = tpu.iota {dimensions = array<i32: 1>} : vector<8x8xi32>
    %c0_i32_165 = arith.constant 0 : i32
    %478 = vector.broadcast %c0_i32_165 : i32 to vector<8x8xi32>
    %479 = vector.broadcast %474 : vector<8x1xi32> to vector<8x8xi32>
    %480 = arith.cmpi eq, %468, %479 : vector<8x8xi32>
    %c0_i32_166 = arith.constant 0 : i32
    %481 = vector.broadcast %c0_i32_166 : i32 to vector<8x8xi32>
    %482 = arith.select %480, %456, %481 : vector<8x8xi1>, vector<8x8xi32>
    %cst_167 = arith.constant dense<0> : vector<8xi32>
    %483 = vector.multi_reduction <add>, %482, %cst_167 [1] : vector<8x8xi32> to vector<8xi32>
    %484 = vector.shape_cast %483 : vector<8xi32> to vector<8x1xi32>
    %c1_i32 = arith.constant 1 : i32
    %485 = vector.broadcast %c1_i32 : i32 to vector<8x1xi32>
    %486 = arith.subi %476, %485 : vector<8x1xi32>
    %c7_i32 = arith.constant 7 : i32
    %487 = vector.broadcast %c7_i32 : i32 to vector<8x1xi32>
    %488 = arith.cmpi eq, %486, %487 : vector<8x1xi32>
    %c1_i32_168 = arith.constant 1 : i32
    %489 = vector.broadcast %c1_i32_168 : i32 to vector<8x1xi32>
    %490 = arith.subi %476, %489 : vector<8x1xi32>
    %c7_i32_169 = arith.constant 7 : i32
    %491 = vector.broadcast %c7_i32_169 : i32 to vector<8x1xi32>
    %492 = arith.cmpi sgt, %490, %491 : vector<8x1xi32>
    %493 = arith.select %492, %484, %474 : vector<8x1xi1>, vector<8x1xi32>
    %494 = arith.select %488, %474, %493 : vector<8x1xi1>, vector<8x1xi32>
    %c7_i32_170 = arith.constant 7 : i32
    %495 = vector.broadcast %c7_i32_170 : i32 to vector<8x1xi32>
    %496 = arith.cmpi sgt, %476, %495 : vector<8x1xi32>
    %c0_i32_171 = arith.constant 0 : i32
    %497 = vector.broadcast %c0_i32_171 : i32 to vector<8x1xi32>
    %498 = arith.select %496, %494, %497 : vector<8x1xi1>, vector<8x1xi32>
    %c7_i32_172 = arith.constant 7 : i32
    %499 = vector.broadcast %c7_i32_172 : i32 to vector<8x8xi32>
    %500 = arith.cmpi eq, %477, %499 : vector<8x8xi32>
    %501 = vector.shape_cast %498 : vector<8x1xi32> to vector<8x1xi32>
    %502 = vector.broadcast %501 : vector<8x1xi32> to vector<8x8xi32>
    %503 = arith.select %500, %502, %478 : vector<8x8xi1>, vector<8x8xi32>
    %504 = vector.broadcast %494 : vector<8x1xi32> to vector<8x8xi32>
    %505 = arith.cmpi eq, %468, %504 : vector<8x8xi32>
    %c0_i32_173 = arith.constant 0 : i32
    %506 = vector.broadcast %c0_i32_173 : i32 to vector<8x8xi32>
    %507 = arith.select %505, %456, %506 : vector<8x8xi1>, vector<8x8xi32>
    %cst_174 = arith.constant dense<0> : vector<8xi32>
    %508 = vector.multi_reduction <add>, %507, %cst_174 [1] : vector<8x8xi32> to vector<8xi32>
    %509 = vector.shape_cast %508 : vector<8xi32> to vector<8x1xi32>
    %c1_i32_175 = arith.constant 1 : i32
    %510 = vector.broadcast %c1_i32_175 : i32 to vector<8x1xi32>
    %511 = arith.subi %476, %510 : vector<8x1xi32>
    %c6_i32 = arith.constant 6 : i32
    %512 = vector.broadcast %c6_i32 : i32 to vector<8x1xi32>
    %513 = arith.cmpi eq, %511, %512 : vector<8x1xi32>
    %c1_i32_176 = arith.constant 1 : i32
    %514 = vector.broadcast %c1_i32_176 : i32 to vector<8x1xi32>
    %515 = arith.subi %476, %514 : vector<8x1xi32>
    %c6_i32_177 = arith.constant 6 : i32
    %516 = vector.broadcast %c6_i32_177 : i32 to vector<8x1xi32>
    %517 = arith.cmpi sgt, %515, %516 : vector<8x1xi32>
    %518 = arith.select %517, %509, %494 : vector<8x1xi1>, vector<8x1xi32>
    %519 = arith.select %513, %474, %518 : vector<8x1xi1>, vector<8x1xi32>
    %c6_i32_178 = arith.constant 6 : i32
    %520 = vector.broadcast %c6_i32_178 : i32 to vector<8x1xi32>
    %521 = arith.cmpi sgt, %476, %520 : vector<8x1xi32>
    %c0_i32_179 = arith.constant 0 : i32
    %522 = vector.broadcast %c0_i32_179 : i32 to vector<8x1xi32>
    %523 = arith.select %521, %519, %522 : vector<8x1xi1>, vector<8x1xi32>
    %c6_i32_180 = arith.constant 6 : i32
    %524 = vector.broadcast %c6_i32_180 : i32 to vector<8x8xi32>
    %525 = arith.cmpi eq, %477, %524 : vector<8x8xi32>
    %526 = vector.shape_cast %523 : vector<8x1xi32> to vector<8x1xi32>
    %527 = vector.broadcast %526 : vector<8x1xi32> to vector<8x8xi32>
    %528 = arith.select %525, %527, %503 : vector<8x8xi1>, vector<8x8xi32>
    %529 = vector.broadcast %519 : vector<8x1xi32> to vector<8x8xi32>
    %530 = arith.cmpi eq, %468, %529 : vector<8x8xi32>
    %c0_i32_181 = arith.constant 0 : i32
    %531 = vector.broadcast %c0_i32_181 : i32 to vector<8x8xi32>
    %532 = arith.select %530, %433, %531 : vector<8x8xi1>, vector<8x8xi32>
    %cst_182 = arith.constant dense<0> : vector<8xi32>
    %533 = vector.multi_reduction <add>, %532, %cst_182 [1] : vector<8x8xi32> to vector<8xi32>
    %534 = vector.shape_cast %533 : vector<8xi32> to vector<8x1xi32>
    %c1_i32_183 = arith.constant 1 : i32
    %535 = vector.broadcast %c1_i32_183 : i32 to vector<8x1xi32>
    %536 = arith.subi %476, %535 : vector<8x1xi32>
    %c5_i32 = arith.constant 5 : i32
    %537 = vector.broadcast %c5_i32 : i32 to vector<8x1xi32>
    %538 = arith.cmpi eq, %536, %537 : vector<8x1xi32>
    %c1_i32_184 = arith.constant 1 : i32
    %539 = vector.broadcast %c1_i32_184 : i32 to vector<8x1xi32>
    %540 = arith.subi %476, %539 : vector<8x1xi32>
    %c5_i32_185 = arith.constant 5 : i32
    %541 = vector.broadcast %c5_i32_185 : i32 to vector<8x1xi32>
    %542 = arith.cmpi sgt, %540, %541 : vector<8x1xi32>
    %543 = arith.select %542, %534, %519 : vector<8x1xi1>, vector<8x1xi32>
    %544 = arith.select %538, %474, %543 : vector<8x1xi1>, vector<8x1xi32>
    %c5_i32_186 = arith.constant 5 : i32
    %545 = vector.broadcast %c5_i32_186 : i32 to vector<8x1xi32>
    %546 = arith.cmpi sgt, %476, %545 : vector<8x1xi32>
    %c0_i32_187 = arith.constant 0 : i32
    %547 = vector.broadcast %c0_i32_187 : i32 to vector<8x1xi32>
    %548 = arith.select %546, %544, %547 : vector<8x1xi1>, vector<8x1xi32>
    %c5_i32_188 = arith.constant 5 : i32
    %549 = vector.broadcast %c5_i32_188 : i32 to vector<8x8xi32>
    %550 = arith.cmpi eq, %477, %549 : vector<8x8xi32>
    %551 = vector.shape_cast %548 : vector<8x1xi32> to vector<8x1xi32>
    %552 = vector.broadcast %551 : vector<8x1xi32> to vector<8x8xi32>
    %553 = arith.select %550, %552, %528 : vector<8x8xi1>, vector<8x8xi32>
    %554 = vector.broadcast %544 : vector<8x1xi32> to vector<8x8xi32>
    %555 = arith.cmpi eq, %468, %554 : vector<8x8xi32>
    %c0_i32_189 = arith.constant 0 : i32
    %556 = vector.broadcast %c0_i32_189 : i32 to vector<8x8xi32>
    %557 = arith.select %555, %410, %556 : vector<8x8xi1>, vector<8x8xi32>
    %cst_190 = arith.constant dense<0> : vector<8xi32>
    %558 = vector.multi_reduction <add>, %557, %cst_190 [1] : vector<8x8xi32> to vector<8xi32>
    %559 = vector.shape_cast %558 : vector<8xi32> to vector<8x1xi32>
    %c1_i32_191 = arith.constant 1 : i32
    %560 = vector.broadcast %c1_i32_191 : i32 to vector<8x1xi32>
    %561 = arith.subi %476, %560 : vector<8x1xi32>
    %c4_i32 = arith.constant 4 : i32
    %562 = vector.broadcast %c4_i32 : i32 to vector<8x1xi32>
    %563 = arith.cmpi eq, %561, %562 : vector<8x1xi32>
    %c1_i32_192 = arith.constant 1 : i32
    %564 = vector.broadcast %c1_i32_192 : i32 to vector<8x1xi32>
    %565 = arith.subi %476, %564 : vector<8x1xi32>
    %c4_i32_193 = arith.constant 4 : i32
    %566 = vector.broadcast %c4_i32_193 : i32 to vector<8x1xi32>
    %567 = arith.cmpi sgt, %565, %566 : vector<8x1xi32>
    %568 = arith.select %567, %559, %544 : vector<8x1xi1>, vector<8x1xi32>
    %569 = arith.select %563, %474, %568 : vector<8x1xi1>, vector<8x1xi32>
    %c4_i32_194 = arith.constant 4 : i32
    %570 = vector.broadcast %c4_i32_194 : i32 to vector<8x1xi32>
    %571 = arith.cmpi sgt, %476, %570 : vector<8x1xi32>
    %c0_i32_195 = arith.constant 0 : i32
    %572 = vector.broadcast %c0_i32_195 : i32 to vector<8x1xi32>
    %573 = arith.select %571, %569, %572 : vector<8x1xi1>, vector<8x1xi32>
    %c4_i32_196 = arith.constant 4 : i32
    %574 = vector.broadcast %c4_i32_196 : i32 to vector<8x8xi32>
    %575 = arith.cmpi eq, %477, %574 : vector<8x8xi32>
    %576 = vector.shape_cast %573 : vector<8x1xi32> to vector<8x1xi32>
    %577 = vector.broadcast %576 : vector<8x1xi32> to vector<8x8xi32>
    %578 = arith.select %575, %577, %553 : vector<8x8xi1>, vector<8x8xi32>
    %579 = vector.broadcast %569 : vector<8x1xi32> to vector<8x8xi32>
    %580 = arith.cmpi eq, %468, %579 : vector<8x8xi32>
    %c0_i32_197 = arith.constant 0 : i32
    %581 = vector.broadcast %c0_i32_197 : i32 to vector<8x8xi32>
    %582 = arith.select %580, %387, %581 : vector<8x8xi1>, vector<8x8xi32>
    %cst_198 = arith.constant dense<0> : vector<8xi32>
    %583 = vector.multi_reduction <add>, %582, %cst_198 [1] : vector<8x8xi32> to vector<8xi32>
    %584 = vector.shape_cast %583 : vector<8xi32> to vector<8x1xi32>
    %c1_i32_199 = arith.constant 1 : i32
    %585 = vector.broadcast %c1_i32_199 : i32 to vector<8x1xi32>
    %586 = arith.subi %476, %585 : vector<8x1xi32>
    %c3_i32 = arith.constant 3 : i32
    %587 = vector.broadcast %c3_i32 : i32 to vector<8x1xi32>
    %588 = arith.cmpi eq, %586, %587 : vector<8x1xi32>
    %c1_i32_200 = arith.constant 1 : i32
    %589 = vector.broadcast %c1_i32_200 : i32 to vector<8x1xi32>
    %590 = arith.subi %476, %589 : vector<8x1xi32>
    %c3_i32_201 = arith.constant 3 : i32
    %591 = vector.broadcast %c3_i32_201 : i32 to vector<8x1xi32>
    %592 = arith.cmpi sgt, %590, %591 : vector<8x1xi32>
    %593 = arith.select %592, %584, %569 : vector<8x1xi1>, vector<8x1xi32>
    %594 = arith.select %588, %474, %593 : vector<8x1xi1>, vector<8x1xi32>
    %c3_i32_202 = arith.constant 3 : i32
    %595 = vector.broadcast %c3_i32_202 : i32 to vector<8x1xi32>
    %596 = arith.cmpi sgt, %476, %595 : vector<8x1xi32>
    %c0_i32_203 = arith.constant 0 : i32
    %597 = vector.broadcast %c0_i32_203 : i32 to vector<8x1xi32>
    %598 = arith.select %596, %594, %597 : vector<8x1xi1>, vector<8x1xi32>
    %c3_i32_204 = arith.constant 3 : i32
    %599 = vector.broadcast %c3_i32_204 : i32 to vector<8x8xi32>
    %600 = arith.cmpi eq, %477, %599 : vector<8x8xi32>
    %601 = vector.shape_cast %598 : vector<8x1xi32> to vector<8x1xi32>
    %602 = vector.broadcast %601 : vector<8x1xi32> to vector<8x8xi32>
    %603 = arith.select %600, %602, %578 : vector<8x8xi1>, vector<8x8xi32>
    %604 = vector.broadcast %594 : vector<8x1xi32> to vector<8x8xi32>
    %605 = arith.cmpi eq, %468, %604 : vector<8x8xi32>
    %c0_i32_205 = arith.constant 0 : i32
    %606 = vector.broadcast %c0_i32_205 : i32 to vector<8x8xi32>
    %607 = arith.select %605, %364, %606 : vector<8x8xi1>, vector<8x8xi32>
    %cst_206 = arith.constant dense<0> : vector<8xi32>
    %608 = vector.multi_reduction <add>, %607, %cst_206 [1] : vector<8x8xi32> to vector<8xi32>
    %609 = vector.shape_cast %608 : vector<8xi32> to vector<8x1xi32>
    %c1_i32_207 = arith.constant 1 : i32
    %610 = vector.broadcast %c1_i32_207 : i32 to vector<8x1xi32>
    %611 = arith.subi %476, %610 : vector<8x1xi32>
    %c2_i32 = arith.constant 2 : i32
    %612 = vector.broadcast %c2_i32 : i32 to vector<8x1xi32>
    %613 = arith.cmpi eq, %611, %612 : vector<8x1xi32>
    %c1_i32_208 = arith.constant 1 : i32
    %614 = vector.broadcast %c1_i32_208 : i32 to vector<8x1xi32>
    %615 = arith.subi %476, %614 : vector<8x1xi32>
    %c2_i32_209 = arith.constant 2 : i32
    %616 = vector.broadcast %c2_i32_209 : i32 to vector<8x1xi32>
    %617 = arith.cmpi sgt, %615, %616 : vector<8x1xi32>
    %618 = arith.select %617, %609, %594 : vector<8x1xi1>, vector<8x1xi32>
    %619 = arith.select %613, %474, %618 : vector<8x1xi1>, vector<8x1xi32>
    %c2_i32_210 = arith.constant 2 : i32
    %620 = vector.broadcast %c2_i32_210 : i32 to vector<8x1xi32>
    %621 = arith.cmpi sgt, %476, %620 : vector<8x1xi32>
    %c0_i32_211 = arith.constant 0 : i32
    %622 = vector.broadcast %c0_i32_211 : i32 to vector<8x1xi32>
    %623 = arith.select %621, %619, %622 : vector<8x1xi1>, vector<8x1xi32>
    %c2_i32_212 = arith.constant 2 : i32
    %624 = vector.broadcast %c2_i32_212 : i32 to vector<8x8xi32>
    %625 = arith.cmpi eq, %477, %624 : vector<8x8xi32>
    %626 = vector.shape_cast %623 : vector<8x1xi32> to vector<8x1xi32>
    %627 = vector.broadcast %626 : vector<8x1xi32> to vector<8x8xi32>
    %628 = arith.select %625, %627, %603 : vector<8x8xi1>, vector<8x8xi32>
    %629 = vector.broadcast %619 : vector<8x1xi32> to vector<8x8xi32>
    %630 = arith.cmpi eq, %468, %629 : vector<8x8xi32>
    %c0_i32_213 = arith.constant 0 : i32
    %631 = vector.broadcast %c0_i32_213 : i32 to vector<8x8xi32>
    %632 = arith.select %630, %341, %631 : vector<8x8xi1>, vector<8x8xi32>
    %cst_214 = arith.constant dense<0> : vector<8xi32>
    %633 = vector.multi_reduction <add>, %632, %cst_214 [1] : vector<8x8xi32> to vector<8xi32>
    %634 = vector.shape_cast %633 : vector<8xi32> to vector<8x1xi32>
    %c1_i32_215 = arith.constant 1 : i32
    %635 = vector.broadcast %c1_i32_215 : i32 to vector<8x1xi32>
    %636 = arith.subi %476, %635 : vector<8x1xi32>
    %c1_i32_216 = arith.constant 1 : i32
    %637 = vector.broadcast %c1_i32_216 : i32 to vector<8x1xi32>
    %638 = arith.cmpi eq, %636, %637 : vector<8x1xi32>
    %c1_i32_217 = arith.constant 1 : i32
    %639 = vector.broadcast %c1_i32_217 : i32 to vector<8x1xi32>
    %640 = arith.subi %476, %639 : vector<8x1xi32>
    %c1_i32_218 = arith.constant 1 : i32
    %641 = vector.broadcast %c1_i32_218 : i32 to vector<8x1xi32>
    %642 = arith.cmpi sgt, %640, %641 : vector<8x1xi32>
    %643 = arith.select %642, %634, %619 : vector<8x1xi1>, vector<8x1xi32>
    %644 = arith.select %638, %474, %643 : vector<8x1xi1>, vector<8x1xi32>
    %c1_i32_219 = arith.constant 1 : i32
    %645 = vector.broadcast %c1_i32_219 : i32 to vector<8x1xi32>
    %646 = arith.cmpi sgt, %476, %645 : vector<8x1xi32>
    %c0_i32_220 = arith.constant 0 : i32
    %647 = vector.broadcast %c0_i32_220 : i32 to vector<8x1xi32>
    %648 = arith.select %646, %644, %647 : vector<8x1xi1>, vector<8x1xi32>
    %c1_i32_221 = arith.constant 1 : i32
    %649 = vector.broadcast %c1_i32_221 : i32 to vector<8x8xi32>
    %650 = arith.cmpi eq, %477, %649 : vector<8x8xi32>
    %651 = vector.shape_cast %648 : vector<8x1xi32> to vector<8x1xi32>
    %652 = vector.broadcast %651 : vector<8x1xi32> to vector<8x8xi32>
    %653 = arith.select %650, %652, %628 : vector<8x8xi1>, vector<8x8xi32>
    %654 = vector.broadcast %644 : vector<8x1xi32> to vector<8x8xi32>
    %655 = arith.cmpi eq, %468, %654 : vector<8x8xi32>
    %c0_i32_222 = arith.constant 0 : i32
    %656 = vector.broadcast %c0_i32_222 : i32 to vector<8x8xi32>
    %657 = arith.select %655, %318, %656 : vector<8x8xi1>, vector<8x8xi32>
    %cst_223 = arith.constant dense<0> : vector<8xi32>
    %658 = vector.multi_reduction <add>, %657, %cst_223 [1] : vector<8x8xi32> to vector<8xi32>
    %659 = vector.shape_cast %658 : vector<8xi32> to vector<8x1xi32>
    %c1_i32_224 = arith.constant 1 : i32
    %660 = vector.broadcast %c1_i32_224 : i32 to vector<8x1xi32>
    %661 = arith.subi %476, %660 : vector<8x1xi32>
    %c0_i32_225 = arith.constant 0 : i32
    %662 = vector.broadcast %c0_i32_225 : i32 to vector<8x1xi32>
    %663 = arith.cmpi eq, %661, %662 : vector<8x1xi32>
    %c1_i32_226 = arith.constant 1 : i32
    %664 = vector.broadcast %c1_i32_226 : i32 to vector<8x1xi32>
    %665 = arith.subi %476, %664 : vector<8x1xi32>
    %c0_i32_227 = arith.constant 0 : i32
    %666 = vector.broadcast %c0_i32_227 : i32 to vector<8x1xi32>
    %667 = arith.cmpi sgt, %665, %666 : vector<8x1xi32>
    %668 = arith.select %667, %659, %644 : vector<8x1xi1>, vector<8x1xi32>
    %669 = arith.select %663, %474, %668 : vector<8x1xi1>, vector<8x1xi32>
    %c0_i32_228 = arith.constant 0 : i32
    %670 = vector.broadcast %c0_i32_228 : i32 to vector<8x1xi32>
    %671 = arith.cmpi sgt, %476, %670 : vector<8x1xi32>
    %c0_i32_229 = arith.constant 0 : i32
    %672 = vector.broadcast %c0_i32_229 : i32 to vector<8x1xi32>
    %673 = arith.select %671, %669, %672 : vector<8x1xi1>, vector<8x1xi32>
    %c0_i32_230 = arith.constant 0 : i32
    %674 = vector.broadcast %c0_i32_230 : i32 to vector<8x8xi32>
    %675 = arith.cmpi eq, %477, %674 : vector<8x8xi32>
    %676 = vector.shape_cast %673 : vector<8x1xi32> to vector<8x1xi32>
    %677 = vector.broadcast %676 : vector<8x1xi32> to vector<8x8xi32>
    %678 = arith.select %675, %677, %653 : vector<8x8xi1>, vector<8x8xi32>
    %679 = vector.extract_strided_slice %467 {offsets = [0, 0], sizes = [4, 1], strides = [1, 1]} : vector<8x1xf32> to vector<4x1xf32>
    %c0_231 = arith.constant 0 : index
    %c0_232 = arith.constant 0 : index
    %680 = vector.load %arg3[%c0_231, %c0_232] : memref<4x1xf32, #tpu.memory_space<vmem>>, vector<4x1xf32>
    tpu.vector_store %arg3[%c0_231, %c0_232], %679 {strides = array<i32>} : memref<4x1xf32, #tpu.memory_space<vmem>>, vector<4x1xf32>,
    %681 = vector.extract_strided_slice %678 {offsets = [0, 0], sizes = [4, 8], strides = [1, 1]} : vector<8x8xi32> to vector<4x8xi32>
    %c0_233 = arith.constant 0 : index
    %c0_234 = arith.constant 0 : index
    %682 = vector.load %arg4[%c0_233, %c0_234] : memref<4x8xi32, #tpu.memory_space<vmem>>, vector<4x8xi32>
    tpu.vector_store %arg4[%c0_233, %c0_234], %681 {strides = array<i32>} : memref<4x8xi32, #tpu.memory_space<vmem>>, vector<4x8xi32>,
    return
  }
}

</mosaic_0001>

<bundles_post_ra>
// kernel: _lambda_.1
= control target key start
LH: loop header
LB: loop body
LE: loop exit
PB: predicated region body
PF: predicated region fallthrough
CT: control target
= control target key end

     0   :  { %v7873_v2 = vmov 0   ;;  %s7868_s0 = inlined_call_operand.vmem [shape: s32[4,8,1], index: 0, kind: input, shape index: {}]   ;;  %s7869_s1 = inlined_call_operand.vmem [shape: f32[160,256], index: 1, kind: input, shape index: {}]   ;;  %s7870_s2 = inlined_call_operand.vmem [shape: f32[96,8], index: 2, kind: input, shape index: {}]   ;;  %s7871_s3 = inlined_call_operand.vmem [shape: f32[4,1], index: 3, kind: output, shape index: {0}]   ;;  %s7872_s4 = inlined_call_operand.hbm [shape: s32[4,8], index: 4, kind: output, shape index: {1}]  }
   0x1   :  { %v19_v0 = vld [vmem:[%s7868_s0 + $0x10] sm:$0xff]  ;;  %v17_v1 = vld [vmem:[%s7868_s0] sm:$0xff]  ;;  %5077 = vset.pattern.permute.xlu1 %v7873_v2  ;;  %5076 = vset.pattern.permute.xlu0 %v7873_v2 }
   0x2   :  { %10 = vsyncpa [#allocation6], 0  ;;  %30 = vperm.xlu1 %5077, %v19_v0   ;;  %24 = vperm.xlu0 %5076, %v17_v1   ;;  %v20_v3 = vld [vmem:[%s7868_s0 + $0x18] sm:$0xff]  ;;  %v18_v4 = vld [vmem:[%s7868_s0 + $0x8] sm:$0xff]  ;;  %vm55_vm0 = vcmask 261120   ;;  %v21_v12 = vlaneseq  ;;  %vm216_vm7 = vcmask 1043456  }
   0x3   :  { %v47_v5 = vld [vmem:[%s7869_s1] sm:$0xff]  ;;  %v186_v6 = vld [vmem:[%s7869_s1 + $0x88] sm:$0xff]  ;;  %v188_v7 = vld [vmem:[%s7869_s1 + $0x98] sm:$0xff]  ;;  %v5201_v18 = vmov 1.0|1.0   ;;  %v7875_v28 = vmov 0.0  }
   0x4   :  { %4871 = vmatprep.mubr.msk.f32.mxu0 %vm55_vm0, %v47_v5  ;;  %v185_v8 = vld [vmem:[%s7869_s1 + $0x80] sm:$0xff]  ;;  %v4919_v9 = vpack.c.bf16 %v188_v7, %v186_v6  ;;  %v187_v10 = vld [vmem:[%s7869_s1 + $0x90] sm:$0xff]  ;;  %v5263_v15 = vand.u32 127, %v21_v12  ;;  %v190_v26 = vld [vmem:[%s7869_s1 + $0xa8] sm:$0xf]  ;;  %287 = vmatprep.mubr.f32.mxu1 %v7875_v28  ;;  %vm191_vm8 = vcmask 162816  }
   0x5   :  { %v4921_v11 = vpack.c.bf16 %v187_v10, %v185_v8  ;;  %v48_v19 = vld [vmem:[%s7869_s1 + $0x10] sm:$0xff]  ;;  %v49_v20 = vld [vmem:[%s7869_s1 + $0x20] sm:$0xff]  ;;  %v385_v29 = vld [vmem:[%s7869_s1 + $0xb8] sm:$0xff]  ;;  %vm414_vm11 = vcmask 523264   ;;  %s5204_s0 = smov 32   ;;  %vm1721_vm14 = vcmask 64512  }
   0x6   :  { %33 = vperm.xlu1 %5077, %v20_v3   ;;  %27 = vperm.xlu0 %5076, %v18_v4   ;;  %v50_v21 = vld [vmem:[%s7869_s1 + $0x30] sm:$0xff]  ;;  %v51_v22 = vld [vmem:[%s7869_s1 + $0x40] sm:$0xff]  ;;  %v387_v30 = vld [vmem:[%s7869_s1 + $0xc8] sm:$0xff]  ;;  %vm1928_vm15 = vcmask 1041409  }
   0x7   :  { %4920 = vmatprep.subr.bf16.mxu1 %v4919_v9  ;;  %v52_v23 = vld [vmem:[%s7869_s1 + $0x50] sm:$0xff]  ;;  %v53_v24 = vld [vmem:[%s7869_s1 + $0x60] sm:$0xff]  ;;  %v5311_v31 = vpack.c.bf16 %v387_v30, %v385_v29  ;;  %v389_v35 = vld [vmem:[%s7869_s1 + $0xd8] sm:$0xff] }
   0x8   :  { %4922 = vmatpush1.bf16.msra.mxu1 %v4921_v11  ;;  %v54_v25 = vld [vmem:[%s7869_s1 + $0x70] sm:$0xff]  ;;  %v189_v27 = vld [vmem:[%s7869_s1 + $0xa0] sm:$0xf]  ;;  %v391_v36 = vld [vmem:[%s7869_s1 + $0xe8] sm:$0xff] }
   0x9   :  { %4789 = vmatprep.subr.msk.mxu1 %vm216_vm7, %v190_v26  ;;  %v384_v32 = vld [vmem:[%s7869_s1 + $0xb0] sm:$0xff]  ;;  %v386_v33 = vld [vmem:[%s7869_s1 + $0xc0] sm:$0xff]  ;;  %v5330_v37 = vpack.c.bf16 %v391_v36, %v389_v35  ;;  %v393_v41 = vld [vmem:[%s7869_s1 + $0xf8] sm:$0xff] }
   0xa   :  { %v5319_v34 = vpack.c.bf16 %v386_v33, %v384_v32  ;;  %v388_v38 = vld [vmem:[%s7869_s1 + $0xd0] sm:$0xff]  ;;  %v390_v39 = vld [vmem:[%s7869_s1 + $0xe0] sm:$0xff]  ;;  %v395_v42 = vld [vmem:[%s7869_s1 + $0x108] sm:$0xff]  ;;  %v5518_v32 = vshrl.u32 %v21_v12, 7 }
   0xb   :  { %v5338_v40 = vpack.c.bf16 %v390_v39, %v388_v38  ;;  %v5348_v43 = vpack.c.bf16 %v395_v42, %v393_v41  ;;  %v392_v44 = vld [vmem:[%s7869_s1 + $0xf0] sm:$0xff]  ;;  %v394_v45 = vld [vmem:[%s7869_s1 + $0x100] sm:$0xff]  ;;  %v397_v47 = vld [vmem:[%s7869_s1 + $0x118] sm:$0xff] }
   0xc   :  { %4790 = vmatpush1.msk.msra.mxu1 %vm216_vm7, %v189_v27  ;;  %v5356_v46 = vpack.c.bf16 %v394_v45, %v392_v44  ;;  %v399_v48 = vld [vmem:[%s7869_s1 + $0x128] sm:$0xff]  ;;  %v396_v50 = vld [vmem:[%s7869_s1 + $0x110] sm:$0xff]  ;;  %v398_v51 = vld [vmem:[%s7869_s1 + $0x120] sm:$0xff]  ;;  %v5541_v41 = vsub.s32 0, %v5518_v32  ;;  %v5589_v27 = vsub.s32 1, %v5518_v32 }
   0xd   :  { %4940 = vmatprep.subr.bf16.mxu1 %v5311_v31  ;;  %v5366_v49 = vpack.c.bf16 %v399_v48, %v397_v47  ;;  %v5374_v52 = vpack.c.bf16 %v398_v51, %v396_v50  ;;  %v4799_v44 = vld [vmem:[%s7869_s1 + $0x130] ss:$8 sm:$0x3]  ;;  %s5203_s1 = smov 64  }
  0x81   :  { %v31_v13 = vpop.permute.xlu1 %30  ;;  %v25_v14 = vpop.permute.xlu0 %24 }
  0x82   :  { %vm37_vm2 = vcmp.eq.s32.totalorder %v31_v13, %v5263_v15  ;;  %vm35_vm4 = vcmp.eq.s32.totalorder %v25_v14, %v5263_v15  ;;  %v402_v13 = vadd.s32 128, %v5263_v15 }
  0x85   :  { %v34_v16 = vpop.permute.xlu1 %33  ;;  %v28_v17 = vpop.permute.xlu0 %27 }
  0x86   :  { %vm36_vm1 = vcmp.eq.s32.totalorder %v28_v17, %v5263_v15  ;;  %vm38_vm3 = vcmp.eq.s32.totalorder %v34_v16, %v5263_v15  ;;  %v403_v17 = vand.u32 32, %v5263_v15 }
  0x87   :  { %vm4911_vm5 = vmpackc.low %vm36_vm1, %vm35_vm4  ;;  %vm1930_vm1 = vcmask 1042434   ;;  %vm1936_vm4 = vcmask 1045509  }
  0x88   :  { %4912 = vmatprep.subr.msk.bf16.mxu0 %vm4911_vm5, %v5201_v18  ;;  %vm4915_vm6 = vmpackc.low %vm38_vm3, %vm37_vm2  ;;  %vm5487_vm9 = vcmp.eq.s32.totalorder %v403_v17, 0  ;;  %vm1932_vm2 = vcmask 1043459   ;;  %vm1934_vm3 = vcmask 1044484  }
  0x89   :  { %4914 = vmatpush3.bf16.msk.msra.mxu0 %vm4911_vm5, %v5201_v18  ;;  %vm1938_vm5 = vcmask 1046534  }
  0x8a   :  { %4916 = vmatprep.subr.msk.bf16.mxu0 %vm4915_vm6, %v5201_v18 }
  0x8d   :  { %4918 = vmatpush3.bf16.msk.msra.mxu0 %vm4915_vm6, %v5201_v18  ;;  %v404_v18 = vand.u32 32, %v402_v13  ;;  %v5567_v13 = vrot.slane %v4799_v44, %v5541_v41  ;;  %vm1940_vm6 = vcmask 1047559  }
  0x8e   :  { %4924 = vmatprep.subr.bf16.mxu0 %v5311_v31 }
  0x8f   :  { %vm5491_vm10 = vcmp.eq.s32.totalorder %v404_v18, 0 }
  0x90   :  { %4872 = vmatmul.mubr.msk.f32.vlgmr.msra.gmra.mrb[0].mxu0 %vm55_vm0, %v48_v19 }
  0x91   :  { %4874 = vmatprep.mubr.msk.f32.mxu0 %vm55_vm0, %v49_v20  ;;  %4926 = vmatpush1.bf16.msra.mxu0 %v5319_v34 }
  0x92   :  { %4928 = vmatprep.subr.bf16.mxu0 %v5330_v37 }
  0x94   :  { %4875 = vmatmul.mubr.msk.f32.gmra.mrb[2].mxu0 %vm55_vm0, %v50_v21 }
  0x95   :  { %4877 = vmatprep.mubr.msk.f32.mxu0 %vm55_vm0, %v51_v22  ;;  %4930 = vmatpush1.bf16.msra.mxu0 %v5338_v40 }
  0x96   :  { %4932 = vmatprep.subr.bf16.mxu0 %v5348_v43 }
  0x98   :  { %4878 = vmatmul.mubr.msk.f32.gmra.mrb[4].mxu0 %vm55_vm0, %v52_v23 }
  0x99   :  { %4880 = vmatprep.mubr.msk.f32.mxu0 %vm55_vm0, %v53_v24  ;;  %4934 = vmatpush1.bf16.msra.mxu0 %v5356_v46 }
  0x9a   :  { %4936 = vmatprep.subr.bf16.mxu0 %v5366_v49 }
  0x9c   :  { %4881 = vmatmul.mubr.msk.f32.gmra.mrb[6].mxu0 %vm55_vm0, %v54_v25 }
  0x9d   :  { %482 = vmatprep.mubr.f32.mxu0 %v7875_v28  ;;  %4938 = vmatpush1.bf16.msra.mxu0 %v5374_v52 }
  0x9e   :  { %4956 = vmatprep.subr.bf16.mxu0 %v5311_v31 }
  0xa0   :  { %483 = vmatmul.mubr.f32.vlgmr.msra.gmra.mrb[8].mxu0 %v7875_v28 }
  0xa1   :  { %4958 = vmatpush1.bf16.msra.mxu0 %v5319_v34  ;;  %728 = vmatprep.mubr.f32.mxu0 %v7875_v28 }
  0xa2   :  { %4960 = vmatprep.subr.bf16.mxu0 %v5330_v37 }
  0xa5   :  { %4962 = vmatpush1.bf16.msra.mxu0 %v5338_v40 }
  0xa6   :  { %4964 = vmatprep.subr.bf16.mxu0 %v5348_v43 }
  0xa9   :  { %4966 = vmatpush1.bf16.msra.mxu0 %v5356_v46 }
  0xaa   :  { %4968 = vmatprep.subr.bf16.mxu0 %v5366_v49 }
  0xad   :  { %4970 = vmatpush1.bf16.msra.mxu0 %v5374_v52 }
  0xae   :  { %4988 = vmatprep.subr.bf16.mxu0 %v5311_v31 }
 0x163   :  { %v5389_v53 = vpop.f32.mrb[0].mxu0 }
 0x164   :  { %v5391_v54 = vpop.f32.mrb[1].mxu0  ;;  %v5395_v55 = vsel %vm191_vm8, %v5389_v53, 0.0 }
 0x165   :  { %7951 = vst [vmem:[#allocation8_spill] sm:$0xff] %v5391_v54  ;;  %4791 = vmatmul.mubr.msk.f32.vlgmr.msra.gmra.mrb[0].mxu1 %vm191_vm8, %v5391_v54  ;;  %v5401_v56 = vsel %vm191_vm8, %v5391_v54, 0.0 }
 0x166   :  { %7952 = vst [vmem:[#allocation9_spill] sm:$0xff] %v5401_v56  ;;  %293 = vmatprep.mubr.f32.mxu1 %v7875_v28  ;;  %4942 = vmatpush1.bf16.msra.mxu1 %v5319_v34 }
 0x167   :  { %v5405_v57 = vpop.f32.mrb[2].mxu0  ;;  %4944 = vmatprep.subr.bf16.mxu1 %v5330_v37 }
 0x168   :  { %v5408_v58 = vpop.f32.mrb[3].mxu0  ;;  %v5412_v59 = vsel %vm191_vm8, %v5405_v57, 0.0 }
 0x169   :  { %4792 = vmatmul.mubr.msk.f32.gmra.mrb[2].mxu1 %vm191_vm8, %v5389_v53  ;;  %v5418_v60 = vsel %vm191_vm8, %v5408_v58, 0.0 }
 0x16a   :  { %299 = vmatprep.mubr.f32.mxu1 %v7875_v28  ;;  %4946 = vmatpush1.bf16.msra.mxu1 %v5338_v40 }
 0x16b   :  { %v5422_v61 = vpop.f32.mrb[4].mxu0  ;;  %4948 = vmatprep.subr.bf16.mxu1 %v5348_v43 }
 0x16c   :  { %v5425_v62 = vpop.f32.mrb[5].mxu0  ;;  %v5429_v63 = vsel %vm191_vm8, %v5422_v61, 0.0 }
 0x16d   :  { %4793 = vmatmul.mubr.msk.f32.gmra.mrb[4].mxu1 %vm191_vm8, %v5408_v58  ;;  %v5435_v0 = vsel %vm191_vm8, %v5425_v62, 0.0 }
 0x16e   :  { %305 = vmatprep.mubr.f32.mxu1 %v7875_v28  ;;  %4950 = vmatpush1.bf16.msra.mxu1 %v5356_v46 }
 0x16f   :  { %v5439_v1 = vpop.f32.mrb[6].mxu0  ;;  %4952 = vmatprep.subr.bf16.mxu1 %v5366_v49 }
 0x170   :  { %7953 = vst [vmem:[#allocation10_spill] sm:$0xff] %v5439_v1  ;;  %v5442_v3 = vpop.f32.mrb[7].mxu0  ;;  %v5446_v4 = vsel %vm191_vm8, %v5439_v1, 0.0 }
 0x171   :  { %4794 = vmatmul.mubr.msk.f32.gmra.mrb[6].mxu1 %vm191_vm8, %v5405_v57  ;;  %v5452_v5 = vsel %vm191_vm8, %v5442_v3, 0.0 }
 0x172   :  { %311 = vmatprep.mubr.f32.mxu1 %v7875_v28  ;;  %4954 = vmatpush1.bf16.msra.mxu1 %v5374_v52 }
 0x173   :  { %4972 = vmatprep.subr.bf16.mxu1 %v5311_v31  ;;  %v484_v6 = vpop.f32.mrb[8].mxu0 }
 0x174   :  { %v486_v7 = vpop.f32.mrb[9].mxu0 }
 0x175   :  { %4795 = vmatmul.mubr.msk.f32.gmra.mrb[8].mxu1 %vm191_vm8, %v5425_v62 }
 0x176   :  { %317 = vmatprep.mubr.f32.mxu1 %v7875_v28 }
 0x179   :  { %4796 = vmatmul.mubr.msk.f32.gmra.mrb[10].mxu1 %vm191_vm8, %v5422_v61 }
 0x17a   :  { %323 = vmatprep.mubr.f32.mxu1 %v7875_v28 }
 0x17d   :  { %4797 = vmatmul.mubr.msk.f32.gmra.mrb[12].mxu1 %vm191_vm8, %v5442_v3 }
 0x17e   :  { %329 = vmatprep.mubr.f32.mxu1 %v7875_v28 }
 0x181   :  { %4798 = vmatmul.mubr.msk.f32.gmra.mrb[14].mxu1 %vm191_vm8, %v5439_v1 }
 0x182   :  { %610 = vmatprep.mubr.f32.mxu1 %v7875_v28 }
 0x238   :  { %v5469_v8 = vpop.f32.mrb[0].mxu1 }
 0x239   :  { %v5471_v9 = vpop.f32.mrb[1].mxu1 }
 0x23c   :  { %v5473_v10 = vpop.f32.mrb[2].mxu1 }
 0x23d   :  { %v5475_v11 = vpop.f32.mrb[3].mxu1 }
 0x240   :  { %v5478_v14 = vpop.f32.mrb[4].mxu1 }
 0x241   :  { %v5480_v16 = vpop.f32.mrb[5].mxu1 }
 0x244   :  { %v5483_v19 = vpop.f32.mrb[6].mxu1 }
 0x245   :  { %v5485_v20 = vpop.f32.mrb[7].mxu1 }
 0x248   :  { %v5495_v23 = vpop.f32.mrb[8].mxu1 }
 0x249   :  { %v5497_v24 = vpop.f32.mrb[9].mxu1 }
 0x24c   :  { %v5515_v30 = vpop.f32.mrb[10].mxu1 }
 0x24d   :  { %v5520_v33 = vpop.f32.mrb[11].mxu1 }
 0x250   :  { %v5538_v39 = vpop.f32.mrb[12].mxu1 }
 0x251   :  { %v5543_v42 = vpop.f32.mrb[13].mxu1  ;;  %v542_v45 = vsel %vm5487_vm9, %v5473_v10, %v5538_v39 }
 0x252   :  { %v543_v48 = vsel %vm5491_vm10, %v5475_v11, %v5543_v42 }
 0x254   :  { %v5564_v51 = vpop.f32.mrb[14].mxu1 }
 0x255   :  { %v412_v17 = vsel %vm5487_vm9, %v5469_v8, %v5564_v51  ;;  %v5573_v18 = vpop.f32.mrb[15].mxu1 }
 0x256   :  { %v489_v47 = vadd.f32 %v484_v6, %v412_v17  ;;  %v413_v50 = vsel %vm5491_vm10, %v5471_v9, %v5573_v18  ;;  %v5592_v6 = vrot.slane %v4799_v44, %v5589_v27 }
 0x257   :  { %v490_v36 = vadd.f32 %v486_v7, %v413_v50 }
 0x258   :  { %v502_v29 = vadd.f32 %v5567_v13, %v489_v47 }
 0x259   :  { %v503_v17 = vadd.f32 %v5592_v6, %v490_v36 }
 0x25a   :  { %v4800_v26 = vmul.f32 -1.442695, %v502_v29 }
 0x25b   :  { %v4801_v7 = vmul.f32 -1.442695, %v503_v17 }
 0x25c   :  { %5078 = vpow2.f32 %v4800_v26 }
 0x25d   :  { %5080 = vtanh.f32 %v503_v17 }
 0x266   :  { %v5079_v2 = vpop.eup %5078 }
 0x267   :  { %v510_v25 = vadd.f32 1.0, %v5079_v2  ;;  %v5081_v38 = vpop.eup %5080 }
 0x269   :  { %5082 = vrcp.f32 %v510_v25 }
 0x26a   :  { %5084 = vpow2.f32 %v4801_v7 }
 0x273   :  { %v5083_v35 = vpop.eup %5082 }
 0x274   :  { %v518_v12 = vmul.f32 %v5083_v35, %v5081_v38  ;;  %v5085_v26 = vpop.eup %5084  ;;  %v517_v47 = vmul.f32 0.0, %v5083_v35  ;;  %v7958_v35 = vmov 0.0  }
 0x275   :  { %v511_v29 = vadd.f32 1.0, %v5085_v26 }
 0x276   :  { %520 = vrot.lane.b32.xlu0 %v518_v12, %s5203_s1 }
 0x277   :  { %5086 = vrcp.f32 %v511_v29 }
 0x281   :  { %v5087_v36 = vpop.eup %5086 }
 0x2e8   :  { %v521_v50 = vpop.permute.xlu0 %520 }
 0x2e9   :  { %v523_v44 = vadd.f32 %v521_v50, %v517_v47 }
 0x2eb   :  { %5088 = vtanh.f32 %v523_v44 }
 0x2f5   :  { %v5089_v28 = vpop.eup %5088 }
 0x2f6   :  { %v5596_v2 = vmul.f32 %v5089_v28, %v5087_v36 }
 0x2f8   :  { %527 = vrot.lane.b32.xlu1 %v5596_v2, %s5203_s1 }
 0x36a   :  { %v528_v25 = vpop.permute.xlu1 %527 }
 0x36b   :  { %530 = vst.msk [vmem:[#allocation3] sm:$0xff] %vm55_vm0, %v528_v25  ;;  %4802 = vmatmul.mubr.msk.f32.vlgmr.msra.gmra.mrb[16].mxu1 %vm414_vm11, %v528_v25 }
 0x36c   :  { %4974 = vmatpush1.bf16.msra.mxu1 %v5319_v34  ;;  %846 = vmatprep.mubr.f32.mxu1 %v7958_v35 }
 0x36d   :  { %4976 = vmatprep.subr.bf16.mxu1 %v5330_v37 }
 0x370   :  { %4978 = vmatpush1.bf16.msra.mxu1 %v5338_v40 }
 0x371   :  { %4980 = vmatprep.subr.bf16.mxu1 %v5348_v43 }
 0x374   :  { %4982 = vmatpush1.bf16.msra.mxu1 %v5356_v46 }
 0x375   :  { %4984 = vmatprep.subr.bf16.mxu1 %v5366_v49 }
 0x378   :  { %4986 = vmatpush1.bf16.msra.mxu1 %v5374_v52 }
 0x379   :  { %5004 = vmatprep.subr.bf16.mxu1 %v5311_v31 }
 0x43e   :  { %v612_v28 = vpop.f32.mrb[16].mxu1 }
 0x43f   :  { %v617_v38 = vadd.f32 %v612_v28, %v542_v45  ;;  %v614_v12 = vpop.f32.mrb[17].mxu1 }
 0x440   :  { %v618_v17 = vadd.f32 %v614_v12, %v543_v48 }
 0x441   :  { %v619_v7 = vadd.f32 %v617_v38, %v5567_v13 }
 0x442   :  { %v620_v29 = vadd.f32 %v618_v17, %v5592_v6 }
 0x443   :  { %v4803_v26 = vmul.f32 -1.442695, %v619_v7 }
 0x444   :  { %v4804_v56 = vmul.f32 -1.442695, %v620_v29 }
 0x445   :  { %5090 = vpow2.f32 %v4803_v26 }
 0x446   :  { %5092 = vtanh.f32 %v620_v29 }
 0x44f   :  { %v5091_v47 = vpop.eup %5090 }
 0x450   :  { %v627_v50 = vadd.f32 1.0, %v5091_v47  ;;  %v5093_v36 = vpop.eup %5092 }
 0x452   :  { %5094 = vrcp.f32 %v627_v50  ;;  %v7960_v50 = vsel %vm5491_vm10, %v5480_v16, %v5520_v33 }
 0x453   :  { %5096 = vpow2.f32 %v4804_v56  ;;  %v7959_v56 = vsel %vm5487_vm9, %v5478_v14, %v5515_v30 }
 0x45c   :  { %v5095_v25 = vpop.eup %5094 }
 0x45d   :  { %v635_v54 = vmul.f32 %v5095_v25, %v5093_v36  ;;  %v5097_v45 = vpop.eup %5096  ;;  %v634_v48 = vmul.f32 %v5095_v25, %v523_v44 }
 0x45e   :  { %v628_v28 = vadd.f32 1.0, %v5097_v45 }
 0x45f   :  { %637 = vrot.lane.b32.xlu0 %v635_v54, %s5203_s1 }
 0x460   :  { %5098 = vrcp.f32 %v628_v28 }
 0x46a   :  { %v5099_v7 = vpop.eup %5098 }
 0x4d1   :  { %v638_v12 = vpop.permute.xlu0 %637 }
 0x4d2   :  { %v640_v38 = vadd.f32 %v638_v12, %v634_v48 }
 0x4d4   :  { %5100 = vtanh.f32 %v640_v38 }
 0x4de   :  { %v5101_v17 = vpop.eup %5100 }
 0x4df   :  { %v5614_v26 = vmul.f32 %v5101_v17, %v5099_v7 }
 0x4e1   :  { %644 = vrot.lane.b32.xlu1 %v5614_v26, %s5203_s1 }
 0x553   :  { %v645_v47 = vpop.permute.xlu1 %644 }
 0x554   :  { %648 = vst.msk [vmem:[#allocation3 + $0x8] sm:$0xff] %vm55_vm0, %v645_v47  ;;  %4805 = vmatmul.mubr.msk.f32.vlgmr.msra.gmra.mrb[10].mxu0 %vm414_vm11, %v645_v47 }
 0x555   :  { %4990 = vmatpush1.bf16.msra.mxu0 %v5319_v34  ;;  %962 = vmatprep.mubr.f32.mxu0 %v7958_v35 }
 0x556   :  { %4992 = vmatprep.subr.bf16.mxu0 %v5330_v37 }
 0x559   :  { %4994 = vmatpush1.bf16.msra.mxu0 %v5338_v40 }
 0x55a   :  { %4996 = vmatprep.subr.bf16.mxu0 %v5348_v43 }
 0x55d   :  { %4998 = vmatpush1.bf16.msra.mxu0 %v5356_v46 }
 0x55e   :  { %5000 = vmatprep.subr.bf16.mxu0 %v5366_v49 }
 0x561   :  { %5002 = vmatpush1.bf16.msra.mxu0 %v5374_v52 }
 0x562   :  { %5020 = vmatprep.subr.bf16.mxu0 %v5311_v31 }
 0x627   :  { %v730_v54 = vpop.f32.mrb[10].mxu0 }
 0x628   :  { %v735_v44 = vadd.f32 %v730_v54, %v7959_v56  ;;  %v732_v29 = vpop.f32.mrb[11].mxu0 }
 0x629   :  { %v736_v36 = vadd.f32 %v732_v29, %v7960_v50 }
 0x62a   :  { %v737_v25 = vadd.f32 %v735_v44, %v5567_v13 }
 0x62b   :  { %v738_v28 = vadd.f32 %v736_v36, %v5592_v6 }
 0x62c   :  { %v4806_v45 = vmul.f32 -1.442695, %v737_v25 }
 0x62d   :  { %v4807_v54 = vmul.f32 -1.442695, %v738_v28 }
 0x62e   :  { %5102 = vpow2.f32 %v4806_v45 }
 0x62f   :  { %5104 = vtanh.f32 %v738_v28 }
 0x638   :  { %v5103_v48 = vpop.eup %5102 }
 0x639   :  { %v745_v12 = vadd.f32 1.0, %v5103_v48  ;;  %v5105_v7 = vpop.eup %5104 }
 0x63b   :  { %5106 = vrcp.f32 %v745_v12 }
 0x63c   :  { %5108 = vpow2.f32 %v4807_v54 }
 0x645   :  { %v5107_v17 = vpop.eup %5106 }
 0x646   :  { %v753_v47 = vmul.f32 %v5107_v17, %v5105_v7  ;;  %v5109_v56 = vpop.eup %5108  ;;  %v752_v29 = vmul.f32 %v5107_v17, %v640_v38  ;;  %v7961_v38 = vsel %vm5487_vm9, %v5483_v19, %v5495_v23  ;;  %v7962_v7 = vsel %vm5491_vm10, %v5485_v20, %v5497_v24 }
 0x647   :  { %v746_v1 = vadd.f32 1.0, %v5109_v56 }
 0x648   :  { %755 = vrot.lane.b32.xlu0 %v753_v47, %s5203_s1 }
 0x649   :  { %5110 = vrcp.f32 %v746_v1 }
 0x653   :  { %v5111_v25 = vpop.eup %5110 }
 0x6ba   :  { %v756_v50 = vpop.permute.xlu0 %755 }
 0x6bb   :  { %v758_v44 = vadd.f32 %v756_v50, %v752_v29 }
 0x6bd   :  { %5112 = vtanh.f32 %v758_v44 }
 0x6c7   :  { %v5113_v36 = vpop.eup %5112 }
 0x6c8   :  { %v5642_v45 = vmul.f32 %v5113_v36, %v5111_v25 }
 0x6ca   :  { %762 = vrot.lane.b32.xlu1 %v5642_v45, %s5203_s1 }
 0x73c   :  { %v763_v48 = vpop.permute.xlu1 %762 }
 0x73d   :  { %766 = vst.msk [vmem:[#allocation3 + $0x10] sm:$0xff] %vm55_vm0, %v763_v48  ;;  %4808 = vmatmul.mubr.msk.f32.vlgmr.msra.gmra.mrb[18].mxu1 %vm414_vm11, %v763_v48 }
 0x73e   :  { %5006 = vmatpush1.bf16.msra.mxu1 %v5319_v34  ;;  %1078 = vmatprep.mubr.f32.mxu1 %v7958_v35 }
 0x73f   :  { %5008 = vmatprep.subr.bf16.mxu1 %v5330_v37 }
 0x742   :  { %5010 = vmatpush1.bf16.msra.mxu1 %v5338_v40 }
 0x743   :  { %5012 = vmatprep.subr.bf16.mxu1 %v5348_v43 }
 0x746   :  { %5014 = vmatpush1.bf16.msra.mxu1 %v5356_v46 }
 0x747   :  { %5016 = vmatprep.subr.bf16.mxu1 %v5366_v49 }
 0x74a   :  { %5018 = vmatpush1.bf16.msra.mxu1 %v5374_v52 }
 0x74b   :  { %5036 = vmatprep.subr.bf16.mxu1 %v5311_v31 }
 0x810   :  { %v848_v1 = vpop.f32.mrb[18].mxu1 }
 0x811   :  { %v853_v28 = vadd.f32 %v848_v1, %v7961_v38  ;;  %v850_v12 = vpop.f32.mrb[19].mxu1 }
 0x812   :  { %v854_v17 = vadd.f32 %v850_v12, %v7962_v7 }
 0x813   :  { %v855_v47 = vadd.f32 %v853_v28, %v5567_v13 }
 0x814   :  { %v856_v31 = vadd.f32 %v854_v17, %v5592_v6 }
 0x815   :  { %v4809_v54 = vmul.f32 -1.442695, %v855_v47 }
 0x816   :  { %v4810_v48 = vmul.f32 -1.442695, %v856_v31 }
 0x817   :  { %5114 = vpow2.f32 %v4809_v54 }
 0x818   :  { %5116 = vtanh.f32 %v856_v31  ;;  %v7963_v31 = vsel %vm5487_vm9, %v5495_v23, %v5483_v19 }
 0x821   :  { %v5115_v56 = vpop.eup %5114 }
 0x822   :  { %v863_v29 = vadd.f32 1.0, %v5115_v56  ;;  %v5117_v50 = vpop.eup %5116 }
 0x824   :  { %5118 = vrcp.f32 %v863_v29 }
 0x825   :  { %5120 = vpow2.f32 %v4810_v48 }
 0x82e   :  { %v5119_v25 = vpop.eup %5118 }
 0x82f   :  { %v871_v36 = vmul.f32 %v5119_v25, %v5117_v50  ;;  %v5121_v1 = vpop.eup %5120  ;;  %v870_v12 = vmul.f32 %v5119_v25, %v758_v44  ;;  %v7964_v25 = vsel %vm5491_vm10, %v5497_v24, %v5485_v20 }
 0x830   :  { %v864_v38 = vadd.f32 1.0, %v5121_v1 }
 0x831   :  { %873 = vrot.lane.b32.xlu0 %v871_v36, %s5203_s1 }
 0x832   :  { %5122 = vrcp.f32 %v864_v38 }
 0x83c   :  { %v5123_v47 = vpop.eup %5122 }
 0x8a3   :  { %v874_v7 = vpop.permute.xlu0 %873 }
 0x8a4   :  { %v876_v28 = vadd.f32 %v874_v7, %v870_v12 }
 0x8a6   :  { %5124 = vtanh.f32 %v876_v28 }
 0x8b0   :  { %v5125_v17 = vpop.eup %5124 }
 0x8b1   :  { %v5670_v54 = vmul.f32 %v5125_v17, %v5123_v47 }
 0x8b3   :  { %880 = vrot.lane.b32.xlu1 %v5670_v54, %s5203_s1 }
 0x925   :  { %v881_v56 = vpop.permute.xlu1 %880 }
 0x926   :  { %884 = vst.msk [vmem:[#allocation3 + $0x18] sm:$0xff] %vm55_vm0, %v881_v56  ;;  %4811 = vmatmul.mubr.msk.f32.vlgmr.msra.gmra.mrb[12].mxu0 %vm414_vm11, %v881_v56 }
 0x927   :  { %5022 = vmatpush1.bf16.msra.mxu0 %v5319_v34  ;;  %1194 = vmatprep.mubr.f32.mxu0 %v7958_v35 }
 0x928   :  { %5024 = vmatprep.subr.bf16.mxu0 %v5330_v37 }
 0x92b   :  { %5026 = vmatpush1.bf16.msra.mxu0 %v5338_v40 }
 0x92c   :  { %5028 = vmatprep.subr.bf16.mxu0 %v5348_v43 }
 0x92f   :  { %5030 = vmatpush1.bf16.msra.mxu0 %v5356_v46 }
 0x930   :  { %5032 = vmatprep.subr.bf16.mxu0 %v5366_v49 }
 0x933   :  { %5034 = vmatpush1.bf16.msra.mxu0 %v5374_v52 }
 0x9f9   :  { %v964_v44 = vpop.f32.mrb[12].mxu0 }
 0x9fa   :  { %v969_v29 = vadd.f32 %v964_v44, %v7963_v31  ;;  %v966_v50 = vpop.f32.mrb[13].mxu0 }
 0x9fb   :  { %v970_v36 = vadd.f32 %v966_v50, %v7964_v25 }
 0x9fc   :  { %v971_v48 = vadd.f32 %v969_v29, %v5567_v13 }
 0x9fd   :  { %v972_v38 = vadd.f32 %v970_v36, %v5592_v6 }
 0x9fe   :  { %v4812_v1 = vmul.f32 -1.442695, %v971_v48 }
 0x9ff   :  { %v4813_v17 = vmul.f32 -1.442695, %v972_v38 }
 0xa00   :  { %5126 = vpow2.f32 %v4812_v1 }
 0xa01   :  { %5128 = vtanh.f32 %v972_v38 }
 0xa0a   :  { %v5127_v12 = vpop.eup %5126 }
 0xa0b   :  { %v979_v7 = vadd.f32 1.0, %v5127_v12  ;;  %v5129_v47 = vpop.eup %5128 }
 0xa0d   :  { %5130 = vrcp.f32 %v979_v7 }
 0xa0e   :  { %5132 = vpow2.f32 %v4813_v17 }
 0xa17   :  { %v5131_v19 = vpop.eup %5130 }
 0xa18   :  { %v987_v23 = vmul.f32 %v5131_v19, %v5129_v47  ;;  %v5133_v56 = vpop.eup %5132  ;;  %v986_v24 = vmul.f32 %v5131_v19, %v876_v28 }
 0xa19   :  { %v980_v20 = vadd.f32 1.0, %v5133_v56 }
 0xa1a   :  { %989 = vrot.lane.b32.xlu0 %v987_v23, %s5203_s1 }
 0xa1b   :  { %5134 = vrcp.f32 %v980_v20 }
 0xa25   :  { %v5135_v29 = vpop.eup %5134 }
 0xa8c   :  { %v990_v44 = vpop.permute.xlu0 %989 }
 0xa8d   :  { %v992_v31 = vadd.f32 %v990_v44, %v986_v24  ;;  %v7967_v44 = vsel %vm5487_vm9, %v5538_v39, %v5473_v10 }
 0xa8f   :  { %5136 = vtanh.f32 %v992_v31 }
 0xa99   :  { %v5137_v50 = vpop.eup %5136 }
 0xa9a   :  { %v5697_v25 = vmul.f32 %v5137_v50, %v5135_v29  ;;  %v7968_v50 = vsel %vm5491_vm10, %v5543_v42, %v5475_v11 }
 0xa9c   :  { %996 = vrot.lane.b32.xlu1 %v5697_v25, %s5203_s1 }
 0xb0e   :  { %v997_v36 = vpop.permute.xlu1 %996 }
 0xb0f   :  { %1000 = vst.msk [vmem:[#allocation3 + $0x20] sm:$0xff] %vm55_vm0, %v997_v36  ;;  %4814 = vmatmul.mubr.msk.f32.vlgmr.msra.gmra.mrb[20].mxu1 %vm414_vm11, %v997_v36 }
 0xb10   :  { %5038 = vmatpush1.bf16.msra.mxu1 %v5319_v34  ;;  %1310 = vmatprep.mubr.f32.mxu1 %v7958_v35  ;;  %v7965_v34 = vsel %vm5487_vm9, %v5515_v30, %v5478_v14 }
 0xb11   :  { %5040 = vmatprep.subr.bf16.mxu1 %v5330_v37  ;;  %v7966_v37 = vsel %vm5491_vm10, %v5520_v33, %v5480_v16 }
 0xb14   :  { %5042 = vmatpush1.bf16.msra.mxu1 %v5338_v40 }
 0xb15   :  { %5044 = vmatprep.subr.bf16.mxu1 %v5348_v43 }
 0xb18   :  { %5046 = vmatpush1.bf16.msra.mxu1 %v5356_v46 }
 0xb19   :  { %5048 = vmatprep.subr.bf16.mxu1 %v5366_v49 }
 0xb1c   :  { %5050 = vmatpush1.bf16.msra.mxu1 %v5374_v52 }
 0xbe2   :  { %v1080_v28 = vpop.f32.mrb[20].mxu1 }
 0xbe3   :  { %v1085_v48 = vadd.f32 %v1080_v28, %v7965_v34  ;;  %v1082_v35 = vpop.f32.mrb[21].mxu1 }
 0xbe4   :  { %v1086_v40 = vadd.f32 %v1082_v35, %v7966_v37 }
 0xbe5   :  { %v1087_v43 = vadd.f32 %v1085_v48, %v5567_v13 }
 0xbe6   :  { %v1088_v49 = vadd.f32 %v1086_v40, %v5592_v6 }
 0xbe7   :  { %v4815_v46 = vmul.f32 -1.442695, %v1087_v43 }
 0xbe8   :  { %v4816_v12 = vmul.f32 -1.442695, %v1088_v49 }
 0xbe9   :  { %5138 = vpow2.f32 %v4815_v46 }
 0xbea   :  { %5140 = vtanh.f32 %v1088_v49 }
 0xbf3   :  { %v5139_v52 = vpop.eup %5138 }
 0xbf4   :  { %v1095_v1 = vadd.f32 1.0, %v5139_v52  ;;  %v5141_v38 = vpop.eup %5140 }
 0xbf6   :  { %5142 = vrcp.f32 %v1095_v1 }
 0xbf7   :  { %5144 = vpow2.f32 %v4816_v12 }
 0xc00   :  { %v5143_v14 = vpop.eup %5142 }
 0xc01   :  { %v1103_v30 = vmul.f32 %v5143_v14, %v5141_v38  ;;  %v5145_v7 = vpop.eup %5144  ;;  %v1102_v33 = vmul.f32 %v5143_v14, %v992_v31 }
 0xc02   :  { %v1096_v16 = vadd.f32 1.0, %v5145_v7  ;;  %v7969_v7 = vsel %vm5487_vm9, %v5564_v51, %v5469_v8 }
 0xc03   :  { %1105 = vrot.lane.b32.xlu0 %v1103_v30, %s5203_s1 }
 0xc04   :  { %5146 = vrcp.f32 %v1096_v16 }
 0xc0e   :  { %v5147_v23 = vpop.eup %5146 }
 0xc75   :  { %v1106_v47 = vpop.permute.xlu0 %1105 }
 0xc76   :  { %v1108_v19 = vadd.f32 %v1106_v47, %v1102_v33  ;;  %v7970_v47 = vsel %vm5491_vm10, %v5573_v18, %v5471_v9 }
 0xc78   :  { %5148 = vtanh.f32 %v1108_v19 }
 0xc82   :  { %v5149_v17 = vpop.eup %5148 }
 0xc83   :  { %v5724_v56 = vmul.f32 %v5149_v17, %v5147_v23 }
 0xc85   :  { %1112 = vrot.lane.b32.xlu1 %v5724_v56, %s5203_s1 }
 0xcf7   :  { %v1113_v20 = vpop.permute.xlu1 %1112 }
 0xcf8   :  { %1116 = vst.msk [vmem:[#allocation3 + $0x28] sm:$0xff] %vm55_vm0, %v1113_v20  ;;  %4817 = vmatmul.mubr.msk.f32.vlgmr.msra.gmra.mrb[14].mxu0 %vm414_vm11, %v1113_v20 }
 0xdcb   :  { %v1196_v24 = vpop.f32.mrb[14].mxu0 }
 0xdcc   :  { %v1201_v31 = vadd.f32 %v1196_v24, %v7967_v44  ;;  %v1198_v29 = vpop.f32.mrb[15].mxu0 }
 0xdcd   :  { %v1202_v36 = vadd.f32 %v1198_v29, %v7968_v50 }
 0xdce   :  { %v1203_v28 = vadd.f32 %v1201_v31, %v5567_v13 }
 0xdcf   :  { %v1204_v48 = vadd.f32 %v1202_v36, %v5592_v6 }
 0xdd0   :  { %v4818_v34 = vmul.f32 -1.442695, %v1203_v28 }
 0xdd1   :  { %v4819_v43 = vmul.f32 -1.442695, %v1204_v48 }
 0xdd2   :  { %5150 = vpow2.f32 %v4818_v34 }
 0xdd3   :  { %5152 = vtanh.f32 %v1204_v48  ;;  %v1409_v48 = vld [vmem:[%s7870_s2] sm:$0xff] }
 0xddc   :  { %v5151_v35 = vpop.eup %5150 }
 0xddd   :  { %v1211_v37 = vadd.f32 1.0, %v5151_v35  ;;  %v5153_v40 = vpop.eup %5152  ;;  %v1410_v35 = vld [vmem:[%s7870_s2 + $0x8] sm:$0xff] }
 0xddf   :  { %5154 = vrcp.f32 %v1211_v37  ;;  %v1411_v37 = vld [vmem:[%s7870_s2 + $0x10] sm:$0xff] }
 0xde0   :  { %5156 = vpow2.f32 %v4819_v43  ;;  %v1414_v43 = vld [vmem:[%s7870_s2 + $0x28] sm:$0xff] }
 0xde9   :  { %v5155_v10 = vpop.eup %5154 }
 0xdea   :  { %v1219_v39 = vmul.f32 %v5155_v10, %v5153_v40  ;;  %v5157_v46 = vpop.eup %5156  ;;  %v1218_v42 = vmul.f32 %v5155_v10, %v1108_v19  ;;  %v5051_v40 = vpack.c.bf16 %v1410_v35, %v1409_v48  ;;  %v1412_v10 = vld [vmem:[%s7870_s2 + $0x18] sm:$0xff]  ;;  %v5838_v35 = vsub.s32 5, %v5518_v32 }
 0xdeb   :  { %v1212_v11 = vadd.f32 1.0, %v5157_v46 }
 0xdec   :  { %1221 = vrot.lane.b32.xlu0 %v1219_v39, %s5203_s1  ;;  %v5055_v39 = vpack.c.bf16 %v1412_v10, %v1411_v37  ;;  %5052 = vmatprep.subr.bf16.mxu0 %v5051_v40 }
 0xded   :  { %5158 = vrcp.f32 %v1212_v11  ;;  %5054 = vmatpush3.bf16.msra.mxu0 %v5051_v40  ;;  %v1415_v11 = vld [vmem:[%s7870_s2 + $0x30] sm:$0xff]  ;;  %v5842_v40 = vsub.s32 6, %v5518_v32 }
 0xdee   :  { %5056 = vmatprep.subr.bf16.mxu0 %v5055_v39 }
 0xdf1   :  { %5058 = vmatpush3.bf16.msra.mxu0 %v5055_v39  ;;  %v5846_v39 = vsub.s32 7, %v5518_v32 }
 0xdf7   :  { %v5159_v1 = vpop.eup %5158 }
 0xe5e   :  { %v1222_v49 = vpop.permute.xlu0 %1221 }
 0xe5f   :  { %v1224_v52 = vadd.f32 %v1222_v49, %v1218_v42  ;;  %v1416_v42 = vld [vmem:[%s7870_s2 + $0x38] sm:$0xff] }
 0xe60   :  { %v5063_v49 = vpack.c.bf16 %v1416_v42, %v1415_v11 }
 0xe61   :  { %5160 = vtanh.f32 %v1224_v52 }
 0xe6b   :  { %v5161_v38 = vpop.eup %5160 }
 0xe6c   :  { %v1226_v14 = vmul.f32 %v5161_v38, %v5159_v1 }
 0xe6e   :  { %1228 = vrot.lane.b32.xlu1 %v1226_v14, %s5203_s1 }
 0xee0   :  { %v1229_v30 = vpop.permute.xlu1 %1228 }
 0xee1   :  { %1232 = vst.msk [vmem:[#allocation3 + $0x30] sm:$0xff] %vm55_vm0, %v1229_v30  ;;  %4820 = vmatmul.mubr.msk.f32.vlgmr.msra.gmra.mrb[22].mxu1 %vm414_vm11, %v1229_v30 }
 0xfb4   :  { %v1312_v12 = vpop.f32.mrb[22].mxu1 }
 0xfb5   :  { %v1317_v16 = vadd.f32 %v1312_v12, %v7969_v7  ;;  %v1314_v33 = vpop.f32.mrb[23].mxu1  ;;  %v1353_v7 = vld [vmem:[#allocation3] sm:$0xff] }
 0xfb6   :  { %v1318_v19 = vadd.f32 %v1314_v33, %v7970_v47 }
 0xfb7   :  { %v1319_v23 = vadd.f32 %v1317_v16, %v5567_v13  ;;  %v1354_v16 = vld [vmem:[#allocation3 + $0x8] sm:$0xff] }
 0xfb8   :  { %v1320_v20 = vadd.f32 %v1318_v19, %v5592_v6 }
 0xfb9   :  { %v4821_v17 = vmul.f32 -1.442695, %v1319_v23 }
 0xfba   :  { %v4822_v9 = vmul.f32 -1.442695, %v1320_v20 }
 0xfbb   :  { %5162 = vpow2.f32 %v4821_v17  ;;  %v1355_v17 = vld [vmem:[#allocation3 + $0x10] sm:$0xff] }
 0xfbc   :  { %5164 = vtanh.f32 %v1320_v20  ;;  %v1356_v20 = vld [vmem:[#allocation3 + $0x18] sm:$0xff] }
 0xfc5   :  { %v5163_v24 = vpop.eup %5162 }
 0xfc6   :  { %v1327_v44 = vadd.f32 1.0, %v5163_v24  ;;  %v5165_v21 = vpop.eup %5164 }
 0xfc8   :  { %5166 = vrcp.f32 %v1327_v44 }
 0xfc9   :  { %5168 = vpow2.f32 %v4822_v9 }
 0xfd2   :  { %v5167_v8 = vpop.eup %5166 }
 0xfd3   :  { %v1335_v51 = vmul.f32 %v5167_v8, %v5165_v21  ;;  %v5169_v22 = vpop.eup %5168  ;;  %v1334_v18 = vmul.f32 %v5167_v8, %v1224_v52 }
 0xfd4   :  { %v1328_v13 = vadd.f32 1.0, %v5169_v22 }
 0xfd5   :  { %1337 = vrot.lane.b32.xlu0 %v1335_v51, %s5203_s1 }
 0xfd6   :  { %5170 = vrcp.f32 %v1328_v13 }
 0xfd9   :  { %1233 = vrot.lane.b32.xlu0 %v1226_v14, %s5204_s0 }
 0xfe0   :  { %v5171_v50 = vpop.eup %5170 }
0x1047   :  { %v1338_v31 = vpop.permute.xlu0 %1337 }
0x1048   :  { %v1340_v29 = vadd.f32 %v1338_v31, %v1334_v18 }
0x104a   :  { %5172 = vtanh.f32 %v1340_v29  ;;  %v5826_v29 = vsub.s32 2, %v5518_v32 }
0x104b   :  { %v1234_v6 = vpop.permute.xlu0 %1233 }
0x104c   :  { %1237 = vst.msk [vmem:[#allocation4 + $0x8] sm:$0xff] %vm55_vm0, %v1234_v6 }
0x1053   :  { %v1362_v36 = vld [vmem:[#allocation4 + $0x8] sm:$0xff] }
0x1054   :  { %v5173_v28 = vpop.eup %5172  ;;  %1379 = vrot.lane.b32.xlu0 %v1362_v36, %s5204_s0 }
0x1055   :  { %v5762_v34 = vmul.f32 %v5173_v28, %v5171_v50  ;;  %v5830_v50 = vsub.s32 3, %v5518_v32  ;;  %v5834_v28 = vsub.s32 4, %v5518_v32 }
0x1057   :  { %1349 = vrot.lane.b32.xlu1 %v5762_v34, %s5204_s0 }
0x1058   :  { %1001 = vrot.lane.b32.xlu0 %v5697_v25, %s5204_s0  ;;  %v1413_v25 = vld [vmem:[%s7870_s2 + $0x20] sm:$0xff] }
0x1059   :  { %v5059_v46 = vpack.c.bf16 %v1414_v43, %v1413_v25 }
0x105b   :  { %5060 = vmatprep.subr.bf16.mxu0 %v5059_v46 }
0x105c   :  { %5062 = vmatpush3.bf16.msra.mxu0 %v5059_v46  ;;  %v1357_v46 = vld [vmem:[#allocation3 + $0x20] sm:$0xff] }
0x105d   :  { %5064 = vmatprep.subr.bf16.mxu0 %v5063_v49 }
0x1060   :  { %5066 = vmatpush3.bf16.msra.mxu0 %v5063_v49  ;;  %v1358_v49 = vld [vmem:[#allocation3 + $0x28] sm:$0xff] }
0x10c6   :  { %v1380_v52 = vpop.permute.xlu0 %1379 }
0x10c7   :  { %v1402_v19 = vsel %vm55_vm0, %v1354_v16, %v1380_v52 }
0x10c9   :  { %v1350_v1 = vpop.permute.xlu1 %1349 }
0x10ca   :  { %1352 = vst.msk [vmem:[#allocation4] sm:$0xff] %vm55_vm0, %v1350_v1  ;;  %v1002_v38 = vpop.permute.xlu0 %1001 }
0x10cb   :  { %1005 = vst.msk [vmem:[#allocation4 + $0x18] sm:$0xff] %vm55_vm0, %v1002_v38 }
0x10d1   :  { %v1361_v14 = vld [vmem:[#allocation4] sm:$0xff] }
0x10d2   :  { %1377 = vrot.lane.b32.xlu1 %v1361_v14, %s5204_s0  ;;  %v1364_v30 = vld [vmem:[#allocation4 + $0x18] sm:$0xff]  ;;  %v7971_v14 = vmov 0  }
0x10d3   :  { %1383 = vrot.lane.b32.xlu0 %v1364_v30, %s5204_s0 }
0x10d6   :  { %1117 = vrot.lane.b32.xlu1 %v5724_v56, %s5204_s0 }
0x10d7   :  { %767 = vrot.lane.b32.xlu0 %v5642_v45, %s5204_s0 }
0x10f6   :  { %356 = vadd.xlane.f32.xlu0 %v5395_v55 }
0x1144   :  { %v1378_v12 = vpop.permute.xlu1 %1377 }
0x1145   :  { %v1401_v33 = vsel %vm55_vm0, %v1353_v7, %v1378_v12  ;;  %v1384_v47 = vpop.permute.xlu0 %1383 }
0x1146   :  { %4899 = vmatprep.mubr.msk.f32.mxu0 %vm414_vm11, %v1401_v33  ;;  %v1404_v44 = vsel %vm55_vm0, %v1356_v20, %v1384_v47 }
0x1147   :  { %4900 = vmatmul.mubr.msk.f32.vlgmr.msra.gmra.mrb[16].mxu0 %vm414_vm11, %v1402_v19 }
0x1148   :  { %v1118_v23 = vpop.permute.xlu1 %1117 }
0x1149   :  { %1121 = vst.msk [vmem:[#allocation4 + $0x10] sm:$0xff] %vm55_vm0, %v1118_v23  ;;  %v768_v56 = vpop.permute.xlu0 %767 }
0x114a   :  { %771 = vst.msk [vmem:[#allocation4 + $0x28] sm:$0xff] %vm55_vm0, %v768_v56 }
0x1150   :  { %v1363_v45 = vld [vmem:[#allocation4 + $0x10] sm:$0xff] }
0x1151   :  { %1381 = vrot.lane.b32.xlu1 %v1363_v45, %s5204_s0  ;;  %v1366_v51 = vld [vmem:[#allocation4 + $0x28] sm:$0xff]  ;;  %v5205_v45 = vmov 1966171168  }
0x1155   :  { %885 = vrot.lane.b32.xlu1 %v5670_v54, %s5204_s0  ;;  %v5820_v54 = vld [vmem:[%s7870_s2 + $0x58] ss:$0 sm:$0xff] }
0x1183   :  { %v357_v1 = vpop.xlane.xlu0 %356 }
0x1184   :  { %v5855_v38 = vsub.f32 %v357_v1, %v5389_v53 }
0x1186   :  { %vm1882_vm12 = vcmp.gt.f32.partialorder %v5855_v38, 0.0 }
0x11c3   :  { %v1382_v55 = vpop.permute.xlu1 %1381 }
0x11c4   :  { %v1403_v24 = vsel %vm55_vm0, %v1355_v17, %v1382_v55  ;;  %v1626_v55 = vunpack.c.l.s4 %v5205_v45 }
0x11c5   :  { %4902 = vmatprep.mubr.msk.f32.mxu0 %vm414_vm11, %v1403_v24  ;;  %v4832_v24 = vld [vmem:[%s7870_s2 + $0x48] ss:$0 sm:$0xff] }
0x11c6   :  { %4903 = vmatmul.mubr.msk.f32.gmra.mrb[18].mxu0 %vm414_vm11, %v1404_v44  ;;  %v1627_v17 = vunpack.c.0.s8 %v1626_v55 }
0x11c7   :  { %v886_v21 = vpop.permute.xlu1 %885 }
0x11c8   :  { %889 = vst.msk [vmem:[#allocation4 + $0x20] sm:$0xff] %vm55_vm0, %v886_v21  ;;  %v5872_v44 = vsub.s32 %v1627_v17, %v5518_v32 }
0x11cf   :  { %v1365_v8 = vld [vmem:[#allocation4 + $0x20] sm:$0xff] }
0x11d0   :  { %1385 = vrot.lane.b32.xlu1 %v1365_v8, %s5204_s0 }
0x11d4   :  { %1387 = vrot.lane.b32.xlu1 %v1366_v51, %s5204_s0 }
0x121a   :  { %v4901_v9 = vpop.f32.mrb[16].mxu0 }
0x121b   :  { %v1518_v22 = vadd.f32 %v4901_v9, %v5820_v54  ;;  %v1512_v13 = vpop.f32.mrb[17].mxu0  ;;  %v5881_v9 = vld [vmem:[%s7870_s2 + $0x40] sm:$0xff] }
0x121c   :  { %v1513_v20 = vadd.f32 %v5820_v54, %v1512_v13 }
0x121d   :  { %v1569_v18 = vrot.slane %v1518_v22, %v5589_v27  ;;  %v1562_v31 = vrot.slane %v1518_v22, %v5541_v41  ;;  %v1576_v6 = vrot.slane %v1518_v22, %v5826_v29  ;;  %v1583_v36 = vrot.slane %v1518_v22, %v5830_v50 }
0x121e   :  { %v1590_v48 = vrot.slane %v1518_v22, %v5834_v28  ;;  %v1597_v37 = vrot.slane %v1518_v22, %v5838_v35  ;;  %v1604_v10 = vrot.slane %v1518_v22, %v5842_v40  ;;  %v1611_v25 = vrot.slane %v1518_v22, %v5846_v39 }
0x121f   :  { %1571 = vbcast.lane.b32.xlu0 %v1569_v18, 256  ;;  %1564 = vbcast.lane.b32.xlu1 %v1562_v31, 256  ;;  %v5874_v21 = vadd.f32 %v4832_v24, %v1513_v20 }
0x1221   :  { %v1631_v51 = vrot.slane %v5874_v21, %v5872_v44 }
0x1223   :  { %1578 = vbcast.lane.b32.xlu1 %v1576_v6, 256  ;;  %v1647_v31 = vrot.slane %v1631_v51, %v5872_v44  ;;  %v1639_v17 = vcombine.high %v1631_v51, %v1631_v51 }
0x1225   :  { %v1661_v20 = vrot.slane %v1639_v17, %v5872_v44 }
0x1227   :  { %1585 = vbcast.lane.b32.xlu1 %v1583_v36, 256 }
0x122b   :  { %1592 = vbcast.lane.b32.xlu1 %v1590_v48, 256 }
0x122f   :  { %1599 = vbcast.lane.b32.xlu1 %v1597_v37, 256  ;;  %v1676_v37 = vrot.slane %v1647_v31, %v5541_v41 }
0x1233   :  { %1606 = vbcast.lane.b32.xlu1 %v1604_v10, 256 }
0x1237   :  { %1613 = vbcast.lane.b32.xlu1 %v1611_v25, 256 }
0x123e   :  { %359 = vadd.xlane.f32.xlu0 %v5418_v60  ;;  %v1883_v60 = vsel %vm1882_vm12, 1, %v7971_v14 }
0x1242   :  { %v1386_v43 = vpop.permute.xlu1 %1385 }
0x1243   :  { %v1405_v11 = vsel %vm55_vm0, %v1357_v46, %v1386_v43 }
0x1244   :  { %4905 = vmatprep.mubr.msk.f32.mxu0 %vm414_vm11, %v1405_v11 }
0x1246   :  { %v1388_v42 = vpop.permute.xlu1 %1387 }
0x1247   :  { %v1406_v52 = vsel %vm55_vm0, %v1358_v49, %v1388_v42 }
0x1248   :  { %4906 = vmatmul.mubr.msk.f32.gmra.mrb[20].mxu0 %vm414_vm11, %v1406_v52 }
0x1254   :  { %1885 = vperm.xlu0 %5076, %v1883_v60  }
0x1291   :  { %v1572_v8 = vpop.permute.xlu0 %1571  ;;  %v1565_v22 = vpop.permute.xlu1 %1564 }
0x1292   :  { %v1615_v6 = vadd.f32 %v1565_v22, %v5881_v9  ;;  %v1616_v24 = vadd.f32 %v1572_v8, %v5881_v9  ;;  %v1624_v22 = vcombine.high %v5874_v21, %v5874_v21 }
0x1294   :  { %v5896_v25 = vadd.f32 %v1676_v37, %v1615_v6  ;;  %v1669_v6 = vcombine.high %v1647_v31, %v1647_v31 }
0x1295   :  { %v1579_v52 = vpop.permute.xlu1 %1578 }
0x1296   :  { %7972 = vst [vmem:[#allocation11_spill] sm:$0xff] %v5896_v25 }
0x1299   :  { %v4904_v30 = vpop.f32.mrb[18].mxu0  ;;  %v1586_v1 = vpop.permute.xlu1 %1585 }
0x129a   :  { %v1522_v12 = vpop.f32.mrb[19].mxu0  ;;  %v5889_v36 = vadd.f32 %v4904_v30, %v5820_v54  ;;  %v1618_v51 = vadd.f32 %v1586_v1, %v5881_v9 }
0x129b   :  { %v1523_v7 = vadd.f32 %v5820_v54, %v1522_v12 }
0x129c   :  { %v2324_v10 = vrot.slane %v5889_v36, %v5541_v41  ;;  %v2338_v43 = vrot.slane %v5889_v36, %v5826_v29  ;;  %v2331_v11 = vrot.slane %v5889_v36, %v5589_v27  ;;  %v2345_v55 = vrot.slane %v5889_v36, %v5830_v50 }
0x129d   :  { %v1954_v16 = vrot.slane %v1523_v7, %v5589_v27  ;;  %v1947_v33 = vrot.slane %v1523_v7, %v5541_v41  ;;  %v1961_v47 = vrot.slane %v1523_v7, %v5826_v29  ;;  %v1968_v53 = vrot.slane %v1523_v7, %v5830_v50  ;;  %v1593_v60 = vpop.permute.xlu1 %1592 }
0x129e   :  { %v1975_v19 = vrot.slane %v1523_v7, %v5834_v28  ;;  %v1982_v23 = vrot.slane %v1523_v7, %v5838_v35  ;;  %v1989_v56 = vrot.slane %v1523_v7, %v5842_v40  ;;  %v1996_v46 = vrot.slane %v1523_v7, %v5846_v39 }
0x129f   :  { %1956 = vbcast.lane.b32.xlu0 %v1954_v16, 256  ;;  %1949 = vbcast.lane.b32.xlu1 %v1947_v33, 256 }
0x12a3   :  { %1963 = vbcast.lane.b32.xlu1 %v1961_v47, 256 }
0x12a7   :  { %1970 = vbcast.lane.b32.xlu1 %v1968_v53, 256 }
0x12ab   :  { %1977 = vbcast.lane.b32.xlu1 %v1975_v19, 256 }
0x12af   :  { %1984 = vbcast.lane.b32.xlu1 %v1982_v23, 256 }
0x12b3   :  { %1991 = vbcast.lane.b32.xlu1 %v1989_v56, 256 }
0x12cb   :  { %v360_v13 = vpop.xlane.xlu0 %359 }
0x12cc   :  { %v5884_v18 = vsub.f32 %v360_v13, %v5408_v58  ;;  %v1722_v58 = vsel %vm1721_vm14, %v5896_v25, -inf  ;;  %v1680_v13 = vrot.slane %v1661_v20, %v5541_v41 }
0x12ce   :  { %vm2266_vm13 = vcmp.gt.f32.partialorder %v5884_v18, 0.0  ;;  %v5944_v37 = vadd.f32 %v1680_v13, %v1616_v24 }
0x12cf   :  { %v2267_v48 = vsel %vm2266_vm13, 1, %v7971_v14 }
0x12d0   :  { %2269 = vperm.xlu0 %5076, %v2267_v48   ;;  %v1617_v48 = vadd.f32 %v1579_v52, %v5881_v9  ;;  %7974 = vst [vmem:[#allocation13_spill] sm:$0xff] %v5944_v37  ;;  %v1725_v8 = vsel %vm1721_vm14, %v5944_v37, -inf }
0x12d4   :  { %2326 = vbcast.lane.b32.xlu0 %v2324_v10, 256  ;;  %v1684_v10 = vrot.slane %v1669_v6, %v5541_v41 }
0x12d7   :  { %1723 = vmax.xlane.f32.xlu1 %v1722_v58  ;;  %v1671_v58 = vcombine.high %v1661_v20, %v1661_v20 }
0x12d8   :  { %2340 = vbcast.lane.b32.xlu0 %v2338_v43, 256  ;;  %v1638_v43 = vrot.slane %v1624_v22, %v5872_v44 }
0x12da   :  { %v1654_v31 = vrot.slane %v1638_v43, %v5872_v44  ;;  %v1640_v52 = vcombine.high %v1638_v43, %v1638_v43 }
0x12dc   :  { %v1692_v1 = vrot.slane %v1654_v31, %v5541_v41  ;;  %v1670_v24 = vcombine.high %v1654_v31, %v1654_v31 }
0x12e8   :  { %1998 = vbcast.lane.b32.xlu1 %v1996_v46, 256  ;;  %v5951_v46 = vadd.f32 %v1684_v10, %v1617_v48  ;;  %v1700_v48 = vrot.slane %v1670_v24, %v5541_v41  ;;  %v1359_v24 = vld [vmem:[#allocation3 + $0x30] sm:$0xff] }
0x12ea   :  { %7975 = vst [vmem:[#allocation14_spill] sm:$0xff] %v5951_v46 }
0x12ec   :  { %649 = vrot.lane.b32.xlu1 %v5614_v26, %s5204_s0  ;;  %v1600_v26 = vpop.permute.xlu1 %1599 }
0x12f0   :  { %531 = vrot.lane.b32.xlu1 %v5596_v2, %s5204_s0  ;;  %v1607_v30 = vpop.permute.xlu1 %1606 }
0x12f1   :  { %v1621_v22 = vadd.f32 %v1607_v30, %v5881_v9 }
0x12f3   :  { %v5977_v43 = vadd.f32 %v1700_v48, %v1621_v22 }
0x12f4   :  { %1344 = vrot.lane.b32.xlu1 %v5762_v34, %s5203_s1  ;;  %v1614_v12 = vpop.permute.xlu1 %1613 }
0x12f5   :  { %v1622_v10 = vadd.f32 %v1614_v12, %v5881_v9  ;;  %7979 = vst [vmem:[#allocation18_spill] sm:$0xff] %v5977_v43  ;;  %v1740_v30 = vsel %vm1721_vm14, %v5977_v43, -inf  ;;  %v2352_v12 = vrot.slane %v5889_v36, %v5834_v28 }
0x12f8   :  { %2333 = vbcast.lane.b32.xlu1 %v2331_v11, 256  ;;  %v1688_v11 = vrot.slane %v1671_v58, %v5541_v41 }
0x1311   :  { %v5916_v2 = vpop.permute.xlu1 %1949 }
0x1315   :  { %v5918_v7 = vpop.permute.xlu1 %1963 }
0x1319   :  { %v5920_v34 = vpop.permute.xlu1 %1970 }
0x131b   :  { %v5911_v42 = vpop.f32.mrb[20].mxu0 }
0x131c   :  { %v5913_v49 = vpop.f32.mrb[21].mxu0  ;;  %362 = vadd.xlane.f32.xlu1 %v5412_v59 }
0x131d   :  { %v5922_v16 = vpop.permute.xlu1 %1977 }
0x1321   :  { %v5924_v33 = vpop.permute.xlu1 %1984 }
0x1325   :  { %v5926_v47 = vpop.permute.xlu1 %1991 }
0x1364   :  { %v5928_v53 = vpop.xlane.xlu1 %1723 }
0x1365   :  { %7973 = vst [vmem:[#allocation12_spill] sm:$0xff] %v5928_v53 }
0x1368   :  { %v5930_v59 = vpop.permute.xlu1 %1998 }
0x136c   :  { %v650_v19 = vpop.permute.xlu1 %649 }
0x136d   :  { %653 = vst.msk [vmem:[#allocation4 + $0x30] sm:$0xff] %vm55_vm0, %v650_v19  ;;  %v1619_v19 = vadd.f32 %v1593_v60, %v5881_v9 }
0x136f   :  { %v5965_v20 = vadd.f32 %v1692_v1, %v1619_v19  ;;  %v1886_v19 = vpop.permute.xlu0 %1885 }
0x1370   :  { %v532_v23 = vpop.permute.xlu1 %531  ;;  %vm1887_vm7 = vcmp.eq.s32.totalorder %v1886_v19, 1 }
0x1371   :  { %535 = vst.msk [vmem:[#allocation4 + $0x38] sm:$0xff] %vm55_vm0, %v532_v23  ;;  %v1728_v23 = vsel %vm1721_vm14, %v5951_v46, -inf  ;;  %7977 = vst [vmem:[#allocation16_spill] sm:$0xff] %v5965_v20  ;;  %v1734_v13 = vsel %vm1721_vm14, %v5965_v20, -inf }
0x1373   :  { %v1957_v1 = vpop.permute.xlu0 %1956 }
0x1374   :  { %v1345_v56 = vpop.permute.xlu1 %1344  ;;  %v1367_v45 = vld [vmem:[#allocation4 + $0x30] sm:$0xff] }
0x1375   :  { %1348 = vst.msk [vmem:[#allocation3 + $0x38] sm:$0xff] %vm55_vm0, %v1345_v56  ;;  %1389 = vrot.lane.b32.xlu0 %v1367_v45, %s5204_s0  ;;  %v5958_v56 = vadd.f32 %v1688_v11, %v1618_v51  ;;  %v1668_v45 = vrot.slane %v1640_v52, %v5872_v44  ;;  %v2359_v52 = vrot.slane %v5889_v36, %v5838_v35 }
0x1377   :  { %7976 = vst [vmem:[#allocation15_spill] sm:$0xff] %v5958_v56  ;;  %v1731_v17 = vsel %vm1721_vm14, %v5958_v56, -inf  ;;  %v1696_v60 = vrot.slane %v1668_v45, %v5541_v41 }
0x1378   :  { %v1368_v31 = vld [vmem:[#allocation4 + $0x38] sm:$0xff] }
0x1379   :  { %2347 = vbcast.lane.b32.xlu0 %v2345_v55, 256  ;;  %v1620_v55 = vadd.f32 %v1600_v26, %v5881_v9  ;;  %v1672_v26 = vcombine.high %v1668_v45, %v1668_v45  ;;  %v2373_v45 = vrot.slane %v5889_v36, %v5846_v39 }
0x137b   :  { %v5971_v6 = vadd.f32 %v1696_v60, %v1620_v55  ;;  %v1704_v51 = vrot.slane %v1672_v26, %v5541_v41  ;;  %v5995_v55 = vpop.permute.xlu0 %2269 }
0x137c   :  { %vm2271_vm8 = vcmp.eq.s32.totalorder %v5995_v55, 1 }
0x137d   :  { %7978 = vst [vmem:[#allocation17_spill] sm:$0xff] %v5971_v6  ;;  %v1737_v58 = vsel %vm1721_vm14, %v5971_v6, -inf }
0x1398   :  { %1726 = vmax.xlane.f32.xlu0 %v1725_v8  ;;  %v5982_v8 = vadd.f32 %v1704_v51, %v1622_v10  ;;  %v6015_v51 = vsub.s32 %v5263_v15, %v5518_v32 }
0x139a   :  { %7980 = vst [vmem:[#allocation19_spill] sm:$0xff] %v5982_v8  ;;  %v1743_v11 = vsel %vm1721_vm14, %v5982_v8, -inf }
0x139c   :  { %1729 = vmax.xlane.f32.xlu0 %v1728_v23  ;;  %v2366_v23 = vrot.slane %v5889_v36, %v5842_v40 }
0x13a0   :  { %1732 = vmax.xlane.f32.xlu0 %v1731_v17  ;;  %v5997_v17 = vpop.permute.xlu0 %2326 }
0x13a4   :  { %1735 = vmax.xlane.f32.xlu0 %v1734_v13  ;;  %v5999_v60 = vpop.permute.xlu0 %2340 }
0x13a8   :  { %1738 = vmax.xlane.f32.xlu0 %v1737_v58 }
0x13ac   :  { %1741 = vmax.xlane.f32.xlu0 %v1740_v30 }
0x13b0   :  { %1744 = vmax.xlane.f32.xlu0 %v1743_v11 }
0x13c6   :  { %1391 = vrot.lane.b32.xlu0 %v1368_v31, %s5204_s0 }
0x13ca   :  { %2354 = vbcast.lane.b32.xlu0 %v2352_v12, 256  ;;  %v1899_v12 = vrot.slane %v5928_v53, %v6015_v51 }
0x13ce   :  { %2361 = vbcast.lane.b32.xlu0 %v2359_v52, 256 }
0x13d2   :  { %2368 = vbcast.lane.b32.xlu0 %v2366_v23, 256 }
0x13d6   :  { %2375 = vbcast.lane.b32.xlu0 %v2373_v45, 256 }
0x13e7   :  { %v1390_v22 = vpop.permute.xlu0 %1389 }
0x13e8   :  { %v1407_v13 = vsel %vm55_vm0, %v1359_v24, %v1390_v22 }
0x13e9   :  { %4908 = vmatprep.mubr.msk.f32.mxu0 %vm414_vm11, %v1407_v13 }
0x13eb   :  { %v6003_v48 = vpop.permute.xlu0 %2347 }
0x1425   :  { %v6005_v26 = vpop.xlane.xlu0 %1726 }
0x1426   :  { %7981 = vst [vmem:[#allocation20_spill] sm:$0xff] %v6005_v26  ;;  %v1903_v11 = vrot.slane %v6005_v26, %v6015_v51 }
0x1428   :  { %v1929_v45 = vsel %vm1928_vm15, %v1903_v11, %v1899_v12 }
0x1429   :  { %v6007_v10 = vpop.xlane.xlu0 %1729 }
0x142a   :  { %7982 = vst [vmem:[#allocation21_spill] sm:$0xff] %v6007_v10  ;;  %v1907_v31 = vrot.slane %v6007_v10, %v6015_v51 }
0x142c   :  { %v1931_v22 = vsel %vm1930_vm1, %v1907_v31, %v1929_v45 }
0x142d   :  { %v6009_v36 = vpop.xlane.xlu0 %1732 }
0x142e   :  { %7983 = vst [vmem:[#allocation22_spill] sm:$0xff] %v6009_v36  ;;  %v1911_v52 = vrot.slane %v6009_v36, %v6015_v51 }
0x1430   :  { %v1933_v6 = vsel %vm1932_vm2, %v1911_v52, %v1931_v22  ;;  %v1360_v52 = vld [vmem:[#allocation3 + $0x38] sm:$0xff] }
0x1431   :  { %v6011_v58 = vpop.xlane.xlu0 %1735 }
0x1432   :  { %7984 = vst [vmem:[#allocation23_spill] sm:$0xff] %v6011_v58  ;;  %v1915_v32 = vrot.slane %v6011_v58, %v6015_v51 }
0x1434   :  { %v1935_v8 = vsel %vm1934_vm3, %v1915_v32, %v1933_v6 }
0x1435   :  { %v6017_v30 = vpop.xlane.xlu0 %1738 }
0x1436   :  { %7985 = vst [vmem:[#allocation24_spill] sm:$0xff] %v6017_v30  ;;  %v1919_v24 = vrot.slane %v6017_v30, %v6015_v51 }
0x1438   :  { %v1937_v11 = vsel %vm1936_vm4, %v1919_v24, %v1935_v8 }
0x1439   :  { %v6029_v23 = vpop.xlane.xlu0 %1741 }
0x143a   :  { %7986 = vst [vmem:[#allocation25_spill] sm:$0xff] %v6029_v23  ;;  %v1923_v13 = vrot.slane %v6029_v23, %v6015_v51 }
0x143c   :  { %v1939_v30 = vsel %vm1938_vm5, %v1923_v13, %v1937_v11 }
0x143d   :  { %v6039_v43 = vpop.xlane.xlu0 %1744 }
0x143e   :  { %7987 = vst [vmem:[#allocation26_spill] sm:$0xff] %v6039_v43  ;;  %v1927_v12 = vrot.slane %v6039_v43, %v6015_v51 }
0x1440   :  { %v1941_v31 = vsel %vm1940_vm6, %v1927_v12, %v1939_v30 }
0x1441   :  { %v6047_v45 = vsel %vm1887_vm7, %v1941_v31, %v5874_v21  ;;  %v1392_v22 = vpop.permute.xlu0 %1391  ;;  %v2000_v21 = vadd.f32 %v5916_v2, %v5881_v9  ;;  %v2001_v31 = vadd.f32 %v1957_v1, %v5881_v9 }
0x1442   :  { %v1408_v6 = vsel %vm55_vm0, %v1360_v52, %v1392_v22  ;;  %v2016_v32 = vrot.slane %v6047_v45, %v5872_v44  ;;  %v2009_v8 = vcombine.high %v6047_v45, %v6047_v45 }
0x1443   :  { %4909 = vmatmul.mubr.msk.f32.gmra.mrb[22].mxu0 %vm414_vm11, %v1408_v6 }
0x1444   :  { %v2032_v24 = vrot.slane %v2016_v32, %v5872_v44  ;;  %v2024_v19 = vcombine.high %v2016_v32, %v2016_v32  ;;  %v2023_v30 = vrot.slane %v2009_v8, %v5872_v44  ;;  %v2002_v8 = vadd.f32 %v5918_v7, %v5881_v9 }
0x1446   :  { %v2061_v13 = vrot.slane %v2032_v24, %v5541_v41  ;;  %v2046_v11 = vrot.slane %v2024_v19, %v5872_v44  ;;  %v2054_v12 = vcombine.high %v2032_v24, %v2032_v24  ;;  %v2039_v32 = vrot.slane %v2023_v30, %v5872_v44 }
0x1447   :  { %v2025_v24 = vcombine.high %v2023_v30, %v2023_v30 }
0x1448   :  { %v6062_v52 = vadd.f32 %v2061_v13, %v2000_v21  ;;  %v2065_v22 = vrot.slane %v2046_v11, %v5541_v41  ;;  %v2069_v6 = vrot.slane %v2054_v12, %v5541_v41  ;;  %v2077_v21 = vrot.slane %v2039_v32, %v5541_v41 }
0x1449   :  { %v2056_v13 = vcombine.high %v2046_v11, %v2046_v11  ;;  %v2004_v12 = vadd.f32 %v5922_v16, %v5881_v9  ;;  %v2053_v30 = vrot.slane %v2025_v24, %v5872_v44 }
0x144a   :  { %7988 = vst [vmem:[#allocation27_spill] sm:$0xff] %v6062_v52  ;;  %v2106_v2 = vsel %vm1721_vm14, %v6062_v52, -inf  ;;  %v6071_v43 = vadd.f32 %v2065_v22, %v2001_v31  ;;  %v6075_v19 = vadd.f32 %v2069_v6, %v2002_v8  ;;  %v2003_v22 = vadd.f32 %v5920_v34, %v5881_v9 }
0x144b   :  { %2107 = vmax.xlane.f32.xlu1 %v2106_v2  ;;  %v6082_v23 = vadd.f32 %v2077_v21, %v2004_v12  ;;  %v2073_v31 = vrot.slane %v2056_v13, %v5541_v41  ;;  %v2081_v16 = vrot.slane %v2053_v30, %v5541_v41  ;;  %v2055_v8 = vcombine.high %v2039_v32, %v2039_v32 }
0x144c   :  { %7989 = vst [vmem:[#allocation28_spill] sm:$0xff] %v6071_v43  ;;  %v2109_v1 = vsel %vm1721_vm14, %v6071_v43, -inf  ;;  %7990 = vst [vmem:[#allocation29_spill] sm:$0xff] %v6075_v19  ;;  %v2112_v7 = vsel %vm1721_vm14, %v6075_v19, -inf  ;;  %v1533_v2 = vadd.f32 %v5820_v54, %v5913_v49  ;;  %v2057_v13 = vcombine.high %v2053_v30, %v2053_v30 }
0x144d   :  { %2110 = vmax.xlane.f32.xlu0 %v2109_v1  ;;  %7991 = vst [vmem:[#allocation30_spill] sm:$0xff] %v6082_v23  ;;  %v2118_v11 = vsel %vm1721_vm14, %v6082_v23, -inf  ;;  %v6090_v6 = vadd.f32 %v2073_v31, %v2003_v22  ;;  %v2005_v1 = vadd.f32 %v5924_v33, %v5881_v9  ;;  %v2085_v34 = vrot.slane %v2055_v8, %v5541_v41 }
0x144e   :  { %v2006_v12 = vadd.f32 %v5926_v47, %v5881_v9  ;;  %v2701_v32 = vrot.slane %v1533_v2, %v5541_v41  ;;  %v2089_v33 = vrot.slane %v2057_v13, %v5541_v41  ;;  %v2007_v31 = vadd.f32 %v5930_v59, %v5881_v9 }
0x144f   :  { %7992 = vst [vmem:[#allocation31_spill] sm:$0xff] %v6090_v6  ;;  %v2115_v24 = vsel %vm1721_vm14, %v6090_v6, -inf  ;;  %v6099_v21 = vadd.f32 %v2081_v16, %v2005_v1  ;;  %v2708_v30 = vrot.slane %v1533_v2, %v5589_v27  ;;  %v2334_v16 = vpop.permute.xlu1 %2333  ;;  %v2729_v13 = vrot.slane %v1533_v2, %v5834_v28 }
0x1450   :  { %v6115_v22 = vadd.f32 %v2089_v33, %v2007_v31 }
0x1451   :  { %2113 = vmax.xlane.f32.xlu0 %v2112_v7  ;;  %7993 = vst [vmem:[#allocation32_spill] sm:$0xff] %v6099_v21  ;;  %v2121_v49 = vsel %vm1721_vm14, %v6099_v21, -inf  ;;  %v6107_v7 = vadd.f32 %v2085_v34, %v2006_v12  ;;  %v2722_v34 = vrot.slane %v1533_v2, %v5830_v50  ;;  %v2736_v12 = vrot.slane %v1533_v2, %v5838_v35 }
0x1452   :  { %7995 = vst [vmem:[#allocation34_spill] sm:$0xff] %v6115_v22 }
0x1453   :  { %7994 = vst [vmem:[#allocation33_spill] sm:$0xff] %v6107_v7  ;;  %v2124_v47 = vsel %vm1721_vm14, %v6107_v7, -inf  ;;  %v363_v8 = vpop.xlane.xlu1 %362 }
0x1454   :  { %v6120_v1 = vsub.f32 %v363_v8, %v5405_v57  ;;  %v2743_v57 = vrot.slane %v1533_v2, %v5842_v40 }
0x1455   :  { %2119 = vmax.xlane.f32.xlu0 %v2118_v11  ;;  %v2127_v11 = vsel %vm1721_vm14, %v6115_v22, -inf }
0x1456   :  { %vm2643_vm0 = vcmp.gt.f32.partialorder %v6120_v1, 0.0 }
0x1457   :  { %v2644_v59 = vsel %vm2643_vm0, 1, %v7971_v14 }
0x1459   :  { %2116 = vmax.xlane.f32.xlu0 %v2115_v24  ;;  %v2715_v24 = vrot.slane %v1533_v2, %v5826_v29 }
0x145c   :  { %2703 = vbcast.lane.b32.xlu1 %v2701_v32, 256  ;;  %v2750_v32 = vrot.slane %v1533_v2, %v5846_v39 }
0x145d   :  { %2122 = vmax.xlane.f32.xlu0 %v2121_v49  ;;  %v2355_v49 = vpop.permute.xlu0 %2354 }
0x1460   :  { %2710 = vbcast.lane.b32.xlu1 %v2708_v30, 256 }
0x1461   :  { %2125 = vmax.xlane.f32.xlu0 %v2124_v47  ;;  %v6131_v33 = vpop.permute.xlu0 %2361 }
0x1465   :  { %2128 = vmax.xlane.f32.xlu0 %v2127_v11  ;;  %v6133_v31 = vpop.permute.xlu0 %2368 }
0x1469   :  { %v6135_v30 = vpop.permute.xlu0 %2375 }
0x147b   :  { %2646 = vperm.xlu0 %5076, %v2644_v59  }
0x147f   :  { %2717 = vbcast.lane.b32.xlu0 %v2715_v24, 256 }
0x1483   :  { %2724 = vbcast.lane.b32.xlu0 %v2722_v34, 256 }
0x1484   :  { %365 = vadd.xlane.f32.xlu1 %v5435_v0 }
0x1487   :  { %2731 = vbcast.lane.b32.xlu0 %v2729_v13, 256 }
0x148b   :  { %2738 = vbcast.lane.b32.xlu0 %v2736_v12, 256 }
0x148f   :  { %2745 = vbcast.lane.b32.xlu0 %v2743_v57, 256 }
0x1493   :  { %2752 = vbcast.lane.b32.xlu0 %v2750_v32, 256 }
0x14d8   :  { %v6145_v59 = vpop.xlane.xlu1 %2107 }
0x14d9   :  { %8000 = vst [vmem:[#allocation39_spill] sm:$0xff] %v6145_v59  ;;  %v2283_v13 = vrot.slane %v6145_v59, %v6015_v51 }
0x14da   :  { %v6137_v0 = vpop.xlane.xlu0 %2110 }
0x14db   :  { %7996 = vst [vmem:[#allocation35_spill] sm:$0xff] %v6137_v0  ;;  %v2287_v2 = vrot.slane %v6137_v0, %v6015_v51 }
0x14dd   :  { %v2312_v57 = vsel %vm1928_vm15, %v2287_v2, %v2283_v13 }
0x14de   :  { %v6139_v47 = vpop.xlane.xlu0 %2113 }
0x14df   :  { %7997 = vst [vmem:[#allocation36_spill] sm:$0xff] %v6139_v47  ;;  %v2291_v24 = vrot.slane %v6139_v47, %v6015_v51 }
0x14e1   :  { %v2313_v32 = vsel %vm1930_vm1, %v2291_v24, %v2312_v57 }
0x14e2   :  { %v6141_v11 = vpop.xlane.xlu0 %2119 }
0x14e3   :  { %7998 = vst [vmem:[#allocation37_spill] sm:$0xff] %v6141_v11  ;;  %v2299_v36 = vrot.slane %v6141_v11, %v6015_v51 }
0x14e6   :  { %v6143_v8 = vpop.xlane.xlu0 %2116 }
0x14e7   :  { %7999 = vst [vmem:[#allocation38_spill] sm:$0xff] %v6143_v8  ;;  %v2295_v12 = vrot.slane %v6143_v8, %v6015_v51 }
0x14e9   :  { %v2314_v58 = vsel %vm1932_vm2, %v2295_v12, %v2313_v32 }
0x14ea   :  { %v6151_v34 = vpop.xlane.xlu0 %2122  ;;  %v2315_v10 = vsel %vm1934_vm3, %v2299_v36, %v2314_v58 }
0x14eb   :  { %8001 = vst [vmem:[#allocation40_spill] sm:$0xff] %v6151_v34  ;;  %v2303_v56 = vrot.slane %v6151_v34, %v6015_v51 }
0x14ed   :  { %v2316_v2 = vsel %vm1936_vm4, %v2303_v56, %v2315_v10 }
0x14ee   :  { %v6159_v20 = vpop.xlane.xlu0 %2125 }
0x14ef   :  { %8002 = vst [vmem:[#allocation41_spill] sm:$0xff] %v6159_v20  ;;  %v2307_v46 = vrot.slane %v6159_v20, %v6015_v51 }
0x14f1   :  { %v2317_v13 = vsel %vm1938_vm5, %v2307_v46, %v2316_v2  ;;  %v2377_v46 = vadd.f32 %v5997_v17, %v5881_v9 }
0x14f2   :  { %v6169_v37 = vpop.xlane.xlu0 %2128 }
0x14f3   :  { %8003 = vst [vmem:[#allocation42_spill] sm:$0xff] %v6169_v37  ;;  %v2311_v24 = vrot.slane %v6169_v37, %v6015_v51 }
0x14f5   :  { %v2318_v12 = vsel %vm1940_vm6, %v2311_v24, %v2317_v13  ;;  %v2378_v24 = vadd.f32 %v2334_v16, %v5881_v9 }
0x14f6   :  { %v6178_v57 = vsel %vm2271_vm8, %v2318_v12, %v6047_v45 }
0x14f7   :  { %v2393_v32 = vrot.slane %v6178_v57, %v5872_v44  ;;  %v2386_v36 = vcombine.high %v6178_v57, %v6178_v57 }
0x14f9   :  { %v2409_v56 = vrot.slane %v2393_v32, %v5872_v44  ;;  %v2401_v10 = vcombine.high %v2393_v32, %v2393_v32  ;;  %v2400_v58 = vrot.slane %v2386_v36, %v5872_v44  ;;  %v2379_v36 = vadd.f32 %v5999_v60, %v5881_v9 }
0x14fb   :  { %v2438_v55 = vrot.slane %v2409_v56, %v5541_v41  ;;  %v2423_v2 = vrot.slane %v2401_v10, %v5872_v44  ;;  %v2431_v45 = vcombine.high %v2409_v56, %v2409_v56  ;;  %v2416_v32 = vrot.slane %v2400_v58, %v5872_v44 }
0x14fc   :  { %v2402_v56 = vcombine.high %v2400_v58, %v2400_v58 }
0x14fd   :  { %v6191_v13 = vadd.f32 %v2438_v55, %v2377_v46  ;;  %v2442_v12 = vrot.slane %v2423_v2, %v5541_v41  ;;  %v2446_v26 = vrot.slane %v2431_v45, %v5541_v41  ;;  %v2454_v46 = vrot.slane %v2416_v32, %v5541_v41 }
0x14fe   :  { %v2433_v55 = vcombine.high %v2423_v2, %v2423_v2  ;;  %v2381_v45 = vadd.f32 %v2355_v49, %v5881_v9  ;;  %v2430_v58 = vrot.slane %v2402_v56, %v5872_v44 }
0x14ff   :  { %8004 = vst [vmem:[#allocation43_spill] sm:$0xff] %v6191_v13  ;;  %v2483_v17 = vsel %vm1721_vm14, %v6191_v13, -inf  ;;  %v6200_v25 = vadd.f32 %v2442_v12, %v2378_v24  ;;  %v6204_v10 = vadd.f32 %v2446_v26, %v2379_v36  ;;  %v2380_v26 = vadd.f32 %v6003_v48, %v5881_v9  ;;  %v6216_v12 = vpop.permute.xlu1 %2703 }
0x1500   :  { %2484 = vmax.xlane.f32.xlu0 %v2483_v17  ;;  %v6210_v53 = vadd.f32 %v2454_v46, %v2381_v45  ;;  %v2450_v24 = vrot.slane %v2433_v55, %v5541_v41  ;;  %v2458_v49 = vrot.slane %v2430_v58, %v5541_v41  ;;  %v2432_v17 = vcombine.high %v2416_v32, %v2416_v32 }
0x1501   :  { %8005 = vst [vmem:[#allocation44_spill] sm:$0xff] %v6200_v25  ;;  %v2486_v16 = vsel %vm1721_vm14, %v6200_v25, -inf  ;;  %8006 = vst [vmem:[#allocation45_spill] sm:$0xff] %v6204_v10  ;;  %v2489_v60 = vsel %vm1721_vm14, %v6204_v10, -inf  ;;  %v2434_v45 = vcombine.high %v2430_v58, %v2430_v58 }
0x1502   :  { %2487 = vmax.xlane.f32.xlu1 %v2486_v16  ;;  %8007 = vst [vmem:[#allocation46_spill] sm:$0xff] %v6210_v53  ;;  %v2495_v2 = vsel %vm1721_vm14, %v6210_v53, -inf  ;;  %v6220_v36 = vadd.f32 %v2450_v24, %v2380_v26  ;;  %v2382_v16 = vadd.f32 %v6131_v33, %v5881_v9  ;;  %v2462_v55 = vrot.slane %v2432_v17, %v5541_v41 }
0x1503   :  { %v6225_v46 = vpop.permute.xlu1 %2710  ;;  %v2466_v33 = vrot.slane %v2434_v45, %v5541_v41  ;;  %v2647_v45 = vpop.permute.xlu0 %2646 }
0x1504   :  { %8008 = vst [vmem:[#allocation47_spill] sm:$0xff] %v6220_v36  ;;  %v2492_v56 = vsel %vm1721_vm14, %v6220_v36, -inf  ;;  %v6229_v48 = vadd.f32 %v2458_v49, %v2382_v16  ;;  %v2384_v49 = vadd.f32 %v6135_v30, %v5881_v9  ;;  %v6258_v30 = vadd.f32 %v5911_v42, %v5820_v54 }
0x1505   :  { %vm2648_vm10 = vcmp.eq.s32.totalorder %v2647_v45, 1 }
0x1506   :  { %2490 = vmax.xlane.f32.xlu1 %v2489_v60  ;;  %8009 = vst [vmem:[#allocation48_spill] sm:$0xff] %v6229_v48  ;;  %v2383_v60 = vadd.f32 %v6133_v31, %v5881_v9  ;;  %v2498_v32 = vsel %vm1721_vm14, %v6229_v48, -inf  ;;  %v6248_v17 = vadd.f32 %v2466_v33, %v2384_v49 }
0x1508   :  { %v6236_v26 = vadd.f32 %v2462_v55, %v2383_v60  ;;  %8011 = vst [vmem:[#allocation50_spill] sm:$0xff] %v6248_v17  ;;  %v3078_v55 = vrot.slane %v6258_v30, %v5541_v41  ;;  %v2718_v60 = vpop.permute.xlu0 %2717 }
0x1509   :  { %v2756_v48 = vadd.f32 %v2718_v60, %v5881_v9 }
0x150a   :  { %2496 = vmax.xlane.f32.xlu1 %v2495_v2  ;;  %8010 = vst [vmem:[#allocation49_spill] sm:$0xff] %v6236_v26  ;;  %v2501_v31 = vsel %vm1721_vm14, %v6236_v26, -inf }
0x150e   :  { %2493 = vmax.xlane.f32.xlu1 %v2492_v56 }
0x1511   :  { %v366_v24 = vpop.xlane.xlu1 %365 }
0x1512   :  { %v6240_v2 = vsub.f32 %v366_v24, %v5425_v62  ;;  %2499 = vmax.xlane.f32.xlu1 %v2498_v32  ;;  %v2504_v62 = vsel %vm1721_vm14, %v6248_v17, -inf  ;;  %v6262_v24 = vpop.permute.xlu0 %2724 }
0x1514   :  { %vm3020_vm9 = vcmp.gt.f32.partialorder %v6240_v2, 0.0 }
0x1515   :  { %v3021_v58 = vsel %vm3020_vm9, 1, %v7971_v14 }
0x1516   :  { %v6250_v16 = vpop.f32.mrb[22].mxu0  ;;  %3023 = vperm.xlu0 %5076, %v3021_v58   ;;  %2502 = vmax.xlane.f32.xlu1 %v2501_v31  ;;  %v2732_v32 = vpop.permute.xlu0 %2731 }
0x1517   :  { %v6252_v56 = vpop.f32.mrb[23].mxu0 }
0x151a   :  { %2505 = vmax.xlane.f32.xlu1 %v2504_v62  ;;  %v6264_v33 = vpop.permute.xlu0 %2738 }
0x151e   :  { %v2746_v58 = vpop.permute.xlu0 %2745 }
0x1522   :  { %v6272_v42 = vpop.permute.xlu0 %2752 }
0x152b   :  { %3080 = vbcast.lane.b32.xlu1 %v3078_v55, 256 }
0x158d   :  { %v6276_v20 = vpop.xlane.xlu0 %2484 }
0x158e   :  { %8016 = vst [vmem:[#allocation55_spill] sm:$0xff] %v6276_v20  ;;  %v2660_v21 = vrot.slane %v6276_v20, %v6015_v51 }
0x158f   :  { %v6266_v49 = vpop.xlane.xlu1 %2487 }
0x1590   :  { %8012 = vst [vmem:[#allocation51_spill] sm:$0xff] %v6266_v49  ;;  %v2664_v55 = vrot.slane %v6266_v49, %v6015_v51 }
0x1592   :  { %v2689_v23 = vsel %vm1928_vm15, %v2664_v55, %v2660_v21 }
0x1593   :  { %v6268_v31 = vpop.xlane.xlu1 %2490 }
0x1594   :  { %8013 = vst [vmem:[#allocation52_spill] sm:$0xff] %v6268_v31  ;;  %v2668_v22 = vrot.slane %v6268_v31, %v6015_v51 }
0x1596   :  { %v2690_v11 = vsel %vm1930_vm1, %v2668_v22, %v2689_v23 }
0x1597   :  { %v6270_v62 = vpop.xlane.xlu1 %2496 }
0x1598   :  { %8014 = vst [vmem:[#allocation53_spill] sm:$0xff] %v6270_v62  ;;  %v2676_v47 = vrot.slane %v6270_v62, %v6015_v51 }
0x159b   :  { %v6274_v7 = vpop.xlane.xlu1 %2493 }
0x159c   :  { %8015 = vst [vmem:[#allocation54_spill] sm:$0xff] %v6274_v7  ;;  %v2672_v34 = vrot.slane %v6274_v7, %v6015_v51 }
0x159e   :  { %v2691_v8 = vsel %vm1932_vm2, %v2672_v34, %v2690_v11 }
0x159f   :  { %v6282_v37 = vpop.xlane.xlu1 %2499  ;;  %v2692_v0 = vsel %vm1934_vm3, %v2676_v47, %v2691_v8 }
0x15a0   :  { %8017 = vst [vmem:[#allocation56_spill] sm:$0xff] %v6282_v37  ;;  %v2680_v19 = vrot.slane %v6282_v37, %v6015_v51 }
0x15a2   :  { %v2693_v21 = vsel %vm1936_vm4, %v2680_v19, %v2692_v0 }
0x15a3   :  { %v6290_v6 = vpop.xlane.xlu1 %2502 }
0x15a4   :  { %8018 = vst [vmem:[#allocation57_spill] sm:$0xff] %v6290_v6  ;;  %v2684_v43 = vrot.slane %v6290_v6, %v6015_v51 }
0x15a6   :  { %v2694_v22 = vsel %vm1938_vm5, %v2684_v43, %v2693_v21  ;;  %v2754_v43 = vadd.f32 %v6216_v12, %v5881_v9  ;;  %v2760_v12 = vadd.f32 %v2746_v58, %v5881_v9  ;;  %v2758_v58 = vadd.f32 %v2732_v32, %v5881_v9 }
0x15a7   :  { %v6300_v52 = vpop.xlane.xlu1 %2505 }
0x15a8   :  { %8019 = vst [vmem:[#allocation58_spill] sm:$0xff] %v6300_v52  ;;  %v2688_v23 = vrot.slane %v6300_v52, %v6015_v51 }
0x15aa   :  { %v2695_v11 = vsel %vm1940_vm6, %v2688_v23, %v2694_v22  ;;  %v2755_v22 = vadd.f32 %v6225_v46, %v5881_v9 }
0x15ab   :  { %v6308_v34 = vsel %vm2648_vm10, %v2695_v11, %v6178_v57 }
0x15ac   :  { %v2763_v55 = vcombine.high %v6308_v34, %v6308_v34  ;;  %v2770_v47 = vrot.slane %v6308_v34, %v5872_v44 }
0x15ae   :  { %v2786_v8 = vrot.slane %v2770_v47, %v5872_v44  ;;  %v2778_v19 = vcombine.high %v2770_v47, %v2770_v47  ;;  %v2777_v0 = vrot.slane %v2763_v55, %v5872_v44 }
0x15b0   :  { %v2815_v45 = vrot.slane %v2786_v8, %v5541_v41  ;;  %v2800_v21 = vrot.slane %v2778_v19, %v5872_v44  ;;  %v2793_v57 = vrot.slane %v2777_v0, %v5872_v44  ;;  %v2808_v23 = vcombine.high %v2786_v8, %v2786_v8 }
0x15b2   :  { %v6323_v11 = vadd.f32 %v2815_v45, %v2754_v43  ;;  %v2819_v59 = vrot.slane %v2800_v21, %v5541_v41  ;;  %v2809_v47 = vcombine.high %v2793_v57, %v2793_v57  ;;  %v2823_v55 = vrot.slane %v2808_v23, %v5541_v41 }
0x15b3   :  { %v2831_v46 = vrot.slane %v2793_v57, %v5541_v41  ;;  %v2779_v43 = vcombine.high %v2777_v0, %v2777_v0  ;;  %v2810_v60 = vcombine.high %v2800_v21, %v2800_v21 }
0x15b4   :  { %8020 = vst [vmem:[#allocation59_spill] sm:$0xff] %v6323_v11  ;;  %v2860_v19 = vsel %vm1721_vm14, %v6323_v11, -inf  ;;  %v6331_v37 = vadd.f32 %v2819_v59, %v2755_v22  ;;  %v2839_v8 = vrot.slane %v2809_v47, %v5541_v41  ;;  %v6339_v23 = vadd.f32 %v2823_v55, %v2756_v48 }
0x15b5   :  { %2861 = vmax.xlane.f32.xlu0 %v2860_v19  ;;  %v6346_v57 = vadd.f32 %v2831_v46, %v2758_v58  ;;  %v2827_v0 = vrot.slane %v2810_v60, %v5541_v41  ;;  %v2807_v47 = vrot.slane %v2779_v43, %v5872_v44  ;;  %v2757_v48 = vadd.f32 %v6262_v24, %v5881_v9 }
0x15b6   :  { %8021 = vst [vmem:[#allocation60_spill] sm:$0xff] %v6331_v37  ;;  %v2863_v45 = vsel %vm1721_vm14, %v6331_v37, -inf  ;;  %v6337_v17 = vadd.f32 %v2839_v8, %v2760_v12  ;;  %8023 = vst [vmem:[#allocation62_spill] sm:$0xff] %v6339_v23  ;;  %v2866_v22 = vsel %vm1721_vm14, %v6339_v23, -inf  ;;  %v2759_v19 = vadd.f32 %v6264_v33, %v5881_v9 }
0x15b7   :  { %2864 = vmax.xlane.f32.xlu1 %v2863_v45  ;;  %8024 = vst [vmem:[#allocation63_spill] sm:$0xff] %v6346_v57  ;;  %v2872_v32 = vsel %vm1721_vm14, %v6346_v57, -inf  ;;  %v6354_v21 = vadd.f32 %v2827_v0, %v2757_v48  ;;  %v2835_v55 = vrot.slane %v2807_v47, %v5541_v41  ;;  %v2811_v12 = vcombine.high %v2807_v47, %v2807_v47 }
0x15b8   :  { %8022 = vst [vmem:[#allocation61_spill] sm:$0xff] %v6337_v17  ;;  %v2878_v59 = vsel %vm1721_vm14, %v6337_v17, -inf  ;;  %v2761_v24 = vadd.f32 %v6272_v42, %v5881_v9  ;;  %v3092_v58 = vrot.slane %v6258_v30, %v5826_v29  ;;  %v3106_v42 = vrot.slane %v6258_v30, %v5834_v28 }
0x15b9   :  { %2879 = vmax.xlane.f32.xlu0 %v2878_v59  ;;  %8025 = vst [vmem:[#allocation64_spill] sm:$0xff] %v6354_v21  ;;  %v2869_v8 = vsel %vm1721_vm14, %v6354_v21, -inf  ;;  %v6361_v46 = vadd.f32 %v2835_v55, %v2759_v19  ;;  %v2843_v43 = vrot.slane %v2811_v12, %v5541_v41  ;;  %v3099_v59 = vrot.slane %v6258_v30, %v5830_v50  ;;  %v6396_v19 = vpop.permute.xlu1 %3080 }
0x15ba   :  { %v3085_v0 = vrot.slane %v6258_v30, %v5589_v27  ;;  %v3120_v47 = vrot.slane %v6258_v30, %v5842_v40  ;;  %v3127_v48 = vrot.slane %v6258_v30, %v5846_v39 }
0x15bb   :  { %2867 = vmax.xlane.f32.xlu1 %v2866_v22  ;;  %8026 = vst [vmem:[#allocation65_spill] sm:$0xff] %v6361_v46  ;;  %v2875_v45 = vsel %vm1721_vm14, %v6361_v46, -inf  ;;  %v6368_v60 = vadd.f32 %v2843_v43, %v2761_v24  ;;  %v3113_v22 = vrot.slane %v6258_v30, %v5838_v35  ;;  %v3024_v30 = vpop.permute.xlu0 %3023 }
0x15bc   :  { %vm3025_vm11 = vcmp.eq.s32.totalorder %v3024_v30, 1 }
0x15bd   :  { %8027 = vst [vmem:[#allocation66_spill] sm:$0xff] %v6368_v60  ;;  %v2881_v33 = vsel %vm1721_vm14, %v6368_v60, -inf }
0x15bf   :  { %2873 = vmax.xlane.f32.xlu1 %v2872_v32  ;;  %v6389_v32 = vadd.f32 %v5820_v54, %v6252_v56 }
0x15c1   :  { %v3455_v55 = vrot.slane %v6389_v32, %v5541_v41  ;;  %v3462_v12 = vrot.slane %v6389_v32, %v5589_v27 }
0x15c3   :  { %2870 = vmax.xlane.f32.xlu1 %v2869_v8 }
0x15c7   :  { %2876 = vmax.xlane.f32.xlu1 %v2875_v45 }
0x15cb   :  { %2882 = vmax.xlane.f32.xlu1 %v2881_v33 }
0x15cf   :  { %3094 = vbcast.lane.b32.xlu0 %v3092_v58, 256 }
0x15d3   :  { %3101 = vbcast.lane.b32.xlu0 %v3099_v59, 256 }
0x15d7   :  { %3108 = vbcast.lane.b32.xlu0 %v3106_v42, 256 }
0x15db   :  { %3115 = vbcast.lane.b32.xlu0 %v3113_v22, 256 }
0x15dc   :  { %3087 = vbcast.lane.b32.xlu1 %v3085_v0, 256 }
0x15df   :  { %3122 = vbcast.lane.b32.xlu0 %v3120_v47, 256 }
0x15e3   :  { %3129 = vbcast.lane.b32.xlu0 %v3127_v48, 256 }
0x1600   :  { %368 = vadd.xlane.f32.xlu1 %v5429_v63 }
0x1611   :  { %3457 = vbcast.lane.b32.xlu1 %v3455_v55, 256 }
0x1615   :  { %3464 = vbcast.lane.b32.xlu1 %v3462_v12, 256 }
0x1639   :  { %371 = vadd.xlane.f32.xlu1 %v5452_v5 }
0x1642   :  { %v6400_v63 = vpop.xlane.xlu0 %2861 }
0x1643   :  { %8029 = vst [vmem:[#allocation68_spill] sm:$0xff] %v6400_v63  ;;  %v3037_v5 = vrot.slane %v6400_v63, %v6015_v51 }
0x1644   :  { %v6398_v8 = vpop.xlane.xlu1 %2864 }
0x1645   :  { %8028 = vst [vmem:[#allocation67_spill] sm:$0xff] %v6398_v8  ;;  %v3041_v56 = vrot.slane %v6398_v8, %v6015_v51 }
0x1646   :  { %v6408_v24 = vpop.xlane.xlu0 %2879 }
0x1647   :  { %8032 = vst [vmem:[#allocation71_spill] sm:$0xff] %v6408_v24  ;;  %v3066_v58 = vsel %vm1928_vm15, %v3041_v56, %v3037_v5  ;;  %v3061_v5 = vrot.slane %v6408_v24, %v6015_v51 }
0x1648   :  { %v6402_v43 = vpop.xlane.xlu1 %2867 }
0x1649   :  { %8030 = vst [vmem:[#allocation69_spill] sm:$0xff] %v6402_v43  ;;  %v3045_v45 = vrot.slane %v6402_v43, %v6015_v51 }
0x164a   :  { %v3095_v0 = vpop.permute.xlu0 %3094 }
0x164b   :  { %v3067_v42 = vsel %vm1930_vm1, %v3045_v45, %v3066_v58 }
0x164c   :  { %v6404_v54 = vpop.xlane.xlu1 %2873 }
0x164d   :  { %8031 = vst [vmem:[#allocation70_spill] sm:$0xff] %v6404_v54  ;;  %v3053_v47 = vrot.slane %v6404_v54, %v6015_v51 }
0x164e   :  { %v3102_v58 = vpop.permute.xlu0 %3101 }
0x1650   :  { %v6414_v33 = vpop.xlane.xlu1 %2870 }
0x1651   :  { %8033 = vst [vmem:[#allocation72_spill] sm:$0xff] %v6414_v33  ;;  %v3049_v59 = vrot.slane %v6414_v33, %v6015_v51 }
0x1652   :  { %v3109_v53 = vpop.permute.xlu0 %3108 }
0x1653   :  { %v3068_v22 = vsel %vm1932_vm2, %v3049_v59, %v3067_v42  ;;  %v3135_v31 = vadd.f32 %v3109_v53, %v5881_v9 }
0x1654   :  { %v6423_v48 = vpop.xlane.xlu1 %2876  ;;  %v3069_v12 = vsel %vm1934_vm3, %v3053_v47, %v3068_v22 }
0x1655   :  { %8034 = vst [vmem:[#allocation73_spill] sm:$0xff] %v6423_v48  ;;  %v3057_v55 = vrot.slane %v6423_v48, %v6015_v51 }
0x1657   :  { %v3070_v56 = vsel %vm1936_vm4, %v3057_v55, %v3069_v12 }
0x1658   :  { %v6431_v52 = vpop.xlane.xlu1 %2882  ;;  %v3071_v59 = vsel %vm1938_vm5, %v3061_v5, %v3070_v56 }
0x1659   :  { %8035 = vst [vmem:[#allocation74_spill] sm:$0xff] %v6431_v52  ;;  %v3065_v45 = vrot.slane %v6431_v52, %v6015_v51 }
0x165b   :  { %v3072_v42 = vsel %vm1940_vm6, %v3065_v45, %v3071_v59 }
0x165c   :  { %v6438_v26 = vsel %vm3025_vm11, %v3072_v42, %v6308_v34  ;;  %v3088_v56 = vpop.permute.xlu1 %3087 }
0x165d   :  { %v3147_v22 = vrot.slane %v6438_v26, %v5872_v44  ;;  %v3140_v47 = vcombine.high %v6438_v26, %v6438_v26  ;;  %v3132_v5 = vadd.f32 %v3088_v56, %v5881_v9 }
0x165f   :  { %v3155_v55 = vcombine.high %v3147_v22, %v3147_v22  ;;  %v6445_v12 = vrot.slane %v3147_v22, %v5872_v44  ;;  %v3154_v6 = vrot.slane %v3140_v47, %v5872_v44  ;;  %v3133_v22 = vadd.f32 %v3095_v0, %v5881_v9  ;;  %v3116_v47 = vpop.permute.xlu0 %3115 }
0x1661   :  { %v3177_v30 = vrot.slane %v3155_v55, %v5872_v44  ;;  %v3185_v34 = vcombine.high %v6445_v12, %v6445_v12  ;;  %v3170_v42 = vrot.slane %v3154_v6, %v5872_v44  ;;  %v3156_v36 = vcombine.high %v3154_v6, %v3154_v6 }
0x1663   :  { %v3196_v45 = vrot.slane %v3177_v30, %v5541_v41  ;;  %v3200_v59 = vrot.slane %v3185_v34, %v5541_v41  ;;  %v3208_v10 = vrot.slane %v3170_v42, %v5541_v41  ;;  %v3187_v56 = vcombine.high %v3177_v30, %v3177_v30 }
0x1664   :  { %v3184_v6 = vrot.slane %v3156_v36, %v5872_v44 }
0x1665   :  { %v6456_v62 = vadd.f32 %v3196_v45, %v3132_v5  ;;  %v6460_v7 = vadd.f32 %v3200_v59, %v3133_v22  ;;  %v6466_v25 = vadd.f32 %v3208_v10, %v3135_v31  ;;  %v3204_v0 = vrot.slane %v3187_v56, %v5541_v41  ;;  %v3123_v5 = vpop.permute.xlu0 %3122 }
0x1666   :  { %v3134_v45 = vadd.f32 %v3102_v58, %v5881_v9  ;;  %v3212_v53 = vrot.slane %v3184_v6, %v5541_v41  ;;  %v3188_v22 = vcombine.high %v3184_v6, %v3184_v6  ;;  %v3136_v10 = vadd.f32 %v3116_v47, %v5881_v9  ;;  %v5174_v6 = vld [vmem:[%s7870_s2 + $0x58] ss:$0 sm:$0xff] }
0x1667   :  { %v3240_v55 = vsel %vm1721_vm14, %v6456_v62, -inf  ;;  %v3243_v34 = vsel %vm1721_vm14, %v6460_v7, -inf  ;;  %8036 = vst [vmem:[#allocation75_spill] sm:$0xff] %v6466_v25  ;;  %v3249_v59 = vsel %vm1721_vm14, %v6466_v25, -inf }
0x1668   :  { %3241 = vmax.xlane.f32.xlu1 %v3240_v55  ;;  %v6473_v30 = vadd.f32 %v3204_v0, %v3134_v45  ;;  %v6479_v36 = vadd.f32 %v3212_v53, %v3136_v10  ;;  %v3220_v56 = vrot.slane %v3188_v22, %v5541_v41  ;;  %v6493_v45 = vadd.f32 %v5174_v6, %v6250_v16 }
0x1669   :  { %v3130_v31 = vpop.permute.xlu0 %3129  ;;  %v3469_v10 = vrot.slane %v6389_v32, %v5826_v29  ;;  %v3476_v16 = vrot.slane %v6389_v32, %v5830_v50  ;;  %v3497_v6 = vrot.slane %v6389_v32, %v5842_v40 }
0x166a   :  { %v3246_v55 = vsel %vm1721_vm14, %v6473_v30, -inf  ;;  %8037 = vst [vmem:[#allocation76_spill] sm:$0xff] %v6479_v36  ;;  %v3138_v58 = vadd.f32 %v3130_v31, %v5881_v9  ;;  %v3832_v9 = vrot.slane %v6493_v45, %v5541_v41  ;;  %v3483_v31 = vrot.slane %v6389_v32, %v5834_v28 }
0x166c   :  { %3244 = vmax.xlane.f32.xlu1 %v3243_v34  ;;  %v3252_v34 = vsel %vm1721_vm14, %v6479_v36, -inf  ;;  %v6485_v0 = vadd.f32 %v3220_v56, %v3138_v58  ;;  %v6515_v56 = vld [vmem:[%s7870_s2 + $0x40] sm:$0xff] }
0x166d   :  { %v3131_v58 = vadd.f32 %v6515_v56, %v6396_v19 }
0x166e   :  { %8038 = vst [vmem:[#allocation77_spill] sm:$0xff] %v6485_v0  ;;  %v3258_v47 = vsel %vm1721_vm14, %v6485_v0, -inf }
0x1670   :  { %3250 = vmax.xlane.f32.xlu1 %v3249_v59 }
0x1674   :  { %3247 = vmax.xlane.f32.xlu1 %v3246_v55  ;;  %v3192_v55 = vrot.slane %v6445_v12, %v5541_v41 }
0x1678   :  { %3253 = vmax.xlane.f32.xlu1 %v3252_v34  ;;  %v6519_v34 = vadd.f32 %v3192_v55, %v3131_v58  ;;  %v3504_v55 = vrot.slane %v6389_v32, %v5846_v39 }
0x167c   :  { %3259 = vmax.xlane.f32.xlu1 %v3258_v47  ;;  %v3237_v47 = vsel %vm1721_vm14, %v6519_v34, -inf }
0x168d   :  { %v369_v59 = vpop.xlane.xlu1 %368  ;;  %3834 = vbcast.lane.b32.xlu1 %v3832_v9, 256  ;;  %v3186_v9 = vcombine.high %v3170_v42, %v3170_v42 }
0x168e   :  { %v6498_v53 = vsub.f32 %v369_v59, %v5422_v61  ;;  %v3490_v61 = vrot.slane %v6389_v32, %v5838_v35  ;;  %v3137_v59 = vadd.f32 %v6515_v56, %v3123_v5 }
0x168f   :  { %v3216_v12 = vrot.slane %v3186_v9, %v5541_v41 }
0x1690   :  { %vm3397_vm12 = vcmp.gt.f32.partialorder %v6498_v53, 0.0 }
0x1691   :  { %v3398_v22 = vsel %vm3397_vm12, 1, %v7971_v14 }
0x1692   :  { %3400 = vperm.xlu0 %5076, %v3398_v22   ;;  %v6527_v22 = vadd.f32 %v3216_v12, %v3137_v59 }
0x1694   :  { %8039 = vst [vmem:[#allocation78_spill] sm:$0xff] %v6527_v22  ;;  %v3255_v19 = vsel %vm1721_vm14, %v6527_v22, -inf }
0x1696   :  { %3471 = vbcast.lane.b32.xlu0 %v3469_v10, 256  ;;  %v3458_v10 = vpop.permute.xlu1 %3457 }
0x169a   :  { %3478 = vbcast.lane.b32.xlu0 %v3476_v16, 256  ;;  %v3465_v16 = vpop.permute.xlu1 %3464 }
0x169e   :  { %3485 = vbcast.lane.b32.xlu0 %v3483_v31, 256 }
0x16a2   :  { %3492 = vbcast.lane.b32.xlu0 %v3490_v61, 256 }
0x16c1   :  { %3238 = vmax.xlane.f32.xlu0 %v3237_v47 }
0x16c6   :  { %v372_v31 = vpop.xlane.xlu1 %371 }
0x16c7   :  { %v6532_v61 = vsub.f32 %v372_v31, %v5442_v3 }
0x16c9   :  { %vm3774_vm13 = vcmp.gt.f32.partialorder %v6532_v61, 0.0 }
0x16ca   :  { %v3775_v42 = vsel %vm3774_vm13, 1, %v7971_v14 }
0x16d7   :  { %3499 = vbcast.lane.b32.xlu0 %v3497_v6, 256 }
0x16f5   :  { %v6540_v6 = vpop.xlane.xlu1 %3241 }
0x16f6   :  { %3256 = vmax.xlane.f32.xlu0 %v3255_v19 }
0x16f9   :  { %v6542_v12 = vpop.xlane.xlu1 %3244 }
0x16fa   :  { %v3422_v49 = vrot.slane %v6542_v12, %v6015_v51 }
0x16fd   :  { %v6546_v59 = vpop.xlane.xlu1 %3250 }
0x16fe   :  { %8040 = vst [vmem:[#allocation79_spill] sm:$0xff] %v6546_v59  ;;  %v3430_v52 = vrot.slane %v6546_v59, %v6015_v51 }
0x1701   :  { %v6552_v31 = vpop.xlane.xlu1 %3247 }
0x1702   :  { %v3426_v17 = vrot.slane %v6552_v31, %v6015_v51 }
0x1705   :  { %v6559_v13 = vpop.xlane.xlu1 %3253 }
0x1706   :  { %8041 = vst [vmem:[#allocation80_spill] sm:$0xff] %v6559_v13 }
0x1709   :  { %v6567_v46 = vpop.xlane.xlu1 %3259 }
0x170a   :  { %8042 = vst [vmem:[#allocation81_spill] sm:$0xff] %v6567_v46 }
0x170c   :  { %3506 = vbcast.lane.b32.xlu0 %v3504_v55, 256  ;;  %v3418_v55 = vrot.slane %v6540_v6, %v6015_v51 }
0x1710   :  { %3777 = vperm.xlu0 %5076, %v3775_v42  }
0x1711   :  { %v3401_v5 = vpop.permute.xlu0 %3400 }
0x1712   :  { %vm3402_vm7 = vcmp.eq.s32.totalorder %v3401_v5, 1 }
0x1715   :  { %v3472_v58 = vpop.permute.xlu0 %3471 }
0x1719   :  { %v6538_v47 = vpop.permute.xlu0 %3478 }
0x171d   :  { %v3486_v9 = vpop.permute.xlu0 %3485 }
0x1721   :  { %v6544_v3 = vpop.permute.xlu0 %3492 }
0x174e   :  { %v6548_v32 = vpop.xlane.xlu0 %3238 }
0x174f   :  { %v3414_v19 = vrot.slane %v6548_v32, %v6015_v51 }
0x1751   :  { %v3443_v42 = vsel %vm1928_vm15, %v3418_v55, %v3414_v19  ;;  %v3434_v55 = vrot.slane %v6559_v13, %v6015_v51 }
0x1752   :  { %v3444_v20 = vsel %vm1930_vm1, %v3422_v49, %v3443_v42  ;;  %v3500_v60 = vpop.permute.xlu0 %3499  ;;  %v3442_v42 = vrot.slane %v6567_v46, %v6015_v51 }
0x1753   :  { %v3445_v24 = vsel %vm1932_vm2, %v3426_v17, %v3444_v20 }
0x1754   :  { %v3446_v19 = vsel %vm1934_vm3, %v3430_v52, %v3445_v24 }
0x1755   :  { %v3447_v20 = vsel %vm1936_vm4, %v3434_v55, %v3446_v19  ;;  %v3508_v19 = vadd.f32 %v6515_v56, %v3458_v10  ;;  %v3514_v10 = vadd.f32 %v6515_v56, %v3500_v60  ;;  %v3512_v60 = vadd.f32 %v6515_v56, %v3486_v9 }
0x1783   :  { %v6572_v48 = vpop.xlane.xlu0 %3256 }
0x1784   :  { %8043 = vst [vmem:[#allocation82_spill] sm:$0xff] %v6572_v48  ;;  %v3438_v49 = vrot.slane %v6572_v48, %v6015_v51 }
0x1786   :  { %v3448_v17 = vsel %vm1938_vm5, %v3438_v49, %v3447_v20  ;;  %v3509_v49 = vadd.f32 %v6515_v56, %v3465_v16 }
0x1787   :  { %v3449_v57 = vsel %vm1940_vm6, %v3442_v42, %v3448_v17 }
0x1788   :  { %v6582_v52 = vsel %vm3402_vm7, %v3449_v57, %v6438_v26 }
0x1789   :  { %v3524_v24 = vrot.slane %v6582_v52, %v5872_v44  ;;  %v3517_v54 = vcombine.high %v6582_v52, %v6582_v52 }
0x178b   :  { %v3540_v21 = vrot.slane %v3524_v24, %v5872_v44  ;;  %v3532_v33 = vcombine.high %v3524_v24, %v3524_v24  ;;  %v3531_v23 = vrot.slane %v3517_v54, %v5872_v44  ;;  %v3510_v54 = vadd.f32 %v6515_v56, %v3472_v58 }
0x178d   :  { %v3569_v5 = vrot.slane %v3540_v21, %v5541_v41  ;;  %v3554_v55 = vrot.slane %v3532_v33, %v5872_v44  ;;  %v3547_v26 = vrot.slane %v3531_v23, %v5872_v44  ;;  %v3562_v57 = vcombine.high %v3540_v21, %v3540_v21 }
0x178f   :  { %v6595_v42 = vadd.f32 %v3569_v5, %v3508_v19  ;;  %v3573_v20 = vrot.slane %v3554_v55, %v5541_v41  ;;  %v3563_v17 = vcombine.high %v3547_v26, %v3547_v26  ;;  %v3577_v24 = vrot.slane %v3562_v57, %v5541_v41 }
0x1790   :  { %v3585_v16 = vrot.slane %v3547_v26, %v5541_v41  ;;  %v3533_v19 = vcombine.high %v3531_v23, %v3531_v23  ;;  %v3564_v58 = vcombine.high %v3554_v55, %v3554_v55  ;;  %v3511_v55 = vadd.f32 %v6515_v56, %v6538_v47 }
0x1791   :  { %v3614_v43 = vsel %vm1721_vm14, %v6595_v42, -inf  ;;  %v6603_v33 = vadd.f32 %v3573_v20, %v3509_v49  ;;  %v3593_v21 = vrot.slane %v3563_v17, %v5541_v41  ;;  %v6611_v57 = vadd.f32 %v3577_v24, %v3510_v54 }
0x1792   :  { %3615 = vmax.xlane.f32.xlu0 %v3614_v43  ;;  %v6618_v26 = vadd.f32 %v3585_v16, %v3512_v60  ;;  %v3581_v23 = vrot.slane %v3564_v58, %v5541_v41  ;;  %v3561_v20 = vrot.slane %v3533_v19, %v5872_v44 }
0x1793   :  { %v3617_v5 = vsel %vm1721_vm14, %v6603_v33, -inf  ;;  %v6609_v37 = vadd.f32 %v3593_v21, %v3514_v10  ;;  %v3620_v43 = vsel %vm1721_vm14, %v6611_v57, -inf  ;;  %v3513_v10 = vadd.f32 %v6515_v56, %v6544_v3  ;;  %v3507_v21 = vpop.permute.xlu0 %3506 }
0x1794   :  { %3618 = vmax.xlane.f32.xlu1 %v3617_v5  ;;  %v3626_v9 = vsel %vm1721_vm14, %v6618_v26, -inf  ;;  %v6626_v17 = vadd.f32 %v3581_v23, %v3511_v55  ;;  %v3589_v24 = vrot.slane %v3561_v20, %v5541_v41  ;;  %v3565_v54 = vcombine.high %v3561_v20, %v3561_v20 }
0x1795   :  { %v3632_v49 = vsel %vm1721_vm14, %v6609_v37, -inf  ;;  %v3515_v5 = vadd.f32 %v6515_v56, %v3507_v21  ;;  %v3860_v23 = vrot.slane %v6493_v45, %v5834_v28  ;;  %v3867_v20 = vrot.slane %v6493_v45, %v5838_v35 }
0x1796   :  { %3633 = vmax.xlane.f32.xlu0 %v3632_v49  ;;  %v3623_v16 = vsel %vm1721_vm14, %v6626_v17, -inf  ;;  %v6633_v19 = vadd.f32 %v3589_v24, %v3513_v10  ;;  %v3597_v47 = vrot.slane %v3565_v54, %v5541_v41  ;;  %v3846_v49 = vrot.slane %v6493_v45, %v5826_v29 }
0x1797   :  { %v3839_v55 = vrot.slane %v6493_v45, %v5589_v27  ;;  %v3874_v29 = vrot.slane %v6493_v45, %v5842_v40  ;;  %v3778_v28 = vpop.permute.xlu0 %3777 }
0x1798   :  { %3621 = vmax.xlane.f32.xlu1 %v3620_v43  ;;  %v3629_v58 = vsel %vm1721_vm14, %v6633_v19, -inf  ;;  %v6639_v60 = vadd.f32 %v3597_v47, %v3515_v5  ;;  %v3853_v43 = vrot.slane %v6493_v45, %v5830_v50  ;;  %v3881_v50 = vrot.slane %v6493_v45, %v5846_v39 }
0x1799   :  { %vm3779_vm0 = vcmp.eq.s32.totalorder %v3778_v28, 1 }
0x179a   :  { %v3635_v3 = vsel %vm1721_vm14, %v6639_v60, -inf }
0x179c   :  { %3627 = vmax.xlane.f32.xlu1 %v3626_v9  ;;  %v3835_v9 = vpop.permute.xlu1 %3834 }
0x179d   :  { %v3885_v28 = vadd.f32 %v6515_v56, %v3835_v9 }
0x17a0   :  { %3624 = vmax.xlane.f32.xlu1 %v3623_v16 }
0x17a4   :  { %3630 = vmax.xlane.f32.xlu1 %v3629_v58 }
0x17a8   :  { %3636 = vmax.xlane.f32.xlu1 %v3635_v3 }
0x17ac   :  { %3848 = vbcast.lane.b32.xlu0 %v3846_v49, 256 }
0x17b0   :  { %3855 = vbcast.lane.b32.xlu0 %v3853_v43, 256 }
0x17b4   :  { %3862 = vbcast.lane.b32.xlu0 %v3860_v23, 256 }
0x17b8   :  { %3869 = vbcast.lane.b32.xlu0 %v3867_v20, 256 }
0x17b9   :  { %3841 = vbcast.lane.b32.xlu1 %v3839_v55, 256 }
0x17bc   :  { %3876 = vbcast.lane.b32.xlu0 %v3874_v29, 256 }
0x17c0   :  { %3883 = vbcast.lane.b32.xlu0 %v3881_v50, 256 }
0x17dd   :  { %374 = vadd.xlane.f32.xlu1 %v5446_v4 }
0x181f   :  { %v6658_v24 = vpop.xlane.xlu0 %3615 }
0x1820   :  { %v3791_v4 = vrot.slane %v6658_v24, %v6015_v51 }
0x1821   :  { %v6660_v35 = vpop.xlane.xlu1 %3618 }
0x1822   :  { %v3795_v40 = vrot.slane %v6660_v35, %v6015_v51 }
0x1823   :  { %v6662_v54 = vpop.xlane.xlu0 %3633 }
0x1824   :  { %v3820_v47 = vsel %vm1928_vm15, %v3795_v40, %v3791_v4  ;;  %v3815_v50 = vrot.slane %v6662_v54, %v6015_v51 }
0x1825   :  { %v6664_v27 = vpop.xlane.xlu1 %3621 }
0x1826   :  { %v3799_v39 = vrot.slane %v6664_v27, %v6015_v51 }
0x1827   :  { %v3849_v10 = vpop.permute.xlu0 %3848 }
0x1828   :  { %v3821_v58 = vsel %vm1930_vm1, %v3799_v39, %v3820_v47 }
0x1829   :  { %v6666_v21 = vpop.xlane.xlu1 %3627 }
0x182a   :  { %v3807_v49 = vrot.slane %v6666_v21, %v6015_v51 }
0x182b   :  { %v3856_v45 = vpop.permute.xlu0 %3855 }
0x182d   :  { %v6674_v16 = vpop.xlane.xlu1 %3624 }
0x182e   :  { %v3803_v5 = vrot.slane %v6674_v16, %v6015_v51 }
0x182f   :  { %v3863_v20 = vpop.permute.xlu0 %3862 }
0x1830   :  { %v3822_v3 = vsel %vm1932_vm2, %v3803_v5, %v3821_v58 }
0x1831   :  { %v6683_v43 = vpop.xlane.xlu1 %3630  ;;  %v3823_v55 = vsel %vm1934_vm3, %v3807_v49, %v3822_v3 }
0x1832   :  { %v3811_v23 = vrot.slane %v6683_v43, %v6015_v51 }
0x1833   :  { %v3870_v5 = vpop.permute.xlu0 %3869 }
0x1834   :  { %v3824_v29 = vsel %vm1936_vm4, %v3811_v23, %v3823_v55 }
0x1835   :  { %v6691_v40 = vpop.xlane.xlu1 %3636  ;;  %v3825_v4 = vsel %vm1938_vm5, %v3815_v50, %v3824_v29 }
0x1836   :  { %v3819_v39 = vrot.slane %v6691_v40, %v6015_v51 }
0x1838   :  { %v3826_v47 = vsel %vm1940_vm6, %v3819_v39, %v3825_v4  ;;  %v3877_v4 = vpop.permute.xlu0 %3876 }
0x1839   :  { %v6698_v58 = vsel %vm3779_vm0, %v3826_v47, %v6582_v52  ;;  %v3842_v23 = vpop.permute.xlu1 %3841  ;;  %v3891_v9 = vadd.f32 %v6515_v56, %v3877_v4  ;;  %v3889_v4 = vadd.f32 %v6515_v56, %v3863_v20 }
0x183a   :  { %v3894_v3 = vcombine.high %v6698_v58, %v6698_v58  ;;  %v3901_v49 = vrot.slane %v6698_v58, %v5872_v44  ;;  %v3886_v47 = vadd.f32 %v6515_v56, %v3842_v23 }
0x183c   :  { %v3917_v55 = vrot.slane %v3901_v49, %v5872_v44  ;;  %v3909_v8 = vcombine.high %v3901_v49, %v3901_v49  ;;  %v3908_v11 = vrot.slane %v3894_v3, %v5872_v44  ;;  %v3887_v3 = vadd.f32 %v6515_v56, %v3849_v10 }
0x183e   :  { %v3946_v29 = vrot.slane %v3917_v55, %v5541_v41  ;;  %v3931_v50 = vrot.slane %v3909_v8, %v5872_v44  ;;  %v3924_v52 = vrot.slane %v3908_v11, %v5872_v44  ;;  %v3939_v39 = vcombine.high %v3917_v55, %v3917_v55 }
0x1840   :  { %v6711_v63 = vadd.f32 %v3946_v29, %v3885_v28  ;;  %v3950_v36 = vrot.slane %v3931_v50, %v5541_v41  ;;  %v3940_v13 = vcombine.high %v3924_v52, %v3924_v52  ;;  %v3954_v49 = vrot.slane %v3939_v39, %v5541_v41 }
0x1841   :  { %v3962_v23 = vrot.slane %v3924_v52, %v5541_v41  ;;  %v3910_v28 = vcombine.high %v3908_v11, %v3908_v11  ;;  %v3941_v10 = vcombine.high %v3931_v50, %v3931_v50 }
0x1842   :  { %v3991_v8 = vsel %vm1721_vm14, %v6711_v63, -inf  ;;  %v6719_v0 = vadd.f32 %v3950_v36, %v3886_v47  ;;  %v3970_v55 = vrot.slane %v3940_v13, %v5541_v41  ;;  %v6727_v39 = vadd.f32 %v3954_v49, %v3887_v3 }
0x1843   :  { %3992 = vmax.xlane.f32.xlu0 %v3991_v8  ;;  %v6734_v52 = vadd.f32 %v3962_v23, %v3889_v4  ;;  %v3958_v11 = vrot.slane %v3941_v10, %v5541_v41  ;;  %v3938_v47 = vrot.slane %v3910_v28, %v5872_v44  ;;  %v3888_v49 = vadd.f32 %v6515_v56, %v3856_v45 }
0x1844   :  { %v3994_v29 = vsel %vm1721_vm14, %v6719_v0, -inf  ;;  %v6725_v46 = vadd.f32 %v3970_v55, %v3891_v9  ;;  %v3997_v13 = vsel %vm1721_vm14, %v6727_v39, -inf  ;;  %v3890_v8 = vadd.f32 %v6515_v56, %v3870_v5  ;;  %v3884_v55 = vpop.permute.xlu0 %3883 }
0x1845   :  { %3995 = vmax.xlane.f32.xlu1 %v3994_v29  ;;  %v4003_v50 = vsel %vm1721_vm14, %v6734_v52, -inf  ;;  %v6741_v20 = vadd.f32 %v3958_v11, %v3888_v49  ;;  %v3966_v3 = vrot.slane %v3938_v47, %v5541_v41  ;;  %v3942_v9 = vcombine.high %v3938_v47, %v3938_v47 }
0x1846   :  { %v4009_v36 = vsel %vm1721_vm14, %v6725_v46, -inf  ;;  %v3892_v45 = vadd.f32 %v6515_v56, %v3884_v55 }
0x1847   :  { %4010 = vmax.xlane.f32.xlu0 %v4009_v36  ;;  %v4000_v23 = vsel %vm1721_vm14, %v6741_v20, -inf  ;;  %v3988_v29 = vadd.f32 %v3966_v3, %v3890_v8  ;;  %v3974_v44 = vrot.slane %v3942_v9, %v5541_v41  ;;  %v8044_v36 = vld [vmem:[#allocation10_spill] sm:$0xff] }
0x1849   :  { %3998 = vmax.xlane.f32.xlu1 %v3997_v13  ;;  %v4006_v28 = vsel %vm1721_vm14, %v3988_v29, -inf  ;;  %v6750_v10 = vadd.f32 %v3974_v44, %v3892_v45 }
0x184b   :  { %v4012_v4 = vsel %vm1721_vm14, %v6750_v10, -inf }
0x184d   :  { %4004 = vmax.xlane.f32.xlu1 %v4003_v50 }
0x1851   :  { %4001 = vmax.xlane.f32.xlu1 %v4000_v23 }
0x1855   :  { %4007 = vmax.xlane.f32.xlu1 %v4006_v28 }
0x1859   :  { %4013 = vmax.xlane.f32.xlu1 %v4012_v4 }
0x186a   :  { %v375_v5 = vpop.xlane.xlu1 %374 }
0x186b   :  { %v6755_v13 = vsub.f32 %v375_v5, %v8044_v36 }
0x186d   :  { %vm4151_vm8 = vcmp.gt.f32.partialorder %v6755_v13, 0.0 }
0x186e   :  { %v4152_v41 = vsel %vm4151_vm8, 1, %v7971_v14 }
0x186f   :  { %4154 = vperm.xlu0 %5076, %v4152_v41  }
0x18d0   :  { %v3993_v50 = vpop.xlane.xlu0 %3992 }
0x18d1   :  { %v4168_v55 = vrot.slane %v3993_v50, %v6015_v51  ;;  %vm4015_vm10 = vcmp.eq.f32.partialorder %v6711_v63, %v3993_v50  ;;  %v4833_v63 = vld [vmem:[%s7870_s2 + $0x50] ss:$0 sm:$0xff] }
0x18d2   :  { %v3996_v11 = vpop.xlane.xlu1 %3995 }
0x18d3   :  { %v4172_v3 = vrot.slane %v3996_v11, %v6015_v51  ;;  %vm4016_vm11 = vcmp.eq.f32.partialorder %v6719_v0, %v3996_v11 }
0x18d5   :  { %v4197_v14 = vsel %vm1928_vm15, %v4172_v3, %v4168_v55 }
0x18d6   :  { %v3999_v56 = vpop.xlane.xlu1 %3998 }
0x18d7   :  { %v4176_v9 = vrot.slane %v3999_v56, %v6015_v51  ;;  %vm4017_vm13 = vcmp.eq.f32.partialorder %v6727_v39, %v3999_v56 }
0x18d9   :  { %v4198_v28 = vsel %vm1930_vm1, %v4176_v9, %v4197_v14 }
0x18da   :  { %v4005_v47 = vpop.xlane.xlu1 %4004 }
0x18db   :  { %v4184_v41 = vrot.slane %v4005_v47, %v6015_v51  ;;  %vm4019_vm0 = vcmp.eq.f32.partialorder %v6734_v52, %v4005_v47 }
0x18de   :  { %v4002_v49 = vpop.xlane.xlu1 %4001 }
0x18df   :  { %v4180_v23 = vrot.slane %v4002_v49, %v6015_v51  ;;  %vm4018_vm7 = vcmp.eq.f32.partialorder %v6741_v20, %v4002_v49 }
0x18e1   :  { %v4199_v5 = vsel %vm1932_vm2, %v4180_v23, %v4198_v28  ;;  %v4023_v23 = vsel %vm4015_vm10, %v5263_v15, 8  ;;  %vm4751_vm10 = vcmask 3072  }
0x18e2   :  { %v4008_v8 = vpop.xlane.xlu1 %4007  ;;  %v4200_v3 = vsel %vm1934_vm3, %v4184_v41, %v4199_v5  ;;  %v4031_v28 = vsel %vm1721_vm14, %v4023_v23, 2147483647 }
0x18e3   :  { %vm4020_vm9 = vcmp.eq.f32.partialorder %v3988_v29, %v4008_v8  ;;  %v4188_v36 = vrot.slane %v4008_v8, %v6015_v51  ;;  %v4011_v29 = vpop.xlane.xlu0 %4010  ;;  %v4033_v0 = vshra.s32 %v4031_v28, 16 }
0x18e4   :  { %v4028_v44 = vsel %vm4020_vm9, %v5263_v15, 8  ;;  %v4192_v8 = vrot.slane %v4011_v29, %v6015_v51  ;;  %vm4021_vm8 = vcmp.eq.f32.partialorder %v6725_v46, %v4011_v29 }
0x18e5   :  { %v6766_v45 = vsel %vm1721_vm14, %v4028_v44, 2147483647  ;;  %v4201_v9 = vsel %vm1936_vm4, %v4188_v36, %v4200_v3  ;;  %v4025_v3 = vsel %vm4017_vm13, %v5263_v15, 8 }
0x18e6   :  { %v4108_v4 = vshra.s32 %v6766_v45, 16  ;;  %v4014_v22 = vpop.xlane.xlu1 %4013  ;;  %v4202_v44 = vsel %vm1938_vm5, %v4192_v8, %v4201_v9  ;;  %v4035_v9 = vcvt.s32.f32 %v4033_v0  ;;  %v4061_v23 = vsel %vm1721_vm14, %v4025_v3, 2147483647 }
0x18e7   :  { %v4196_v55 = vrot.slane %v4014_v22, %v6015_v51  ;;  %v4026_v8 = vsel %vm4018_vm7, %v5263_v15, 8  ;;  %v4063_v39 = vshra.s32 %v4061_v23, 16  ;;  %vm4022_vm9 = vcmp.eq.f32.partialorder %v6750_v10, %v4014_v22 }
0x18e8   :  { %v6773_v48 = vcvt.s32.f32 %v4108_v4  ;;  %v4024_v4 = vsel %vm4016_vm11, %v5263_v15, 8  ;;  %v4076_v56 = vsel %vm1721_vm14, %v4026_v8, 2147483647 }
0x18e9   :  { %v4203_v50 = vsel %vm1940_vm6, %v4196_v55, %v4202_v44  ;;  %v4046_v41 = vsel %vm1721_vm14, %v4024_v4, 2147483647  ;;  %v4027_v44 = vsel %vm4019_vm0, %v5263_v15, 8  ;;  %v4078_v20 = vshra.s32 %v4076_v56, 16 }
0x18ea   :  { %4111 = vmin.xlane.f32.xlu0 %v6773_v48  ;;  %v4048_v55 = vshra.s32 %v4046_v41, 16  ;;  %v4091_v49 = vsel %vm1721_vm14, %v4027_v44, 2147483647  ;;  %v4030_v4 = vsel %vm4022_vm9, %v5263_v15, 8  ;;  %v4032_v44 = vand.u32 65535, %v4031_v28 }
0x18eb   :  { %v4093_v52 = vshra.s32 %v4091_v49, 16  ;;  %v4136_v46 = vsel %vm1721_vm14, %v4030_v4, 2147483647  ;;  %v4092_v28 = vand.u32 65535, %v4091_v49  ;;  %v4077_v59 = vand.u32 65535, %v4076_v56 }
0x18ee   :  { %v4155_v14 = vpop.permute.xlu0 %4154 }
0x18ef   :  { %vm4156_vm12 = vcmp.eq.s32.totalorder %v4155_v14, 1  ;;  %v4065_v14 = vcvt.s32.f32 %v4063_v39 }
0x18f0   :  { %v4205_v5 = vsel %vm4156_vm12, %v4203_v50, %v6698_v58  ;;  %v4050_v58 = vcvt.s32.f32 %v4048_v55  ;;  %v4080_v50 = vcvt.s32.f32 %v4078_v20 }
0x18f1   :  { %v4210_v36 = vadd.f32 %v4833_v63, %v4205_v5  ;;  %v4029_v63 = vsel %vm4021_vm8, %v5263_v15, 8  ;;  %v4095_v5 = vcvt.s32.f32 %v4093_v52  ;;  %v4034_v52 = vcvt.s32.f32 %v4032_v44 }
0x18f2   :  { %v4121_v47 = vsel %vm1721_vm14, %v4029_v63, 2147483647  ;;  %v4094_v44 = vcvt.s32.f32 %v4092_v28 }
0x18f3   :  { %v4211_v11 = vsel %vm1721_vm14, %v4210_v36, -inf  ;;  %v4123_v0 = vshra.s32 %v4121_v47, 16 }
0x18f4   :  { %4212 = vmax.xlane.f32.xlu1 %v4211_v11  ;;  %v4138_v11 = vshra.s32 %v4136_v46, 16 }
0x18f5   :  { %v4125_v29 = vcvt.s32.f32 %v4123_v0 }
0x18f6   :  { %v4140_v3 = vcvt.s32.f32 %v4138_v11 }
0x18f8   :  { %4036 = vmin.xlane.f32.xlu1 %v4035_v9 }
0x18fc   :  { %4051 = vmin.xlane.f32.xlu1 %v4050_v58 }
0x1900   :  { %4066 = vmin.xlane.f32.xlu1 %v4065_v14 }
0x1904   :  { %4081 = vmin.xlane.f32.xlu1 %v4080_v50 }
0x1908   :  { %4096 = vmin.xlane.f32.xlu1 %v4095_v5 }
0x190c   :  { %4126 = vmin.xlane.f32.xlu1 %v4125_v29 }
0x1910   :  { %4141 = vmin.xlane.f32.xlu1 %v4140_v3 }
0x1981   :  { %v4213_v55 = vpop.xlane.xlu1 %4212 }
0x1982   :  { %vm4214_vm11 = vcmp.eq.f32.partialorder %v4210_v36, %v4213_v55  ;;  %4752 = vst.msk [vmem:[%s7871_s3] sm:$0xf] %vm4751_vm10, %v4213_v55  ;;  %v4047_v36 = vand.u32 65535, %v4046_v41  ;;  %v4062_v55 = vand.u32 65535, %v4061_v23  ;;  %v4079_v23 = vcvt.s32.f32 %v4077_v59  ;;  %s5206_s3 = smov [#allocation5]  }
0x1983   :  { %v4215_v22 = vsel %vm4214_vm11, %v5263_v15, 8  ;;  %s4763_s6 = sshll.u32 %s5206_s3, 4  ;;  %s4764_s6 = int_to_ptr.vmem [resolvable:$true] %s4763_s6 }
0x1984   :  { %v4216_v10 = vsel %vm1721_vm14, %v4215_v22, 2147483647  ;;  %v4049_v11 = vcvt.s32.f32 %v4047_v36  ;;  %v4107_v36 = vand.u32 65535, %v6766_v45  ;;  %s5176_s7 = scalar_lea.vmem %s4764_s6, 64  ;;  %p5181_p1 = scmp.lt.s32.totalorder %s4764_s6, %s4764_s6 }
0x1985   :  { %v6813_v8 = vpop.xlane.xlu1 %4036  ;;  %v4218_v39 = vshra.s32 %v4216_v10, 16  ;;  %v4217_v28 = vand.u32 65535, %v4216_v10  ;;  %p5177_p0 = scmp.ne.s32.totalorder %s4764_s6, %s5176_s7  ;;  %p5182_p2 = scmp.lt.s32.totalorder %s5176_s7, %s5176_s7 }
0x1986   :  { %vm4038_vm12 = vcmp.eq.f32.partialorder %v4035_v9, %v6813_v8 }
0x1987   :  { %v4220_v20 = vcvt.s32.f32 %v4218_v39  ;;  %v4039_v4 = vsel %vm4038_vm12, %v4034_v52, inf  ;;  %v4064_v39 = vcvt.s32.f32 %v4062_v55  ;;  %v4122_v52 = vand.u32 65535, %v4121_v47  ;;  %p5183_p3 = por %p5182_p2, %p5181_p1 }
0x1989   :  { %4221 = vmin.xlane.f32.xlu1 %v4220_v20  ;;  %v6815_v63 = vpop.xlane.xlu1 %4051  ;;  %v4124_v49 = vcvt.s32.f32 %v4122_v52  ;;  %p5184_p4 = pnand %p5183_p3, %p5177_p0 }
0x198a   :  { %vm4053_vm13 = vcmp.eq.f32.partialorder %v4050_v58, %v6815_v63  ;;  %v6827_v58 = vpop.xlane.xlu0 %4111 }
0x198b   :  { %v4054_v22 = vsel %vm4053_vm13, %v4049_v11, inf  ;;  %vm4113_vm9 = vcmp.eq.f32.partialorder %v6773_v48, %v6827_v58  ;;  %v4137_v11 = vand.u32 65535, %v4136_v46  ;;  %v4219_v48 = vcvt.s32.f32 %v4217_v28 }
0x198c   :  { %vm4231_vm13 = vcmask 7168  }
0x198d   :  { %4040 = vmin.xlane.f32.xlu1 %v4039_v4  ;;  %v6818_v0 = vpop.xlane.xlu1 %4066  ;;  %v4139_v45 = vcvt.s32.f32 %v4137_v11  ;;  %v4233_v10 = vsel %vm4231_vm13, %v5855_v38, 0.0  ;;  %v4243_v38 = vsel %vm4231_vm13, %v6532_v61, 0.0 }
0x198e   :  { %vm4068_vm7 = vcmp.eq.f32.partialorder %v4065_v14, %v6818_v0 }
0x198f   :  { %v4069_v9 = vsel %vm4068_vm7, %v4064_v39, inf  ;;  %vm3638_vm7 = vcmp.eq.f32.partialorder %v6595_v42, %v6658_v24 }
0x1991   :  { %4055 = vmin.xlane.f32.xlu1 %v4054_v22  ;;  %v6821_v25 = vpop.xlane.xlu1 %4081  ;;  %v8045_v22 = vld [vmem:[#allocation9_spill] sm:$0xff] }
0x1992   :  { %vm4083_vm0 = vcmp.eq.f32.partialorder %v4080_v50, %v6821_v25  ;;  %v4109_v50 = vcvt.s32.f32 %v4107_v36 }
0x1993   :  { %v4084_v14 = vsel %vm4083_vm0, %v4079_v23, inf  ;;  %vm3639_vm0 = vcmp.eq.f32.partialorder %v6603_v33, %v6660_v35 }
0x1995   :  { %4070 = vmin.xlane.f32.xlu1 %v4069_v9  ;;  %v6824_v41 = vpop.xlane.xlu1 %4096 }
0x1996   :  { %vm4098_vm8 = vcmp.eq.f32.partialorder %v4095_v5, %v6824_v41  ;;  %v4114_v5 = vsel %vm4113_vm9, %v4109_v50, inf  ;;  %vm3640_vm9 = vcmp.eq.f32.partialorder %v6611_v57, %v6664_v27 }
0x1997   :  { %v4099_v4 = vsel %vm4098_vm8, %v4094_v44, inf }
0x1998   :  { %4100 = vmin.xlane.f32.xlu0 %v4099_v4  ;;  %v8046_v4 = vld [vmem:[#allocation8_spill] sm:$0xff] }
0x1999   :  { %4085 = vmin.xlane.f32.xlu1 %v4084_v14  ;;  %v6831_v56 = vpop.xlane.xlu1 %4126 }
0x199a   :  { %vm4128_vm10 = vcmp.eq.f32.partialorder %v4125_v29, %v6831_v56 }
0x199b   :  { %v4129_v47 = vsel %vm4128_vm10, %v4124_v49, inf  ;;  %vm3641_vm10 = vcmp.eq.f32.partialorder %v6626_v17, %v6674_v16 }
0x199c   :  { %4130 = vmin.xlane.f32.xlu0 %v4129_v47  ;;  %v4237_v47 = vsel %vm4231_vm13, %v6120_v1, 0.0  ;;  %v4058_v1 = vcvt.f32.s32 %v6815_v63  ;;  %v4103_v63 = vcvt.f32.s32 %v6824_v41  ;;  %v3649_v27 = vsel %vm3641_vm10, %v5263_v15, 8 }
0x199d   :  { %v6836_v59 = vpop.xlane.xlu1 %4141  ;;  %4115 = vmin.xlane.f32.xlu1 %v4114_v5  ;;  %v6925_v17 = vsel %vm1721_vm14, %v3649_v27, 2147483647 }
0x199e   :  { %vm4143_vm11 = vcmp.eq.f32.partialorder %v4140_v3, %v6836_v59 }
0x199f   :  { %v4144_v55 = vsel %vm4143_vm11, %v4139_v45, inf  ;;  %v4239_v45 = vsel %vm4231_vm13, %v6240_v2, 0.0  ;;  %v4043_v2 = vcvt.f32.s32 %v6813_v8  ;;  %vm3642_vm11 = vcmp.eq.f32.partialorder %v6618_v26, %v6666_v21 }
0x19a0   :  { %v3650_v16 = vsel %vm3642_vm11, %v5263_v15, 8  ;;  %vm3262_vm11 = vcmp.eq.f32.partialorder %v6456_v62, %v6540_v6 }
0x19a1   :  { %4145 = vmin.xlane.f32.xlu1 %v4144_v55  ;;  %v6935_v26 = vsel %vm1721_vm14, %v3650_v16, 2147483647 }
0x19a5   :  { %353 = vadd.xlane.f32.xlu1 %v8045_v22  ;;  %v4241_v22 = vsel %vm4231_vm13, %v6498_v53, 0.0 }
0x1a16   :  { %v6840_v39 = vpop.xlane.xlu1 %4221 }
0x1a17   :  { %vm4223_vm12 = vcmp.eq.f32.partialorder %v4220_v20, %v6840_v39  ;;  %v4235_v20 = vsel %vm4231_vm13, %v5884_v18, 0.0  ;;  %v4245_v18 = vsel %vm4231_vm13, %v6755_v13, 0.0  ;;  %v4044_v13 = vshll.u32 %v4043_v2, 16 }
0x1a18   :  { %v4224_v46 = vsel %vm4223_vm12, %v4219_v48, inf  ;;  %vm3643_vm12 = vcmp.eq.f32.partialorder %v6633_v19, %v6683_v43 }
0x1a19   :  { %4225 = vmin.xlane.f32.xlu0 %v4224_v46  ;;  %v3651_v21 = vsel %vm3643_vm12, %v5263_v15, 8 }
0x1a1a   :  { %v4041_v29 = vpop.xlane.xlu1 %4040  ;;  %v3729_v19 = vsel %vm1721_vm14, %v3651_v21, 2147483647  ;;  %v8048_v21 = vld [vmem:[#allocation75_spill] sm:$0xff] }
0x1a1e   :  { %v4056_v9 = vpop.xlane.xlu1 %4055 }
0x1a22   :  { %v4071_v44 = vpop.xlane.xlu1 %4070 }
0x1a23   :  { %v4072_v53 = vcvt.f32.s32 %v4071_v44 }
0x1a26   :  { %v4086_v52 = vpop.xlane.xlu1 %4085 }
0x1a27   :  { %v4087_v61 = vcvt.f32.s32 %v4086_v52  ;;  %v4104_v52 = vshll.u32 %v4103_v63, 16  ;;  %v3646_v63 = vsel %vm3638_vm7, %v5263_v15, 8 }
0x1a2a   :  { %v4116_v23 = vpop.xlane.xlu1 %4115 }
0x1a2b   :  { %v4117_v8 = vcvt.f32.s32 %v4116_v23 }
0x1a2e   :  { %v4146_v36 = vpop.xlane.xlu1 %4145 }
0x1a32   :  { %v354_v3 = vpop.xlane.xlu1 %353 }
0x1a33   :  { %v376_v14 = vsub.f32 %v354_v3, %v8046_v4  ;;  %v4073_v3 = vcvt.f32.s32 %v6818_v0  ;;  %v4088_v4 = vcvt.f32.s32 %v6821_v25 }
0x1a35   :  { %v4232_v49 = vsel %vm4231_vm13, %v376_v14, 0.0  ;;  %v4057_v14 = vcvt.f32.s32 %v4056_v9  ;;  %v4148_v9 = vcvt.f32.s32 %v6836_v59  ;;  %vm3645_vm13 = vcmp.eq.f32.partialorder %v6639_v60, %v6691_v40 }
0x1a36   :  { %v4234_v11 = vadd.f32 %v4233_v10, %v4232_v49  ;;  %v4059_v10 = vshll.u32 %v4058_v1, 16  ;;  %v4042_v49 = vcvt.f32.s32 %v4041_v29  ;;  %v3653_v43 = vsel %vm3645_vm13, %v5263_v15, 8 }
0x1a37   :  { %vm3263_vm13 = vcmp.eq.f32.partialorder %v6460_v7, %v6542_v12  ;;  %v8047_v12 = vld [vmem:[#allocation79_spill] sm:$0xff] }
0x1a38   :  { %v4236_v50 = vadd.f32 %v4235_v20, %v4234_v11  ;;  %v4101_v11 = vpop.xlane.xlu0 %4100  ;;  %v4074_v20 = vshll.u32 %v4073_v3, 16  ;;  %v4045_v0 = vadd.s32 %v4044_v13, %v4042_v49  ;;  %v4149_v3 = vshll.u32 %v4148_v9, 16 }
0x1a39   :  { %v3271_v27 = vsel %vm3263_vm13, %v5263_v15, 8 }
0x1a3a   :  { %v4238_v5 = vadd.f32 %v4237_v47, %v4236_v50  ;;  %v4118_v50 = vcvt.f32.s32 %v6827_v58  ;;  %v4089_v47 = vshll.u32 %v4088_v4, 16 }
0x1a3c   :  { %v4240_v55 = vadd.f32 %v4239_v45, %v4238_v5  ;;  %v4060_v5 = vadd.s32 %v4059_v10, %v4057_v14  ;;  %v4075_v45 = vadd.s32 %v4074_v20, %v4072_v53  ;;  %v4119_v25 = vshll.u32 %v4118_v50, 16  ;;  %v4131_v44 = vpop.xlane.xlu0 %4130 }
0x1a3d   :  { %v4132_v23 = vcvt.f32.s32 %v4131_v44  ;;  %v4228_v14 = vcvt.f32.s32 %v6840_v39  ;;  %v3648_v44 = vsel %vm3640_vm9, %v5263_v15, 8  ;;  %vm3261_vm9 = vcmp.eq.f32.partialorder %v6519_v34, %v6548_v32 }
0x1a3e   :  { %v4242_v28 = vadd.f32 %v4241_v22, %v4240_v55  ;;  %v4090_v55 = vadd.s32 %v4089_v47, %v4087_v61  ;;  %v4102_v22 = vcvt.f32.s32 %v4101_v11  ;;  %v4256_v29 = vrot.slane %v4060_v5, %v6015_v51 }
0x1a3f   :  { %v4260_v58 = vrot.slane %v4075_v45, %v6015_v51  ;;  %v4229_v20 = vshll.u32 %v4228_v14, 16  ;;  %v6915_v57 = vsel %vm1721_vm14, %v3648_v44, 2147483647  ;;  %v3270_v34 = vsel %vm3262_vm11, %v5263_v15, 8 }
0x1a40   :  { %v4244_v48 = vadd.f32 %v4243_v38, %v4242_v28  ;;  %v4133_v28 = vcvt.f32.s32 %v6831_v56  ;;  %v4252_v38 = vrot.slane %v4045_v0, %v6015_v51  ;;  %v4264_v41 = vrot.slane %v4090_v55, %v6015_v51 }
0x1a41   :  { %v4105_v1 = vadd.s32 %v4104_v52, %v4102_v22  ;;  %v6899_v55 = vsel %vm1721_vm14, %v3646_v63, 2147483647  ;;  %v7003_v6 = vsel %vm1721_vm14, %v3270_v34, 2147483647 }
0x1a42   :  { %v6859_v46 = vadd.f32 %v4245_v18, %v4244_v48  ;;  %v4120_v48 = vadd.s32 %v4119_v25, %v4117_v8  ;;  %v4147_v18 = vcvt.f32.s32 %v4146_v36  ;;  %v4281_v2 = vsel %vm1928_vm15, %v4256_v29, %v4252_v38 }
0x1a43   :  { %v4134_v59 = vshll.u32 %v4133_v28, 16  ;;  %v4282_v4 = vsel %vm1930_vm1, %v4260_v58, %v4281_v2  ;;  %v4268_v49 = vrot.slane %v4105_v1, %v6015_v51  ;;  %v3647_v8 = vsel %vm3639_vm0, %v5263_v15, 8 }
0x1a44   :  { %v4283_v56 = vsel %vm1932_vm2, %v4264_v41, %v4282_v4  ;;  %v4272_v53 = vrot.slane %v4120_v48, %v6015_v51  ;;  %v4150_v10 = vadd.s32 %v4149_v3, %v4147_v18  ;;  %v3656_v9 = vshra.s32 %v6899_v55, 16 }
0x1a45   :  { %v4135_v11 = vadd.s32 %v4134_v59, %v4132_v23  ;;  %v4284_v36 = vsel %vm1934_vm3, %v4268_v49, %v4283_v56  ;;  %v6906_v29 = vsel %vm1721_vm14, %v3647_v8, 2147483647  ;;  %v3686_v38 = vshra.s32 %v6915_v57, 16 }
0x1a46   :  { %v4285_v50 = vsel %vm1936_vm4, %v4272_v53, %v4284_v36  ;;  %v4280_v13 = vrot.slane %v4150_v10, %v6015_v51  ;;  %v6911_v52 = vcvt.s32.f32 %v3656_v9  ;;  %v3671_v28 = vshra.s32 %v6906_v29, 16 }
0x1a47   :  { %v4276_v47 = vrot.slane %v4135_v11, %v6015_v51  ;;  %v6931_v41 = vcvt.s32.f32 %v3686_v38  ;;  %v3701_v48 = vshra.s32 %v6925_v17, 16  ;;  %v3716_v1 = vshra.s32 %v6935_v26, 16 }
0x1a48   :  { %v6921_v58 = vcvt.s32.f32 %v3671_v28  ;;  %v3731_v3 = vshra.s32 %v3729_v19, 16  ;;  %v3759_v2 = vsel %vm1721_vm14, %v3653_v43, 2147483647  ;;  %v5067_v40 = vtrunc.f32 %v6859_v46  ;;  %v8049_v43 = vld [vmem:[#allocation82_spill] sm:$0xff] }
0x1a49   :  { %v4286_v45 = vsel %vm1938_vm5, %v4276_v47, %v4285_v50  ;;  %v6941_v18 = vcvt.s32.f32 %v3701_v48  ;;  %v6947_v23 = vcvt.s32.f32 %v3716_v1  ;;  %v3761_v4 = vshra.s32 %v3759_v2, 16 }
0x1a4a   :  { %v6894_v42 = vsel %vm1940_vm6, %v4280_v13, %v4286_v45  ;;  %v3733_v59 = vcvt.s32.f32 %v3731_v3  ;;  %v6952_v14 = vcvt.f32.s32 %v5067_v40  ;;  %v3294_v16 = vshra.s32 %v7003_v6, 16  ;;  %v8050_v3 = vld [vmem:[#allocation78_spill] sm:$0xff]  ;;  %v8051_v40 = vld [vmem:[#allocation81_spill] sm:$0xff] }
0x1a4b   :  { %v3763_v60 = vcvt.s32.f32 %v3761_v4  ;;  %v7012_v48 = vsel %vm1721_vm14, %v3271_v27, 2147483647 }
0x1a4c   :  { %v6955_v49 = vadd.s32 4294967295, %v6952_v14  ;;  %v7018_v1 = vcvt.s32.f32 %v3294_v16 }
0x1a4e   :  { %vm4304_vm7 = vcmp.gt.s32.totalorder %v6955_v49, 7  ;;  %vm4303_vm0 = vcmp.eq.s32.totalorder %v6955_v49, 7 }
0x1aa6   :  { %v4226_v61 = vpop.xlane.xlu0 %4225 }
0x1aa7   :  { %v4227_v39 = vcvt.f32.s32 %v4226_v61 }
0x1aa9   :  { %v6885_v5 = vadd.s32 %v4229_v20, %v4227_v39 }
0x1aab   :  { %vm4248_vm8 = vcmp.eq.s32.totalorder %v5263_v15, %v6885_v5 }
0x1aac   :  { %v4288_v24 = vsel %vm4248_vm8, %v6894_v42, 0  ;;  %vm3644_vm8 = vcmp.eq.f32.partialorder %v6609_v37, %v6662_v54 }
0x1aad   :  { %v4289_v0 = vsel %vm1721_vm14, %v4288_v24, 0  ;;  %v3652_v63 = vsel %vm3644_vm8, %v5263_v15, 8  ;;  %vm3267_vm8 = vcmp.eq.f32.partialorder %v8050_v3, %v8049_v43  ;;  %v3715_v43 = vand.u32 65535, %v6935_v26 }
0x1aae   :  { %v4291_v22 = vshrl.u32 %v4289_v0, 16  ;;  %v4290_v25 = vand.u32 65535, %v4289_v0  ;;  %v6978_v24 = vsel %vm1721_vm14, %v3652_v63, 2147483647 }
0x1aaf   :  { %v3746_v0 = vshra.s32 %v6978_v24, 16 }
0x1ab0   :  { %v4293_v33 = vcvt.s32.f32 %v4291_v22  ;;  %v4292_v35 = vcvt.s32.f32 %v4290_v25  ;;  %v3730_v22 = vand.u32 65535, %v3729_v19  ;;  %v3309_v19 = vshra.s32 %v7012_v48, 16 }
0x1ab1   :  { %v6985_v25 = vcvt.s32.f32 %v3746_v0 }
0x1ab2   :  { %4296 = vadd.xlane.f32.xlu0 %v4293_v33  ;;  %4294 = vadd.xlane.f32.xlu1 %v4292_v35  ;;  %v3269_v33 = vsel %vm3261_vm9, %v5263_v15, 8  ;;  %v3732_v54 = vcvt.s32.f32 %v3730_v22  ;;  %v3760_v35 = vand.u32 65535, %v3759_v2  ;;  %v7028_v2 = vcvt.s32.f32 %v3309_v19 }
0x1ab3   :  { %v6995_v44 = vsel %vm1721_vm14, %v3269_v33, 2147483647 }
0x1ab4   :  { %v3762_v32 = vcvt.s32.f32 %v3760_v35  ;;  %v3279_v28 = vshra.s32 %v6995_v44, 16 }
0x1ab6   :  { %3659 = vmin.xlane.f32.xlu1 %v6911_v52  ;;  %v7008_v38 = vcvt.s32.f32 %v3279_v28 }
0x1aba   :  { %3674 = vmin.xlane.f32.xlu1 %v6921_v58 }
0x1abe   :  { %3689 = vmin.xlane.f32.xlu1 %v6931_v41 }
0x1ac2   :  { %3704 = vmin.xlane.f32.xlu1 %v6941_v18 }
0x1ac6   :  { %3719 = vmin.xlane.f32.xlu1 %v6947_v23 }
0x1aca   :  { %3734 = vmin.xlane.f32.xlu1 %v3733_v59 }
0x1ace   :  { %3764 = vmin.xlane.f32.xlu1 %v3763_v60 }
0x1b3f   :  { %v4297_v56 = vpop.xlane.xlu0 %4296  ;;  %v4295_v53 = vpop.xlane.xlu1 %4294 }
0x1b40   :  { %v4299_v10 = vcvt.f32.s32 %v4297_v56  ;;  %v4298_v36 = vcvt.f32.s32 %v4295_v53  ;;  %v8052_v56 = vld [vmem:[#allocation77_spill] sm:$0xff] }
0x1b41   :  { %vm3268_vm9 = vcmp.eq.f32.partialorder %v8052_v56, %v8051_v40 }
0x1b42   :  { %v4300_v11 = vshll.u32 %v4299_v10, 16 }
0x1b43   :  { %v6957_v20 = vpop.xlane.xlu1 %3659 }
0x1b44   :  { %v4301_v61 = vadd.s32 %v4300_v11, %v4298_v36  ;;  %v3276_v36 = vsel %vm3268_vm9, %v5263_v15, 8  ;;  %vm3661_vm11 = vcmp.eq.f32.partialorder %v6911_v52, %v6957_v20  ;;  %vm4333_vm9 = vcmp.gt.s32.totalorder %v6955_v49, 6 }
0x1b45   :  { %v7050_v63 = vsel %vm1721_vm14, %v3276_v36, 2147483647 }
0x1b46   :  { %v4305_v50 = vsel %vm4304_vm7, %v4301_v61, %v6885_v5  ;;  %vm3264_vm7 = vcmp.eq.f32.partialorder %v6473_v30, %v6552_v31  ;;  %v3384_v22 = vshra.s32 %v7050_v63, 16 }
0x1b47   :  { %v6963_v46 = vsel %vm4303_vm0, %v6885_v5, %v4305_v50  ;;  %v6966_v13 = vpop.xlane.xlu1 %3674  ;;  %v3272_v7 = vsel %vm3264_vm7, %v5263_v15, 8  ;;  %vm3265_vm0 = vcmp.eq.f32.partialorder %v8048_v21, %v8047_v12  ;;  %v3685_v21 = vand.u32 65535, %v6915_v57 }
0x1b48   :  { %4315 = vperm.xlu0 %5076, %v6963_v46   ;;  %v7022_v30 = vsel %vm1721_vm14, %v3272_v7, 2147483647  ;;  %v3273_v31 = vsel %vm3265_vm0, %v5263_v15, 8  ;;  %v7057_v33 = vcvt.s32.f32 %v3384_v22  ;;  %v3670_v7 = vand.u32 65535, %v6906_v29 }
0x1b49   :  { %v7032_v4 = vsel %vm1721_vm14, %v3273_v31, 2147483647  ;;  %v3700_v31 = vand.u32 65535, %v6925_v17  ;;  %v3717_v57 = vcvt.s32.f32 %v3715_v43 }
0x1b4a   :  { %v3339_v10 = vshra.s32 %v7032_v4, 16 }
0x1b4b   :  { %v6968_v39 = vpop.xlane.xlu1 %3689  ;;  %v3702_v29 = vcvt.s32.f32 %v3700_v31 }
0x1b4c   :  { %v7046_v61 = vcvt.s32.f32 %v3339_v10  ;;  %vm3691_vm13 = vcmp.eq.f32.partialorder %v6931_v41, %v6968_v39  ;;  %v3745_v41 = vand.u32 65535, %v6978_v24 }
0x1b4e   :  { %v3747_v17 = vcvt.s32.f32 %v3745_v41 }
0x1b4f   :  { %v6970_v47 = vpop.xlane.xlu1 %3704 }
0x1b50   :  { %vm3706_vm7 = vcmp.eq.f32.partialorder %v6941_v18, %v6970_v47 }
0x1b53   :  { %v6975_v45 = vpop.xlane.xlu1 %3719 }
0x1b54   :  { %vm3721_vm0 = vcmp.eq.f32.partialorder %v6947_v23, %v6975_v45 }
0x1b55   :  { %v3722_v3 = vsel %vm3721_vm0, %v3717_v57, inf }
0x1b57   :  { %v6981_v8 = vpop.xlane.xlu1 %3734 }
0x1b58   :  { %vm3736_vm10 = vcmp.eq.f32.partialorder %v3733_v59, %v6981_v8  ;;  %v3324_v59 = vshra.s32 %v7022_v30, 16 }
0x1b59   :  { %v3737_v9 = vsel %vm3736_vm10, %v3732_v54, inf }
0x1b5a   :  { %v7038_v53 = vcvt.s32.f32 %v3324_v59 }
0x1b5b   :  { %v6992_v37 = vpop.xlane.xlu1 %3764 }
0x1b5c   :  { %vm3766_vm12 = vcmp.eq.f32.partialorder %v3763_v60, %v6992_v37  ;;  %v3275_v60 = vsel %vm3267_vm8, %v5263_v15, 8 }
0x1b5d   :  { %v3767_v62 = vsel %vm3766_vm12, %v3762_v32, inf  ;;  %v7042_v11 = vsel %vm1721_vm14, %v3275_v60, 2147483647  ;;  %vm3676_vm12 = vcmp.eq.f32.partialorder %v6921_v58, %v6966_v13  ;;  %v3707_v58 = vsel %vm3706_vm7, %v3702_v29, inf }
0x1b5e   :  { %v3369_v50 = vshra.s32 %v7042_v11, 16 }
0x1b60   :  { %v7053_v0 = vcvt.s32.f32 %v3369_v50  ;;  %v8054_v50 = vld [vmem:[#allocation76_spill] sm:$0xff] }
0x1b67   :  { %3749 = vmin.xlane.f32.xlu0 %v6985_v25 }
0x1b6b   :  { %3738 = vmin.xlane.f32.xlu0 %v3737_v9 }
0x1b6f   :  { %3768 = vmin.xlane.f32.xlu0 %v3767_v62  ;;  %v3655_v62 = vand.u32 65535, %v6899_v55  ;;  %v3687_v55 = vcvt.s32.f32 %v3685_v21 }
0x1b71   :  { %v3657_v16 = vcvt.s32.f32 %v3655_v62  ;;  %v3692_v52 = vsel %vm3691_vm13, %v3687_v55, inf }
0x1b73   :  { %3282 = vmin.xlane.f32.xlu0 %v7008_v38  ;;  %v3662_v12 = vsel %vm3661_vm11, %v3657_v16, inf  ;;  %v3696_v16 = vcvt.f32.s32 %v6968_v39 }
0x1b75   :  { %v3697_v43 = vshll.u32 %v3696_v16, 16 }
0x1b77   :  { %3297 = vmin.xlane.f32.xlu0 %v7018_v1 }
0x1b7b   :  { %3312 = vmin.xlane.f32.xlu0 %v7028_v2 }
0x1b7f   :  { %3327 = vmin.xlane.f32.xlu0 %v7038_v53 }
0x1b83   :  { %3342 = vmin.xlane.f32.xlu0 %v7046_v61 }
0x1b87   :  { %3372 = vmin.xlane.f32.xlu0 %v7053_v0 }
0x1b8b   :  { %3387 = vmin.xlane.f32.xlu0 %v7057_v33 }
0x1bc7   :  { %v4316_v54 = vpop.permute.xlu0 %4315 }
0x1bc8   :  { %vm4317_vm10 = vcmp.eq.s32.totalorder %v5263_v15, %v4316_v54 }
0x1bc9   :  { %v4318_v35 = vsel %vm4317_vm10, %v6894_v42, 0  ;;  %v3672_v42 = vcvt.s32.f32 %v3670_v7  ;;  %vm4332_vm10 = vcmp.eq.s32.totalorder %v6955_v49, 6  ;;  %v3666_v7 = vcvt.f32.s32 %v6957_v20 }
0x1bca   :  { %v4319_v9 = vsel %vm1721_vm14, %v4318_v35, 0 }
0x1bcb   :  { %v4321_v34 = vshrl.u32 %v4319_v9, 16  ;;  %v4320_v28 = vand.u32 65535, %v4319_v9  ;;  %v3677_v19 = vsel %vm3676_vm12, %v3672_v42, inf }
0x1bcd   :  { %v4323_v32 = vcvt.s32.f32 %v4321_v34  ;;  %v4322_v27 = vcvt.s32.f32 %v4320_v28 }
0x1bcf   :  { %4326 = vadd.xlane.f32.xlu1 %v4323_v32 }
0x1bd3   :  { %4324 = vadd.xlane.f32.xlu1 %v4322_v27  ;;  %v3681_v27 = vcvt.f32.s32 %v6966_v13 }
0x1bd5   :  { %v3682_v31 = vshll.u32 %v3681_v27, 16 }
0x1bd7   :  { %3663 = vmin.xlane.f32.xlu1 %v3662_v12  ;;  %v3711_v12 = vcvt.f32.s32 %v6970_v47  ;;  %v3741_v47 = vcvt.f32.s32 %v6981_v8 }
0x1bd9   :  { %v3712_v41 = vshll.u32 %v3711_v12, 16 }
0x1bdb   :  { %3678 = vmin.xlane.f32.xlu1 %v3677_v19  ;;  %v3726_v19 = vcvt.f32.s32 %v6975_v45 }
0x1bdd   :  { %v3727_v39 = vshll.u32 %v3726_v19, 16 }
0x1bdf   :  { %3693 = vmin.xlane.f32.xlu1 %v3692_v52 }
0x1be3   :  { %3708 = vmin.xlane.f32.xlu1 %v3707_v58 }
0x1be7   :  { %3723 = vmin.xlane.f32.xlu1 %v3722_v3  ;;  %v3667_v3 = vshll.u32 %v3666_v7, 16 }
0x1bf4   :  { %v3750_v59 = vpop.xlane.xlu0 %3749 }
0x1bf5   :  { %vm3751_vm8 = vcmp.eq.f32.partialorder %v6985_v25, %v3750_v59  ;;  %v8053_v25 = vld [vmem:[#allocation80_spill] sm:$0xff] }
0x1bf6   :  { %v3752_v60 = vsel %vm3751_vm8, %v3747_v17, inf  ;;  %vm3266_vm11 = vcmp.eq.f32.partialorder %v8054_v50, %v8053_v25  ;;  %v3742_v50 = vshll.u32 %v3741_v47, 16 }
0x1bf7   :  { %3753 = vmin.xlane.f32.xlu1 %v3752_v60  ;;  %v3274_v22 = vsel %vm3266_vm11, %v5263_v15, 8  ;;  %v3756_v60 = vcvt.f32.s32 %v3750_v59 }
0x1bf8   :  { %v7091_v54 = vsel %vm1721_vm14, %v3274_v22, 2147483647  ;;  %v3739_v58 = vpop.xlane.xlu0 %3738  ;;  %v3771_v22 = vcvt.f32.s32 %v6992_v37 }
0x1bf9   :  { %v3354_v35 = vshra.s32 %v7091_v54, 16 }
0x1bfa   :  { %v3772_v16 = vshll.u32 %v3771_v22, 16 }
0x1bfb   :  { %v7094_v9 = vcvt.s32.f32 %v3354_v35 }
0x1c5c   :  { %v4327_v18 = vpop.xlane.xlu1 %4326 }
0x1c5d   :  { %v4329_v40 = vcvt.f32.s32 %v4327_v18 }
0x1c5f   :  { %v4330_v26 = vshll.u32 %v4329_v40, 16 }
0x1c60   :  { %v4325_v56 = vpop.xlane.xlu1 %4324 }
0x1c61   :  { %v4328_v10 = vcvt.f32.s32 %v4325_v56 }
0x1c63   :  { %v4331_v36 = vadd.s32 %v4330_v26, %v4328_v10  ;;  %v3740_v26 = vcvt.f32.s32 %v3739_v58 }
0x1c64   :  { %v3664_v34 = vpop.xlane.xlu1 %3663 }
0x1c65   :  { %v4334_v23 = vsel %vm4333_vm9, %v4331_v36, %v6963_v46  ;;  %v3665_v52 = vcvt.f32.s32 %v3664_v34  ;;  %v3757_v36 = vshll.u32 %v3756_v60, 16 }
0x1c66   :  { %v7084_v24 = vsel %vm4332_vm10, %v6885_v5, %v4334_v23  ;;  %v3769_v23 = vpop.xlane.xlu0 %3768 }
0x1c67   :  { %4344 = vperm.xlu1 %5077, %v7084_v24   ;;  %v3668_v18 = vadd.s32 %v3667_v3, %v3665_v52 }
0x1c68   :  { %v3679_v32 = vpop.xlane.xlu1 %3678 }
0x1c69   :  { %v3680_v42 = vcvt.f32.s32 %v3679_v32  ;;  %v4350_v35 = vrot.slane %v3668_v18, %v6015_v51  ;;  %v3743_v32 = vadd.s32 %v3742_v50, %v3740_v26  ;;  %v3293_v18 = vand.u32 65535, %v7003_v6 }
0x1c6a   :  { %v7118_v52 = vpop.xlane.xlu0 %3282 }
0x1c6b   :  { %v3683_v13 = vadd.s32 %v3682_v31, %v3680_v42  ;;  %v4370_v42 = vrot.slane %v3743_v32, %v6015_v51  ;;  %vm3284_vm13 = vcmp.eq.f32.partialorder %v7008_v38, %v7118_v52  ;;  %v3323_v38 = vand.u32 65535, %v7022_v30 }
0x1c6c   :  { %v3694_v28 = vpop.xlane.xlu1 %3693  ;;  %v3368_v30 = vand.u32 65535, %v7042_v11 }
0x1c6d   :  { %v3695_v55 = vcvt.f32.s32 %v3694_v28  ;;  %v4354_v10 = vrot.slane %v3683_v13, %v6015_v51  ;;  %v3770_v28 = vcvt.f32.s32 %v3769_v23  ;;  %v3338_v23 = vand.u32 65535, %v7032_v4  ;;  %v8056_v4 = vld [vmem:[#allocation59_spill] sm:$0xff] }
0x1c6e   :  { %v3370_v22 = vcvt.s32.f32 %v3368_v30 }
0x1c6f   :  { %v3698_v20 = vadd.s32 %v3697_v43, %v3695_v55 }
0x1c70   :  { %v3709_v62 = vpop.xlane.xlu1 %3708 }
0x1c71   :  { %v3710_v29 = vcvt.f32.s32 %v3709_v62  ;;  %v4358_v25 = vrot.slane %v3698_v20, %v6015_v51  ;;  %v4379_v62 = vsel %vm1928_vm15, %v4354_v10, %v4350_v35  ;;  %v8055_v35 = vld [vmem:[#allocation68_spill] sm:$0xff] }
0x1c72   :  { %vm2884_vm11 = vcmp.eq.f32.partialorder %v8056_v4, %v8055_v35 }
0x1c73   :  { %v3713_v40 = vadd.s32 %v3712_v41, %v3710_v29  ;;  %v4380_v27 = vsel %vm1930_vm1, %v4358_v25, %v4379_v62  ;;  %v7123_v41 = vpop.xlane.xlu0 %3297 }
0x1c74   :  { %v3724_v21 = vpop.xlane.xlu1 %3723  ;;  %vm3299_vm7 = vcmp.eq.f32.partialorder %v7018_v1, %v7123_v41  ;;  %v3325_v1 = vcvt.s32.f32 %v3323_v38 }
0x1c75   :  { %v3725_v57 = vcvt.f32.s32 %v3724_v21  ;;  %v4362_v59 = vrot.slane %v3713_v40, %v6015_v51  ;;  %v3773_v21 = vadd.s32 %v3772_v16, %v3770_v28  ;;  %v8059_v16 = vld [vmem:[#allocation69_spill] sm:$0xff] }
0x1c77   :  { %v3728_v56 = vadd.s32 %v3727_v39, %v3725_v57  ;;  %v4381_v7 = vsel %vm1932_vm2, %v4362_v59, %v4380_v27  ;;  %v4378_v31 = vrot.slane %v3773_v21, %v6015_v51  ;;  %v3278_v39 = vand.u32 65535, %v6995_v44  ;;  %v7126_v20 = vpop.xlane.xlu0 %3312  ;;  %v8061_v21 = vld [vmem:[#allocation72_spill] sm:$0xff] }
0x1c78   :  { %v3308_v44 = vand.u32 65535, %v7012_v48  ;;  %vm3314_vm0 = vcmp.eq.f32.partialorder %v7028_v2, %v7126_v20  ;;  %v3340_v2 = vcvt.s32.f32 %v3338_v23  ;;  %v3353_v59 = vand.u32 65535, %v7091_v54 }
0x1c79   :  { %v4366_v8 = vrot.slane %v3728_v56, %v6015_v51  ;;  %v3280_v47 = vcvt.s32.f32 %v3278_v39  ;;  %v8065_v39 = vld [vmem:[#allocation73_spill] sm:$0xff] }
0x1c7a   :  { %v3310_v10 = vcvt.s32.f32 %v3308_v44  ;;  %v3355_v28 = vcvt.s32.f32 %v3353_v59  ;;  %v8067_v44 = vld [vmem:[#allocation74_spill] sm:$0xff] }
0x1c7b   :  { %v4382_v37 = vsel %vm1934_vm3, %v4366_v8, %v4381_v7  ;;  %v3285_v40 = vsel %vm3284_vm13, %v3280_v47, inf  ;;  %v7133_v56 = vpop.xlane.xlu0 %3327  ;;  %v8057_v8 = vld [vmem:[#allocation67_spill] sm:$0xff]  ;;  %v8060_v7 = vld [vmem:[#allocation62_spill] sm:$0xff] }
0x1c7c   :  { %v4383_v19 = vsel %vm1936_vm4, %v4370_v42, %v4382_v37  ;;  %v3315_v6 = vsel %vm3314_vm0, %v3310_v10, inf  ;;  %vm3329_vm8 = vcmp.eq.f32.partialorder %v7038_v53, %v7133_v56  ;;  %vm2886_vm0 = vcmp.eq.f32.partialorder %v8060_v7, %v8059_v16  ;;  %v8069_v16 = vld [vmem:[#allocation71_spill] sm:$0xff]  ;;  %v8070_v7 = vld [vmem:[#allocation61_spill] sm:$0xff] }
0x1c7d   :  { %v3330_v25 = vsel %vm3329_vm8, %v3325_v1, inf }
0x1c84   :  { %v3754_v17 = vpop.xlane.xlu1 %3753 }
0x1c85   :  { %v3755_v45 = vcvt.f32.s32 %v3754_v17 }
0x1c87   :  { %v3758_v34 = vadd.s32 %v3757_v36, %v3755_v45  ;;  %v3295_v45 = vcvt.s32.f32 %v3293_v18  ;;  %v7139_v36 = vpop.xlane.xlu0 %3342 }
0x1c88   :  { %vm3344_vm9 = vcmp.eq.f32.partialorder %v7046_v61, %v7139_v36  ;;  %v2892_v61 = vsel %vm2884_vm11, %v5263_v15, 8 }
0x1c89   :  { %v4374_v12 = vrot.slane %v3758_v34, %v6015_v51  ;;  %v3300_v26 = vsel %vm3299_vm7, %v3295_v45, inf  ;;  %v3345_v50 = vsel %vm3344_vm9, %v3340_v2, inf  ;;  %v8058_v34 = vld [vmem:[#allocation60_spill] sm:$0xff]  ;;  %v7165_v27 = vsel %vm1721_vm14, %v2892_v61, 2147483647 }
0x1c8a   :  { %v2902_v37 = vshra.s32 %v7165_v27, 16 }
0x1c8b   :  { %3357 = vmin.xlane.f32.xlu1 %v7094_v9  ;;  %v4384_v55 = vsel %vm1938_vm5, %v4374_v12, %v4383_v19  ;;  %v7146_v48 = vpop.xlane.xlu0 %3372  ;;  %v8062_v19 = vld [vmem:[#allocation64_spill] sm:$0xff] }
0x1c8c   :  { %v4385_v43 = vsel %vm1940_vm6, %v4378_v31, %v4384_v55  ;;  %vm3374_vm10 = vcmp.eq.f32.partialorder %v7053_v0, %v7146_v48  ;;  %v3383_v0 = vand.u32 65535, %v7050_v63  ;;  %vm2887_vm8 = vcmp.eq.f32.partialorder %v8062_v19, %v8061_v21 }
0x1c8d   :  { %v3375_v53 = vsel %vm3374_vm10, %v3370_v22, inf  ;;  %v7179_v55 = vcvt.s32.f32 %v2902_v37  ;;  %v3319_v21 = vcvt.f32.s32 %v7126_v20  ;;  %v3289_v19 = vcvt.f32.s32 %v7118_v52 }
0x1c8e   :  { %v3385_v12 = vcvt.s32.f32 %v3383_v0 }
0x1c8f   :  { %v7157_v32 = vpop.xlane.xlu0 %3387 }
0x1c90   :  { %vm3389_vm7 = vcmp.eq.f32.partialorder %v7057_v33, %v7157_v32 }
0x1c91   :  { %v3390_v63 = vsel %vm3389_vm7, %v3385_v12, inf  ;;  %vm2890_vm7 = vcmp.eq.f32.partialorder %v8070_v7, %v8069_v16 }
0x1c92   :  { %v2898_v12 = vsel %vm2890_vm7, %v5263_v15, 8 }
0x1ce6   :  { %v4345_v29 = vpop.permute.xlu1 %4344 }
0x1ce7   :  { %vm4346_vm12 = vcmp.eq.s32.totalorder %v5263_v15, %v4345_v29  ;;  %v2895_v29 = vsel %vm2887_vm8, %v5263_v15, 8 }
0x1ce8   :  { %v4386_v58 = vsel %vm4346_vm12, %v4385_v43, 0  ;;  %vm2885_vm12 = vcmp.eq.f32.partialorder %v8058_v34, %v8057_v8  ;;  %v8063_v43 = vld [vmem:[#allocation70_spill] sm:$0xff] }
0x1ce9   :  { %v4387_v57 = vsel %vm1721_vm14, %v4386_v58, 0  ;;  %v2893_v54 = vsel %vm2885_vm12, %v5263_v15, 8  ;;  %v8064_v58 = vld [vmem:[#allocation63_spill] sm:$0xff]  ;;  %vm4401_vm12 = vcmp.gt.s32.totalorder %v6955_v49, 5 }
0x1cea   :  { %v4389_v3 = vshrl.u32 %v4387_v57, 16  ;;  %v4388_v13 = vand.u32 65535, %v4387_v57  ;;  %v7174_v42 = vsel %vm1721_vm14, %v2893_v54, 2147483647  ;;  %vm2888_vm9 = vcmp.eq.f32.partialorder %v8064_v58, %v8063_v43 }
0x1ceb   :  { %v2917_v33 = vshra.s32 %v7174_v42, 16 }
0x1cec   :  { %v4391_v17 = vcvt.s32.f32 %v4389_v3  ;;  %v4390_v60 = vcvt.s32.f32 %v4388_v13  ;;  %v7193_v13 = vsel %vm1721_vm14, %v2895_v29, 2147483647 }
0x1ced   :  { %v7189_v57 = vcvt.s32.f32 %v2917_v33  ;;  %v2947_v18 = vshra.s32 %v7193_v13, 16  ;;  %v3334_v33 = vcvt.f32.s32 %v7133_v56 }
0x1cee   :  { %4394 = vadd.xlane.f32.xlu0 %v4391_v17  ;;  %v2896_v17 = vsel %vm2888_vm9, %v5263_v15, 8 }
0x1cef   :  { %v7209_v10 = vcvt.s32.f32 %v2947_v18 }
0x1cf2   :  { %4392 = vadd.xlane.f32.xlu0 %v4390_v60  ;;  %v8066_v60 = vld [vmem:[#allocation65_spill] sm:$0xff] }
0x1cf3   :  { %vm2889_vm10 = vcmp.eq.f32.partialorder %v8066_v60, %v8065_v39 }
0x1cf4   :  { %v2897_v45 = vsel %vm2889_vm10, %v5263_v15, 8 }
0x1cf6   :  { %3286 = vmin.xlane.f32.xlu0 %v3285_v40  ;;  %v7203_v40 = vsel %vm1721_vm14, %v2896_v17, 2147483647 }
0x1cf7   :  { %v2962_v38 = vshra.s32 %v7203_v40, 16 }
0x1cf9   :  { %v7217_v23 = vcvt.s32.f32 %v2962_v38 }
0x1cfa   :  { %3301 = vmin.xlane.f32.xlu0 %v3300_v26  ;;  %v8068_v26 = vld [vmem:[#allocation66_spill] sm:$0xff] }
0x1cfb   :  { %vm2891_vm11 = vcmp.eq.f32.partialorder %v8068_v26, %v8067_v44  ;;  %v3290_v26 = vshll.u32 %v3289_v19, 16 }
0x1cfc   :  { %v2899_v1 = vsel %vm2891_vm11, %v5263_v15, 8 }
0x1cfd   :  { %v7221_v2 = vsel %vm1721_vm14, %v2899_v1, 2147483647 }
0x1cfe   :  { %3316 = vmin.xlane.f32.xlu0 %v3315_v6  ;;  %v7213_v6 = vsel %vm1721_vm14, %v2897_v45, 2147483647  ;;  %v3320_v45 = vshll.u32 %v3319_v21, 16  ;;  %v2901_v21 = vand.u32 65535, %v7165_v27 }
0x1d02   :  { %3331 = vmin.xlane.f32.xlu0 %v3330_v25  ;;  %v2977_v25 = vshra.s32 %v7213_v6, 16 }
0x1d04   :  { %v7224_v30 = vcvt.s32.f32 %v2977_v25 }
0x1d06   :  { %3346 = vmin.xlane.f32.xlu0 %v3345_v50  ;;  %v3007_v50 = vshra.s32 %v7221_v2, 16 }
0x1d08   :  { %v7228_v22 = vcvt.s32.f32 %v3007_v50 }
0x1d0a   :  { %3376 = vmin.xlane.f32.xlu0 %v3375_v53 }
0x1d18   :  { %v7159_v11 = vpop.xlane.xlu1 %3357 }
0x1d19   :  { %vm3359_vm13 = vcmp.eq.f32.partialorder %v7094_v9, %v7159_v11  ;;  %v2894_v9 = vsel %vm2886_vm0, %v5263_v15, 8  ;;  %v3364_v56 = vcvt.f32.s32 %v7159_v11 }
0x1d1a   :  { %v3360_v62 = vsel %vm3359_vm13, %v3355_v28, inf  ;;  %v7183_v31 = vsel %vm1721_vm14, %v2894_v9, 2147483647  ;;  %vm4400_vm13 = vcmp.eq.s32.totalorder %v6955_v49, 5  ;;  %v3304_v9 = vcvt.f32.s32 %v7123_v41 }
0x1d1b   :  { %3361 = vmin.xlane.f32.xlu1 %v3360_v62  ;;  %v2932_v3 = vshra.s32 %v7183_v31, 16  ;;  %v3335_v41 = vshll.u32 %v3334_v33, 16 }
0x1d1c   :  { %v3305_v39 = vshll.u32 %v3304_v9, 16 }
0x1d1d   :  { %v7199_v47 = vcvt.s32.f32 %v2932_v3  ;;  %v3349_v3 = vcvt.f32.s32 %v7139_v36  ;;  %v3379_v36 = vcvt.f32.s32 %v7146_v48 }
0x1d1f   :  { %3391 = vmin.xlane.f32.xlu1 %v3390_v63  ;;  %v7242_v63 = vsel %vm1721_vm14, %v2898_v12, 2147483647  ;;  %v3350_v52 = vshll.u32 %v3349_v3, 16  ;;  %v3380_v16 = vshll.u32 %v3379_v36, 16 }
0x1d20   :  { %v2992_v58 = vshra.s32 %v7242_v63, 16 }
0x1d22   :  { %v7250_v20 = vcvt.s32.f32 %v2992_v58 }
0x1d23   :  { %2905 = vmin.xlane.f32.xlu1 %v7179_v55 }
0x1d27   :  { %2920 = vmin.xlane.f32.xlu1 %v7189_v57 }
0x1d2b   :  { %2935 = vmin.xlane.f32.xlu1 %v7199_v47 }
0x1d2f   :  { %2950 = vmin.xlane.f32.xlu1 %v7209_v10 }
0x1d33   :  { %2965 = vmin.xlane.f32.xlu1 %v7217_v23 }
0x1d37   :  { %2980 = vmin.xlane.f32.xlu1 %v7224_v30 }
0x1d3b   :  { %3010 = vmin.xlane.f32.xlu1 %v7228_v22 }
0x1d7b   :  { %v4395_v53 = vpop.xlane.xlu0 %4394 }
0x1d7c   :  { %v4397_v35 = vcvt.f32.s32 %v4395_v53 }
0x1d7e   :  { %v4398_v59 = vshll.u32 %v4397_v35, 16 }
0x1d7f   :  { %v4393_v4 = vpop.xlane.xlu0 %4392 }
0x1d80   :  { %v4396_v61 = vcvt.f32.s32 %v4393_v4 }
0x1d82   :  { %v4399_v8 = vadd.s32 %v4398_v59, %v4396_v61  ;;  %v3394_v59 = vcvt.f32.s32 %v7157_v32 }
0x1d83   :  { %v3287_v0 = vpop.xlane.xlu0 %3286 }
0x1d84   :  { %v4402_v34 = vsel %vm4401_vm12, %v4399_v8, %v7084_v24  ;;  %v3288_v60 = vcvt.f32.s32 %v3287_v0  ;;  %v3365_v0 = vshll.u32 %v3364_v56, 16  ;;  %v3395_v19 = vshll.u32 %v3394_v59, 16 }
0x1d85   :  { %v7235_v28 = vsel %vm4400_vm13, %v6885_v5, %v4402_v34 }
0x1d86   :  { %4412 = vperm.xlu0 %5076, %v7235_v28   ;;  %v3291_v25 = vadd.s32 %v3290_v26, %v3288_v60 }
0x1d87   :  { %v3302_v62 = vpop.xlane.xlu0 %3301 }
0x1d88   :  { %v3303_v29 = vcvt.f32.s32 %v3302_v62  ;;  %v4418_v62 = vrot.slane %v3291_v25, %v6015_v51  ;;  %v2946_v25 = vand.u32 65535, %v7193_v13  ;;  %v2976_v13 = vand.u32 65535, %v7213_v6 }
0x1d8a   :  { %v3306_v38 = vadd.s32 %v3305_v39, %v3303_v29  ;;  %v2948_v36 = vcvt.s32.f32 %v2946_v25  ;;  %v8084_v25 = vld [vmem:[#allocation50_spill] sm:$0xff] }
0x1d8b   :  { %v3317_v54 = vpop.xlane.xlu0 %3316 }
0x1d8c   :  { %v3318_v17 = vcvt.f32.s32 %v3317_v54  ;;  %v4422_v4 = vrot.slane %v3306_v38, %v6015_v51 }
0x1d8e   :  { %v3321_v1 = vadd.s32 %v3320_v45, %v3318_v17  ;;  %v4447_v48 = vsel %vm1928_vm15, %v4422_v4, %v4418_v62  ;;  %v2916_v45 = vand.u32 65535, %v7174_v42  ;;  %v8072_v4 = vld [vmem:[#allocation43_spill] sm:$0xff]  ;;  %v3006_v62 = vand.u32 65535, %v7221_v2 }
0x1d8f   :  { %v3332_v37 = vpop.xlane.xlu0 %3331 }
0x1d90   :  { %v3333_v18 = vcvt.f32.s32 %v3332_v37  ;;  %v4426_v61 = vrot.slane %v3321_v1, %v6015_v51  ;;  %v2931_v1 = vand.u32 65535, %v7183_v31  ;;  %v2961_v31 = vand.u32 65535, %v7203_v40 }
0x1d92   :  { %v3336_v50 = vadd.s32 %v3335_v41, %v3333_v18  ;;  %v4448_v37 = vsel %vm1930_vm1, %v4426_v61, %v4447_v48  ;;  %v2903_v18 = vcvt.s32.f32 %v2901_v21  ;;  %v3008_v48 = vcvt.s32.f32 %v3006_v62 }
0x1d93   :  { %v3347_v43 = vpop.xlane.xlu0 %3346 }
0x1d94   :  { %v3348_v44 = vcvt.f32.s32 %v3347_v43  ;;  %v4430_v11 = vrot.slane %v3336_v50, %v6015_v51 }
0x1d96   :  { %v3351_v35 = vadd.s32 %v3350_v52, %v3348_v44  ;;  %v4449_v33 = vsel %vm1932_vm2, %v4430_v11, %v4448_v37  ;;  %v2918_v52 = vcvt.s32.f32 %v2916_v45  ;;  %v8082_v45 = vld [vmem:[#allocation49_spill] sm:$0xff] }
0x1d97   :  { %v3377_v53 = vpop.xlane.xlu0 %3376 }
0x1d98   :  { %v3378_v8 = vcvt.f32.s32 %v3377_v53  ;;  %v4434_v7 = vrot.slane %v3351_v35, %v6015_v51  ;;  %v8071_v35 = vld [vmem:[#allocation55_spill] sm:$0xff] }
0x1d99   :  { %vm2507_vm11 = vcmp.eq.f32.partialorder %v8072_v4, %v8071_v35 }
0x1d9a   :  { %v3381_v9 = vadd.s32 %v3380_v16, %v3378_v8  ;;  %v4450_v58 = vsel %vm1934_vm3, %v4434_v7, %v4449_v33  ;;  %v2515_v40 = vsel %vm2507_vm11, %v5263_v15, 8  ;;  %v8073_v8 = vld [vmem:[#allocation51_spill] sm:$0xff]  ;;  %v8076_v16 = vld [vmem:[#allocation45_spill] sm:$0xff] }
0x1d9b   :  { %v7320_v11 = vsel %vm1721_vm14, %v2515_v40, 2147483647 }
0x1d9c   :  { %v4442_v39 = vrot.slane %v3381_v9, %v6015_v51  ;;  %v2525_v2 = vshra.s32 %v7320_v11, 16  ;;  %v8077_v9 = vld [vmem:[#allocation54_spill] sm:$0xff] }
0x1d9e   :  { %v7336_v21 = vcvt.s32.f32 %v2525_v2 }
0x1da5   :  { %2995 = vmin.xlane.f32.xlu0 %v7250_v20 }
0x1da8   :  { %v3362_v34 = vpop.xlane.xlu1 %3361 }
0x1da9   :  { %v3363_v54 = vcvt.f32.s32 %v3362_v34  ;;  %v8074_v34 = vld [vmem:[#allocation44_spill] sm:$0xff] }
0x1daa   :  { %vm2508_vm13 = vcmp.eq.f32.partialorder %v8074_v34, %v8073_v8 }
0x1dab   :  { %v3366_v12 = vadd.s32 %v3365_v0, %v3363_v54  ;;  %v2978_v0 = vcvt.s32.f32 %v2976_v13  ;;  %v8075_v54 = vld [vmem:[#allocation52_spill] sm:$0xff] }
0x1dac   :  { %v3392_v32 = vpop.xlane.xlu1 %3391 }
0x1dad   :  { %v4438_v29 = vrot.slane %v3366_v12, %v6015_v51  ;;  %v3393_v43 = vcvt.f32.s32 %v3392_v32  ;;  %v8078_v32 = vld [vmem:[#allocation47_spill] sm:$0xff] }
0x1daf   :  { %v3396_v3 = vadd.s32 %v3395_v19, %v3393_v43  ;;  %v4451_v17 = vsel %vm1936_vm4, %v4438_v29, %v4450_v58  ;;  %v8079_v29 = vld [vmem:[#allocation53_spill] sm:$0xff]  ;;  %v8080_v43 = vld [vmem:[#allocation46_spill] sm:$0xff] }
0x1db0   :  { %v7269_v60 = vpop.xlane.xlu1 %2905  ;;  %v4452_v44 = vsel %vm1938_vm5, %v4442_v39, %v4451_v17 }
0x1db1   :  { %v4446_v27 = vrot.slane %v3396_v3, %v6015_v51  ;;  %vm2907_vm0 = vcmp.eq.f32.partialorder %v7179_v55, %v7269_v60  ;;  %v2933_v55 = vcvt.s32.f32 %v2931_v1 }
0x1db2   :  { %v7276_v26 = vsel %vm2907_vm0, %v2903_v18, inf  ;;  %vm2509_vm0 = vcmp.eq.f32.partialorder %v8076_v16, %v8075_v54  ;;  %v8081_v18 = vld [vmem:[#allocation57_spill] sm:$0xff] }
0x1db3   :  { %v7279_v41 = vsel %vm1940_vm6, %v4446_v27, %v4452_v44  ;;  %v2517_v37 = vsel %vm2509_vm0, %v5263_v15, 8  ;;  %vm2513_vm11 = vcmp.eq.f32.partialorder %v8082_v45, %v8081_v18  ;;  %vm4469_vm0 = vcmp.gt.s32.totalorder %v6955_v49, 4 }
0x1db4   :  { %v7281_v38 = vpop.xlane.xlu1 %2920  ;;  %v7340_v33 = vsel %vm1721_vm14, %v2517_v37, 2147483647  ;;  %v2521_v1 = vsel %vm2513_vm11, %v5263_v15, 8 }
0x1db5   :  { %vm2922_vm8 = vcmp.eq.f32.partialorder %v7189_v57, %v7281_v38  ;;  %v2555_v3 = vshra.s32 %v7340_v33, 16  ;;  %v7370_v35 = vsel %vm1721_vm14, %v2521_v1, 2147483647 }
0x1db6   :  { %v7286_v42 = vsel %vm2922_vm8, %v2918_v52, inf }
0x1db7   :  { %v7356_v27 = vcvt.s32.f32 %v2555_v3 }
0x1db8   :  { %v7288_v56 = vpop.xlane.xlu1 %2935 }
0x1db9   :  { %vm2937_vm9 = vcmp.eq.f32.partialorder %v7199_v47, %v7288_v56  ;;  %v2963_v47 = vcvt.s32.f32 %v2961_v31 }
0x1dba   :  { %v7293_v50 = vsel %vm2937_vm9, %v2933_v55, inf  ;;  %vm2510_vm9 = vcmp.eq.f32.partialorder %v8078_v32, %v8077_v9  ;;  %v8083_v55 = vld [vmem:[#allocation58_spill] sm:$0xff] }
0x1dbc   :  { %v7295_v53 = vpop.xlane.xlu1 %2950 }
0x1dbd   :  { %vm2952_vm10 = vcmp.eq.f32.partialorder %v7209_v10, %v7295_v53 }
0x1dbe   :  { %v7300_v57 = vsel %vm2952_vm10, %v2948_v36, inf  ;;  %vm2511_vm10 = vcmp.eq.f32.partialorder %v8080_v43, %v8079_v29 }
0x1dbf   :  { %v2519_v39 = vsel %vm2511_vm10, %v5263_v15, 8 }
0x1dc0   :  { %v7304_v59 = vpop.xlane.xlu1 %2965  ;;  %v7360_v52 = vsel %vm1721_vm14, %v2519_v39, 2147483647  ;;  %v2942_v39 = vcvt.f32.s32 %v7288_v56 }
0x1dc1   :  { %vm2967_vm12 = vcmp.eq.f32.partialorder %v7217_v23, %v7304_v59  ;;  %v2516_v23 = vsel %vm2508_vm13, %v5263_v15, 8  ;;  %v2585_v31 = vshra.s32 %v7360_v52, 16 }
0x1dc2   :  { %v7309_v61 = vsel %vm2967_vm12, %v2963_v47, inf  ;;  %vm2514_vm12 = vcmp.eq.f32.partialorder %v8084_v25, %v8083_v55  ;;  %v2615_v47 = vshra.s32 %v7370_v35, 16  ;;  %v2943_v55 = vshll.u32 %v2942_v39, 16 }
0x1dc3   :  { %v2522_v4 = vsel %vm2514_vm12, %v5263_v15, 8  ;;  %v7374_v13 = vcvt.s32.f32 %v2585_v31  ;;  %v2957_v25 = vcvt.f32.s32 %v7295_v53 }
0x1dc4   :  { %v7314_v10 = vpop.xlane.xlu1 %2980  ;;  %v7378_v40 = vsel %vm1721_vm14, %v2522_v4, 2147483647  ;;  %v7381_v8 = vcvt.s32.f32 %v2615_v47 }
0x1dc5   :  { %vm2982_vm7 = vcmp.eq.f32.partialorder %v7224_v30, %v7314_v10  ;;  %v7331_v30 = vsel %vm1721_vm14, %v2516_v23, 2147483647  ;;  %v2630_v34 = vshra.s32 %v7378_v40, 16  ;;  %v2987_v56 = vcvt.f32.s32 %v7314_v10 }
0x1dc6   :  { %v2983_v6 = vsel %vm2982_vm7, %v2978_v0, inf  ;;  %v2540_v19 = vshra.s32 %v7331_v30, 16 }
0x1dc7   :  { %2984 = vmin.xlane.f32.xlu0 %v2983_v6  ;;  %v7385_v0 = vcvt.s32.f32 %v2630_v34 }
0x1dc8   :  { %v7325_v7 = vpop.xlane.xlu1 %3010  ;;  %v7346_v58 = vcvt.s32.f32 %v2540_v19 }
0x1dc9   :  { %vm3012_vm8 = vcmp.eq.f32.partialorder %v7228_v22, %v7325_v7  ;;  %v2518_v22 = vsel %vm2510_vm9, %v5263_v15, 8 }
0x1dca   :  { %v3013_v12 = vsel %vm3012_vm8, %v3008_v48, inf  ;;  %v7350_v17 = vsel %vm1721_vm14, %v2518_v22, 2147483647  ;;  %vm4468_vm8 = vcmp.eq.s32.totalorder %v6955_v49, 4 }
0x1dcb   :  { %3014 = vmin.xlane.f32.xlu0 %v3013_v12  ;;  %v2570_v44 = vshra.s32 %v7350_v17, 16 }
0x1dcd   :  { %v7366_v36 = vcvt.s32.f32 %v2570_v44 }
0x1dcf   :  { %2528 = vmin.xlane.f32.xlu0 %v7336_v21 }
0x1dd3   :  { %2543 = vmin.xlane.f32.xlu0 %v7346_v58 }
0x1dd7   :  { %2558 = vmin.xlane.f32.xlu0 %v7356_v27 }
0x1ddb   :  { %2573 = vmin.xlane.f32.xlu0 %v7366_v36 }
0x1ddf   :  { %2588 = vmin.xlane.f32.xlu0 %v7374_v13 }
0x1de3   :  { %2618 = vmin.xlane.f32.xlu0 %v7381_v8 }
0x1de7   :  { %2633 = vmin.xlane.f32.xlu0 %v7385_v0 }
0x1e05   :  { %v4413_v62 = vpop.permute.xlu0 %4412 }
0x1e06   :  { %vm4414_vm13 = vcmp.eq.s32.totalorder %v5263_v15, %v4413_v62 }
0x1e07   :  { %v4454_v6 = vsel %vm4414_vm13, %v7279_v41, 0  ;;  %v2991_v41 = vand.u32 65535, %v7242_v63 }
0x1e08   :  { %v4455_v23 = vsel %vm1721_vm14, %v4454_v6, 0 }
0x1e09   :  { %v4457_v54 = vshrl.u32 %v4455_v23, 16  ;;  %v4456_v16 = vand.u32 65535, %v4455_v23  ;;  %v2993_v37 = vcvt.s32.f32 %v2991_v41 }
0x1e0b   :  { %v4459_v48 = vcvt.s32.f32 %v4457_v54  ;;  %v4458_v2 = vcvt.s32.f32 %v4456_v16  ;;  %v2958_v54 = vshll.u32 %v2957_v25, 16  ;;  %v2972_v16 = vcvt.f32.s32 %v7304_v59 }
0x1e0d   :  { %4462 = vadd.xlane.f32.xlu1 %v4459_v48 }
0x1e11   :  { %4460 = vadd.xlane.f32.xlu1 %v4458_v2 }
0x1e15   :  { %2909 = vmin.xlane.f32.xlu1 %v7276_v26 }
0x1e19   :  { %2924 = vmin.xlane.f32.xlu1 %v7286_v42  ;;  %v2912_v42 = vcvt.f32.s32 %v7269_v60 }
0x1e1b   :  { %v2913_v3 = vshll.u32 %v2912_v42, 16 }
0x1e1d   :  { %2939 = vmin.xlane.f32.xlu1 %v7293_v50 }
0x1e21   :  { %2954 = vmin.xlane.f32.xlu1 %v7300_v57  ;;  %v2927_v57 = vcvt.f32.s32 %v7281_v38 }
0x1e23   :  { %v2928_v18 = vshll.u32 %v2927_v57, 16  ;;  %v8085_v57 = vld [vmem:[#allocation56_spill] sm:$0xff] }
0x1e25   :  { %2969 = vmin.xlane.f32.xlu1 %v7309_v61 }
0x1e32   :  { %v2996_v12 = vpop.xlane.xlu0 %2995 }
0x1e33   :  { %vm2997_vm7 = vcmp.eq.f32.partialorder %v7250_v20, %v2996_v12  ;;  %v3002_v39 = vcvt.f32.s32 %v2996_v12  ;;  %v3017_v12 = vcvt.f32.s32 %v7325_v7 }
0x1e34   :  { %v2998_v9 = vsel %vm2997_vm7, %v2993_v37, inf }
0x1e35   :  { %2999 = vmin.xlane.f32.xlu1 %v2998_v9  ;;  %v2988_v9 = vshll.u32 %v2987_v56, 16 }
0x1e54   :  { %v2985_v34 = vpop.xlane.xlu0 %2984 }
0x1e55   :  { %v2986_v41 = vcvt.f32.s32 %v2985_v34  ;;  %v3018_v34 = vshll.u32 %v3017_v12, 16 }
0x1e9a   :  { %v4463_v32 = vpop.xlane.xlu1 %4462 }
0x1e9b   :  { %v4465_v19 = vcvt.f32.s32 %v4463_v32 }
0x1e9d   :  { %v4466_v26 = vshll.u32 %v4465_v19, 16  ;;  %v2973_v19 = vshll.u32 %v2972_v16, 16 }
0x1e9e   :  { %v4461_v22 = vpop.xlane.xlu1 %4460 }
0x1e9f   :  { %v4464_v29 = vcvt.f32.s32 %v4461_v22 }
0x1ea1   :  { %v4467_v50 = vadd.s32 %v4466_v26, %v4464_v29  ;;  %v2989_v29 = vadd.s32 %v2988_v9, %v2986_v41 }
0x1ea2   :  { %v2910_v43 = vpop.xlane.xlu1 %2909 }
0x1ea3   :  { %v2911_v63 = vcvt.f32.s32 %v2910_v43  ;;  %v4470_v20 = vsel %vm4469_vm0, %v4467_v50, %v7235_v28  ;;  %v4506_v59 = vrot.slane %v2989_v29, %v6015_v51 }
0x1ea4   :  { %v7404_v61 = vsel %vm4468_vm8, %v6885_v5, %v4470_v20 }
0x1ea5   :  { %4480 = vperm.xlu1 %5077, %v7404_v61   ;;  %v2914_v45 = vadd.s32 %v2913_v3, %v2911_v63  ;;  %v8086_v63 = vld [vmem:[#allocation48_spill] sm:$0xff] }
0x1ea6   :  { %v2925_v60 = vpop.xlane.xlu1 %2924  ;;  %vm2512_vm9 = vcmp.eq.f32.partialorder %v8086_v63, %v8085_v57 }
0x1ea7   :  { %v2926_v44 = vcvt.f32.s32 %v2925_v60  ;;  %v4486_v31 = vrot.slane %v2914_v45, %v6015_v51  ;;  %v2520_v3 = vsel %vm2512_vm9, %v5263_v15, 8  ;;  %v3003_v45 = vshll.u32 %v3002_v39, 16 }
0x1ea8   :  { %v7426_v60 = vsel %vm1721_vm14, %v2520_v3, 2147483647  ;;  %v8087_v3 = vld [vmem:[#allocation39_spill] sm:$0xff] }
0x1ea9   :  { %v2929_v1 = vadd.s32 %v2928_v18, %v2926_v44  ;;  %v2599_v39 = vand.u32 65535, %v7426_v60 }
0x1eaa   :  { %v2940_v38 = vpop.xlane.xlu1 %2939 }
0x1eab   :  { %v4490_v4 = vrot.slane %v2929_v1, %v6015_v51  ;;  %v2941_v47 = vcvt.f32.s32 %v2940_v38  ;;  %v2600_v1 = vshra.s32 %v7426_v60, 16 }
0x1ead   :  { %v4515_v62 = vsel %vm1928_vm15, %v4490_v4, %v4486_v31  ;;  %v2944_v6 = vadd.s32 %v2943_v55, %v2941_v47  ;;  %v7430_v25 = vcvt.s32.f32 %v2600_v1  ;;  %v3015_v4 = vpop.xlane.xlu0 %3014  ;;  %v2601_v1 = vcvt.s32.f32 %v2599_v39 }
0x1eae   :  { %v2955_v23 = vpop.xlane.xlu1 %2954  ;;  %v3016_v47 = vcvt.f32.s32 %v3015_v4  ;;  %v8092_v4 = vld [vmem:[#allocation29_spill] sm:$0xff] }
0x1eaf   :  { %v4494_v48 = vrot.slane %v2944_v6, %v6015_v51  ;;  %v2956_v2 = vcvt.f32.s32 %v2955_v23 }
0x1eb1   :  { %v4516_v53 = vsel %vm1930_vm1, %v4494_v48, %v4515_v62  ;;  %v2959_v37 = vadd.s32 %v2958_v54, %v2956_v2  ;;  %v3019_v62 = vadd.s32 %v3018_v34, %v3016_v47  ;;  %v7436_v56 = vpop.xlane.xlu0 %2528 }
0x1eb2   :  { %v2970_v32 = vpop.xlane.xlu1 %2969  ;;  %vm2530_vm11 = vcmp.eq.f32.partialorder %v7336_v21, %v7436_v56 }
0x1eb3   :  { %v4498_v22 = vrot.slane %v2959_v37, %v6015_v51  ;;  %v2971_v26 = vcvt.f32.s32 %v2970_v32  ;;  %v4514_v6 = vrot.slane %v3019_v62, %v6015_v51  ;;  %v2524_v37 = vand.u32 65535, %v7320_v11  ;;  %v8093_v62 = vld [vmem:[#allocation38_spill] sm:$0xff] }
0x1eb4   :  { %v2554_v11 = vand.u32 65535, %v7340_v33 }
0x1eb5   :  { %v4517_v10 = vsel %vm1932_vm2, %v4498_v22, %v4516_v53  ;;  %v2974_v42 = vadd.s32 %v2973_v19, %v2971_v26  ;;  %v7441_v41 = vpop.xlane.xlu0 %2543  ;;  %v2526_v19 = vcvt.s32.f32 %v2524_v37  ;;  %v2539_v22 = vand.u32 65535, %v7331_v30 }
0x1eb6   :  { %vm2545_vm12 = vcmp.eq.f32.partialorder %v7346_v58, %v7441_v41  ;;  %v2556_v21 = vcvt.s32.f32 %v2554_v11 }
0x1eb7   :  { %v4502_v50 = vrot.slane %v2974_v42, %v6015_v51  ;;  %v2531_v26 = vsel %vm2530_vm11, %v2526_v19, inf  ;;  %v8097_v19 = vld [vmem:[#allocation40_spill] sm:$0xff] }
0x1eb9   :  { %v4518_v43 = vsel %vm1934_vm3, %v4502_v50, %v4517_v10  ;;  %v7444_v32 = vpop.xlane.xlu0 %2558  ;;  %v2541_v10 = vcvt.s32.f32 %v2539_v22  ;;  %v2569_v50 = vand.u32 65535, %v7350_v17  ;;  %v2614_v17 = vand.u32 65535, %v7370_v35  ;;  %v8098_v22 = vld [vmem:[#allocation32_spill] sm:$0xff] }
0x1eba   :  { %v4519_v20 = vsel %vm1936_vm4, %v4506_v59, %v4518_v43  ;;  %vm2560_vm13 = vcmp.eq.f32.partialorder %v7356_v27, %v7444_v32  ;;  %v2584_v43 = vand.u32 65535, %v7360_v52  ;;  %v8088_v52 = vld [vmem:[#allocation27_spill] sm:$0xff] }
0x1ebb   :  { %v2546_v42 = vsel %vm2545_vm12, %v2541_v10, inf  ;;  %v2561_v30 = vsel %vm2560_vm13, %v2556_v21, inf  ;;  %v2571_v58 = vcvt.s32.f32 %v2569_v50  ;;  %vm2130_vm9 = vcmp.eq.f32.partialorder %v8088_v52, %v8087_v3  ;;  %v8099_v21 = vld [vmem:[#allocation42_spill] sm:$0xff] }
0x1ebc   :  { %v2586_v27 = vcvt.s32.f32 %v2584_v43  ;;  %v8100_v50 = vld [vmem:[#allocation34_spill] sm:$0xff] }
0x1ebd   :  { %v7451_v29 = vpop.xlane.xlu0 %2573 }
0x1ebe   :  { %vm2575_vm7 = vcmp.eq.f32.partialorder %v7366_v36, %v7451_v29  ;;  %v2616_v36 = vcvt.s32.f32 %v2614_v17 }
0x1ebf   :  { %v2576_v57 = vsel %vm2575_vm7, %v2571_v58, inf }
0x1ec1   :  { %v7457_v59 = vpop.xlane.xlu0 %2588 }
0x1ec2   :  { %v3000_v18 = vpop.xlane.xlu1 %2999  ;;  %vm2590_vm0 = vcmp.eq.f32.partialorder %v7374_v13, %v7457_v59  ;;  %v2138_v13 = vsel %vm2130_vm9, %v5263_v15, 8  ;;  %vm2137_vm9 = vcmp.eq.f32.partialorder %v8100_v50, %v8099_v21 }
0x1ec3   :  { %v3001_v44 = vcvt.f32.s32 %v3000_v18  ;;  %v2591_v63 = vsel %vm2590_vm0, %v2586_v27, inf  ;;  %v8089_v18 = vld [vmem:[#allocation35_spill] sm:$0xff] }
0x1ec5   :  { %v3004_v55 = vadd.s32 %v3003_v45, %v3001_v44  ;;  %v7464_v33 = vpop.xlane.xlu0 %2618  ;;  %v8090_v45 = vld [vmem:[#allocation28_spill] sm:$0xff] }
0x1ec6   :  { %vm2620_vm8 = vcmp.eq.f32.partialorder %v7381_v8, %v7464_v33  ;;  %v2629_v8 = vand.u32 65535, %v7378_v40 }
0x1ec7   :  { %v4510_v38 = vrot.slane %v3004_v55, %v6015_v51 }
0x1ec8   :  { %v2631_v12 = vcvt.s32.f32 %v2629_v8 }
0x1ec9   :  { %2603 = vmin.xlane.f32.xlu1 %v7430_v25  ;;  %v4520_v31 = vsel %vm1938_vm5, %v4510_v38, %v4519_v20  ;;  %v2621_v20 = vsel %vm2620_vm8, %v2616_v36, inf  ;;  %v7475_v44 = vpop.xlane.xlu0 %2633  ;;  %v7483_v38 = vsel %vm1721_vm14, %v2138_v13, 2147483647  ;;  %vm2135_vm8 = vcmp.eq.f32.partialorder %v8098_v22, %v8097_v19 }
0x1eca   :  { %v4521_v54 = vsel %vm1940_vm6, %v4514_v6, %v4520_v31  ;;  %vm2635_vm12 = vcmp.eq.f32.partialorder %v7385_v0, %v7475_v44  ;;  %v8091_v31 = vld [vmem:[#allocation36_spill] sm:$0xff]  ;;  %v2148_v47 = vshra.s32 %v7483_v38, 16  ;;  %v8094_v6 = vld [vmem:[#allocation31_spill] sm:$0xff] }
0x1ecb   :  { %vm2132_vm13 = vcmp.eq.f32.partialorder %v8092_v4, %v8091_v31  ;;  %v2636_v40 = vsel %vm2635_vm12, %v2631_v12, inf  ;;  %vm2133_vm7 = vcmp.eq.f32.partialorder %v8094_v6, %v8093_v62 }
0x1f24   :  { %v4481_v23 = vpop.permute.xlu1 %4480 }
0x1f25   :  { %vm4482_vm10 = vcmp.eq.s32.totalorder %v5263_v15, %v4481_v23  ;;  %v7497_v23 = vcvt.s32.f32 %v2148_v47 }
0x1f26   :  { %v4522_v16 = vsel %vm4482_vm10, %v4521_v54, 0  ;;  %vm2131_vm10 = vcmp.eq.f32.partialorder %v8090_v45, %v8089_v18 }
0x1f27   :  { %v4523_v48 = vsel %vm1721_vm14, %v4522_v16, 0  ;;  %v2139_v60 = vsel %vm2131_vm10, %v5263_v15, 8  ;;  %v2141_v16 = vsel %vm2133_vm7, %v5263_v15, 8  ;;  %vm4537_vm10 = vcmp.gt.s32.totalorder %v6955_v49, 3 }
0x1f28   :  { %v4525_v2 = vshrl.u32 %v4523_v48, 16  ;;  %v4524_v53 = vand.u32 65535, %v4523_v48  ;;  %v7492_v34 = vsel %vm1721_vm14, %v2139_v60, 2147483647  ;;  %v8095_v48 = vld [vmem:[#allocation37_spill] sm:$0xff]  ;;  %v2550_v60 = vcvt.f32.s32 %v7441_v41 }
0x1f29   :  { %v2163_v0 = vshra.s32 %v7492_v34, 16  ;;  %v7511_v37 = vsel %vm1721_vm14, %v2141_v16, 2147483647 }
0x1f2a   :  { %v4527_v7 = vcvt.s32.f32 %v4525_v2  ;;  %v4526_v9 = vcvt.s32.f32 %v4524_v53  ;;  %v8096_v2 = vld [vmem:[#allocation30_spill] sm:$0xff]  ;;  %v2193_v10 = vshra.s32 %v7511_v37, 16 }
0x1f2b   :  { %vm2134_vm0 = vcmp.eq.f32.partialorder %v8096_v2, %v8095_v48  ;;  %v7507_v53 = vcvt.s32.f32 %v2163_v0  ;;  %v2580_v48 = vcvt.f32.s32 %v7451_v29 }
0x1f2c   :  { %4530 = vadd.xlane.f32.xlu0 %v4527_v7 }
0x1f30   :  { %4528 = vadd.xlane.f32.xlu0 %v4526_v9  ;;  %v2142_v9 = vsel %vm2134_vm0, %v5263_v15, 8 }
0x1f31   :  { %v7521_v11 = vsel %vm1721_vm14, %v2142_v9, 2147483647 }
0x1f32   :  { %v2208_v58 = vshra.s32 %v7521_v11, 16 }
0x1f34   :  { %2532 = vmin.xlane.f32.xlu0 %v2531_v26  ;;  %v7535_v27 = vcvt.s32.f32 %v2208_v58 }
0x1f38   :  { %2547 = vmin.xlane.f32.xlu0 %v2546_v42  ;;  %v2143_v42 = vsel %vm2135_vm8, %v5263_v15, 8 }
0x1f39   :  { %v7531_v43 = vsel %vm1721_vm14, %v2143_v42, 2147483647  ;;  %v2581_v42 = vshll.u32 %v2580_v48, 16 }
0x1f3a   :  { %v2223_v17 = vshra.s32 %v7531_v43, 16 }
0x1f3c   :  { %2562 = vmin.xlane.f32.xlu0 %v2561_v30  ;;  %v7527_v30 = vcvt.s32.f32 %v2193_v10  ;;  %v7542_v36 = vcvt.s32.f32 %v2223_v17 }
0x1f40   :  { %2577 = vmin.xlane.f32.xlu0 %v2576_v57  ;;  %v2145_v57 = vsel %vm2137_vm9, %v5263_v15, 8 }
0x1f44   :  { %2592 = vmin.xlane.f32.xlu0 %v2591_v63  ;;  %v7539_v63 = vsel %vm1721_vm14, %v2145_v57, 2147483647 }
0x1f48   :  { %2622 = vmin.xlane.f32.xlu0 %v2621_v20  ;;  %v2253_v20 = vshra.s32 %v7539_v63, 16 }
0x1f4a   :  { %v7546_v3 = vcvt.s32.f32 %v2253_v20 }
0x1f56   :  { %v7477_v35 = vpop.xlane.xlu1 %2603 }
0x1f57   :  { %vm2605_vm11 = vcmp.eq.f32.partialorder %v7430_v25, %v7477_v35  ;;  %v2140_v25 = vsel %vm2132_vm13, %v5263_v15, 8 }
0x1f58   :  { %v2606_v55 = vsel %vm2605_vm11, %v2601_v1, inf  ;;  %v7501_v54 = vsel %vm1721_vm14, %v2140_v25, 2147483647  ;;  %v2535_v1 = vcvt.f32.s32 %v7436_v56  ;;  %vm4536_vm11 = vcmp.eq.s32.totalorder %v6955_v49, 3 }
0x1f59   :  { %2607 = vmin.xlane.f32.xlu1 %v2606_v55  ;;  %v2178_v7 = vshra.s32 %v7501_v54, 16  ;;  %v2551_v25 = vshll.u32 %v2550_v60, 16 }
0x1f5a   :  { %v2536_v47 = vshll.u32 %v2535_v1, 16 }
0x1f5b   :  { %v7517_v26 = vcvt.s32.f32 %v2178_v7 }
0x1f5d   :  { %2637 = vmin.xlane.f32.xlu1 %v2636_v40  ;;  %v2565_v40 = vcvt.f32.s32 %v7444_v32  ;;  %v2595_v32 = vcvt.f32.s32 %v7457_v59 }
0x1f5f   :  { %v2566_v16 = vshll.u32 %v2565_v40, 16  ;;  %v2596_v29 = vshll.u32 %v2595_v32, 16  ;;  %v2610_v40 = vcvt.f32.s32 %v7477_v35 }
0x1f61   :  { %2151 = vmin.xlane.f32.xlu1 %v7497_v23 }
0x1f65   :  { %2166 = vmin.xlane.f32.xlu1 %v7507_v53 }
0x1f69   :  { %2181 = vmin.xlane.f32.xlu1 %v7517_v26 }
0x1f6d   :  { %2196 = vmin.xlane.f32.xlu1 %v7527_v30 }
0x1f71   :  { %2211 = vmin.xlane.f32.xlu1 %v7535_v27 }
0x1f75   :  { %2226 = vmin.xlane.f32.xlu1 %v7542_v36 }
0x1f79   :  { %2256 = vmin.xlane.f32.xlu1 %v7546_v3 }
0x1fb9   :  { %v4531_v52 = vpop.xlane.xlu0 %4530 }
0x1fba   :  { %v4533_v39 = vcvt.f32.s32 %v4531_v52 }
0x1fbc   :  { %v4534_v18 = vshll.u32 %v4533_v39, 16  ;;  %v8101_v39 = vld [vmem:[#allocation41_spill] sm:$0xff] }
0x1fbd   :  { %v4529_v13 = vpop.xlane.xlu0 %4528 }
0x1fbe   :  { %v4532_v45 = vcvt.f32.s32 %v4529_v13  ;;  %v8102_v13 = vld [vmem:[#allocation33_spill] sm:$0xff] }
0x1fbf   :  { %vm2136_vm12 = vcmp.eq.f32.partialorder %v8102_v13, %v8101_v39 }
0x1fc0   :  { %v4535_v8 = vadd.s32 %v4534_v18, %v4532_v45  ;;  %v2144_v59 = vsel %vm2136_vm12, %v5263_v15, 8 }
0x1fc1   :  { %v2533_v55 = vpop.xlane.xlu0 %2532 }
0x1fc2   :  { %v2534_v31 = vcvt.f32.s32 %v2533_v55  ;;  %v4538_v4 = vsel %vm4537_vm10, %v4535_v8, %v7404_v61  ;;  %v7574_v55 = vsel %vm1721_vm14, %v2144_v59, 2147483647 }
0x1fc3   :  { %v7555_v12 = vsel %vm4536_vm11, %v6885_v5, %v4538_v4  ;;  %v2238_v60 = vshra.s32 %v7574_v55, 16 }
0x1fc4   :  { %4548 = vperm.xlu0 %5076, %v7555_v12   ;;  %v2537_v62 = vadd.s32 %v2536_v47, %v2534_v31  ;;  %v2625_v47 = vcvt.f32.s32 %v7464_v33 }
0x1fc5   :  { %v2548_v56 = vpop.xlane.xlu0 %2547  ;;  %v7577_v4 = vcvt.s32.f32 %v2238_v60  ;;  %v8105_v60 = vld [vmem:[#allocation20_spill] sm:$0xff] }
0x1fc6   :  { %v2549_v6 = vcvt.f32.s32 %v2548_v56  ;;  %v4554_v2 = vrot.slane %v2537_v62, %v6015_v51 }
0x1fc8   :  { %v2552_v0 = vadd.s32 %v2551_v25, %v2549_v6  ;;  %v2626_v25 = vshll.u32 %v2625_v47, 16  ;;  %v2640_v6 = vcvt.f32.s32 %v7475_v44 }
0x1fc9   :  { %v2563_v41 = vpop.xlane.xlu0 %2562 }
0x1fca   :  { %v4558_v7 = vrot.slane %v2552_v0, %v6015_v51  ;;  %v2564_v9 = vcvt.f32.s32 %v2563_v41  ;;  %v2611_v0 = vshll.u32 %v2610_v40, 16  ;;  %v2252_v40 = vand.u32 65535, %v7539_v63 }
0x1fcc   :  { %v4583_v19 = vsel %vm1928_vm15, %v4558_v7, %v4554_v2  ;;  %v2567_v22 = vadd.s32 %v2566_v16, %v2564_v9  ;;  %v2147_v7 = vand.u32 65535, %v7483_v38  ;;  %v2641_v9 = vshll.u32 %v2640_v6, 16 }
0x1fcd   :  { %v2578_v10 = vpop.xlane.xlu0 %2577 }
0x1fce   :  { %v4562_v21 = vrot.slane %v2567_v22, %v6015_v51  ;;  %v2579_v50 = vcvt.f32.s32 %v2578_v10  ;;  %v2149_v32 = vcvt.s32.f32 %v2147_v7 }
0x1fd0   :  { %v4584_v58 = vsel %vm1930_vm1, %v4562_v21, %v4583_v19  ;;  %v2582_v57 = vadd.s32 %v2581_v42, %v2579_v50  ;;  %v2162_v21 = vand.u32 65535, %v7492_v34 }
0x1fd1   :  { %v2593_v17 = vpop.xlane.xlu0 %2592 }
0x1fd2   :  { %v4566_v20 = vrot.slane %v2582_v57, %v6015_v51  ;;  %v2594_v52 = vcvt.f32.s32 %v2593_v17  ;;  %v2164_v17 = vcvt.s32.f32 %v2162_v21  ;;  %v8113_v21 = vld [vmem:[#allocation25_spill] sm:$0xff] }
0x1fd4   :  { %v4585_v18 = vsel %vm1932_vm2, %v4566_v20, %v4584_v58  ;;  %v2597_v45 = vadd.s32 %v2596_v29, %v2594_v52  ;;  %v2177_v29 = vand.u32 65535, %v7501_v54  ;;  %v2207_v54 = vand.u32 65535, %v7521_v11 }
0x1fd5   :  { %v2623_v31 = vpop.xlane.xlu0 %2622 }
0x1fd6   :  { %v4570_v1 = vrot.slane %v2597_v45, %v6015_v51  ;;  %v2624_v56 = vcvt.f32.s32 %v2623_v31  ;;  %v2179_v52 = vcvt.s32.f32 %v2177_v29  ;;  %v8103_v45 = vld [vmem:[#allocation12_spill] sm:$0xff]  ;;  %v8106_v31 = vld [vmem:[#allocation13_spill] sm:$0xff] }
0x1fd7   :  { %vm1747_vm11 = vcmp.eq.f32.partialorder %v8106_v31, %v8105_v60 }
0x1fd8   :  { %v4586_v8 = vsel %vm1934_vm3, %v4570_v1, %v4585_v18  ;;  %v2627_v41 = vadd.s32 %v2626_v25, %v2624_v56  ;;  %v8104_v1 = vld [vmem:[#allocation11_spill] sm:$0xff]  ;;  %v8107_v25 = vld [vmem:[#allocation21_spill] sm:$0xff] }
0x1fd9   :  { %vm1746_vm9 = vcmp.eq.f32.partialorder %v8104_v1, %v8103_v45 }
0x1fda   :  { %v4578_v35 = vrot.slane %v2627_v41, %v6015_v51  ;;  %v1754_v11 = vsel %vm1746_vm9, %v5263_v15, 8 }
0x1fdb   :  { %v7638_v56 = vsel %vm1721_vm14, %v1754_v11, 2147483647 }
0x1fdc   :  { %v1764_v63 = vshra.s32 %v7638_v56, 16 }
0x1fde   :  { %v7654_v7 = vcvt.s32.f32 %v1764_v63 }
0x1fe3   :  { %2241 = vmin.xlane.f32.xlu0 %v7577_v4 }
0x1fe6   :  { %v2608_v62 = vpop.xlane.xlu1 %2607 }
0x1fe7   :  { %v2609_v16 = vcvt.f32.s32 %v2608_v62  ;;  %v8108_v62 = vld [vmem:[#allocation14_spill] sm:$0xff] }
0x1fe9   :  { %v2612_v48 = vadd.s32 %v2611_v0, %v2609_v16  ;;  %v2254_v0 = vcvt.s32.f32 %v2252_v40 }
0x1fea   :  { %v2638_v2 = vpop.xlane.xlu1 %2637 }
0x1feb   :  { %v4574_v19 = vrot.slane %v2612_v48, %v6015_v51  ;;  %v2639_v33 = vcvt.f32.s32 %v2638_v2  ;;  %v8109_v48 = vld [vmem:[#allocation22_spill] sm:$0xff]  ;;  %v8110_v2 = vld [vmem:[#allocation15_spill] sm:$0xff] }
0x1fed   :  { %v2642_v22 = vadd.s32 %v2641_v9, %v2639_v33  ;;  %v4587_v10 = vsel %vm1936_vm4, %v4574_v19, %v4586_v8  ;;  %v8111_v33 = vld [vmem:[#allocation23_spill] sm:$0xff] }
0x1fee   :  { %v7587_v42 = vpop.xlane.xlu1 %2151  ;;  %v4588_v44 = vsel %vm1938_vm5, %v4578_v35, %v4587_v10  ;;  %v8112_v35 = vld [vmem:[#allocation16_spill] sm:$0xff] }
0x1fef   :  { %v4582_v50 = vrot.slane %v2642_v22, %v6015_v51  ;;  %vm2153_vm13 = vcmp.eq.f32.partialorder %v7497_v23, %v7587_v42  ;;  %v2192_v23 = vand.u32 65535, %v7511_v37  ;;  %v2222_v37 = vand.u32 65535, %v7531_v43 }
0x1ff0   :  { %v7594_v38 = vsel %vm2153_vm13, %v2149_v32, inf  ;;  %vm1748_vm13 = vcmp.eq.f32.partialorder %v8108_v62, %v8107_v25 }
0x1ff1   :  { %v7597_v58 = vsel %vm1940_vm6, %v4582_v50, %v4588_v44  ;;  %v2194_v18 = vcvt.s32.f32 %v2192_v23  ;;  %v2224_v47 = vcvt.s32.f32 %v2222_v37  ;;  %v1756_v41 = vsel %vm1748_vm13, %v5263_v15, 8  ;;  %v8114_v50 = vld [vmem:[#allocation18_spill] sm:$0xff] }
0x1ff2   :  { %v7599_v57 = vpop.xlane.xlu1 %2166  ;;  %v7658_v19 = vsel %vm1721_vm14, %v1756_v41, 2147483647  ;;  %vm1752_vm9 = vcmp.eq.f32.partialorder %v8114_v50, %v8113_v21  ;;  %vm4605_vm13 = vcmp.gt.s32.totalorder %v6955_v49, 2 }
0x1ff3   :  { %vm2168_vm7 = vcmp.eq.f32.partialorder %v7507_v53, %v7599_v57  ;;  %v1794_v10 = vshra.s32 %v7658_v19, 16  ;;  %v1760_v23 = vsel %vm1752_vm9, %v5263_v15, 8 }
0x1ff4   :  { %v7604_v20 = vsel %vm2168_vm7, %v2164_v17, inf  ;;  %v7688_v37 = vsel %vm1721_vm14, %v1760_v23, 2147483647 }
0x1ff5   :  { %v7674_v17 = vcvt.s32.f32 %v1794_v10  ;;  %v1854_v60 = vshra.s32 %v7688_v37, 16 }
0x1ff6   :  { %v7606_v34 = vpop.xlane.xlu1 %2181 }
0x1ff7   :  { %vm2183_vm0 = vcmp.eq.f32.partialorder %v7517_v26, %v7606_v34  ;;  %v2209_v26 = vcvt.s32.f32 %v2207_v54  ;;  %v8116_v54 = vld [vmem:[#allocation19_spill] sm:$0xff]  ;;  %v2188_v50 = vcvt.f32.s32 %v7606_v34 }
0x1ff8   :  { %v7611_v39 = vsel %vm2183_vm0, %v2179_v52, inf  ;;  %vm1749_vm0 = vcmp.eq.f32.partialorder %v8110_v2, %v8109_v48 }
0x1ffa   :  { %v7613_v13 = vpop.xlane.xlu1 %2196 }
0x1ffb   :  { %vm2198_vm8 = vcmp.eq.f32.partialorder %v7527_v30, %v7613_v13 }
0x1ffc   :  { %v7618_v53 = vsel %vm2198_vm8, %v2194_v18, inf  ;;  %vm1750_vm8 = vcmp.eq.f32.partialorder %v8112_v35, %v8111_v33  ;;  %v8115_v18 = vld [vmem:[#allocation26_spill] sm:$0xff] }
0x1ffd   :  { %v1758_v32 = vsel %vm1750_vm8, %v5263_v15, 8 }
0x1ffe   :  { %v7622_v59 = vpop.xlane.xlu1 %2211  ;;  %v7678_v52 = vsel %vm1721_vm14, %v1758_v32, 2147483647 }
0x1fff   :  { %vm2213_vm10 = vcmp.eq.f32.partialorder %v7535_v27, %v7622_v59  ;;  %v1755_v27 = vsel %vm1747_vm11, %v5263_v15, 8  ;;  %v1824_v1 = vshra.s32 %v7678_v52, 16 }
0x2000   :  { %v7627_v8 = vsel %vm2213_vm10, %v2209_v26, inf  ;;  %vm1753_vm10 = vcmp.eq.f32.partialorder %v8116_v54, %v8115_v18 }
0x2001   :  { %v1761_v26 = vsel %vm1753_vm10, %v5263_v15, 8  ;;  %v7692_v11 = vcvt.s32.f32 %v1824_v1  ;;  %v2189_v1 = vshll.u32 %v2188_v50, 16 }
0x2002   :  { %v7632_v30 = vpop.xlane.xlu1 %2226  ;;  %v7696_v31 = vsel %vm1721_vm14, %v1761_v26, 2147483647  ;;  %v2203_v26 = vcvt.f32.s32 %v7613_v13 }
0x2003   :  { %vm2228_vm12 = vcmp.eq.f32.partialorder %v7542_v36, %v7632_v30  ;;  %v7649_v36 = vsel %vm1721_vm14, %v1755_v27, 2147483647  ;;  %v1869_v40 = vshra.s32 %v7696_v31, 16  ;;  %v2233_v34 = vcvt.f32.s32 %v7632_v30 }
0x2004   :  { %v2229_v43 = vsel %vm2228_vm12, %v2224_v47, inf  ;;  %v1779_v9 = vshra.s32 %v7649_v36, 16  ;;  %v7699_v47 = vcvt.s32.f32 %v1854_v60 }
0x2005   :  { %2230 = vmin.xlane.f32.xlu0 %v2229_v43  ;;  %v7703_v43 = vcvt.s32.f32 %v1869_v40 }
0x2006   :  { %v7643_v6 = vpop.xlane.xlu1 %2256  ;;  %v7664_v22 = vcvt.s32.f32 %v1779_v9 }
0x2007   :  { %vm2258_vm7 = vcmp.eq.f32.partialorder %v7546_v3, %v7643_v6  ;;  %v1757_v3 = vsel %vm1749_vm0, %v5263_v15, 8 }
0x2008   :  { %v2259_v16 = vsel %vm2258_vm7, %v2254_v0, inf  ;;  %v7668_v44 = vsel %vm1721_vm14, %v1757_v3, 2147483647  ;;  %vm4604_vm7 = vcmp.eq.s32.totalorder %v6955_v49, 2 }
0x2009   :  { %2260 = vmin.xlane.f32.xlu0 %v2259_v16  ;;  %v1809_v29 = vshra.s32 %v7668_v44, 16 }
0x200b   :  { %v7684_v45 = vcvt.s32.f32 %v1809_v29 }
0x200d   :  { %1767 = vmin.xlane.f32.xlu0 %v7654_v7 }
0x2011   :  { %1782 = vmin.xlane.f32.xlu0 %v7664_v22 }
0x2015   :  { %1797 = vmin.xlane.f32.xlu0 %v7674_v17 }
0x2019   :  { %1812 = vmin.xlane.f32.xlu0 %v7684_v45 }
0x201d   :  { %1827 = vmin.xlane.f32.xlu0 %v7692_v11 }
0x2021   :  { %1857 = vmin.xlane.f32.xlu0 %v7699_v47 }
0x2025   :  { %1872 = vmin.xlane.f32.xlu0 %v7703_v43 }
0x2043   :  { %v4549_v27 = vpop.permute.xlu0 %4548 }
0x2044   :  { %vm4550_vm11 = vcmp.eq.s32.totalorder %v5263_v15, %v4549_v27 }
0x2045   :  { %v4590_v25 = vsel %vm4550_vm11, %v7597_v58, 0  ;;  %v2237_v58 = vand.u32 65535, %v7574_v55 }
0x2046   :  { %v4591_v62 = vsel %vm1721_vm14, %v4590_v25, 0 }
0x2047   :  { %v4593_v0 = vshrl.u32 %v4591_v62, 16  ;;  %v4592_v63 = vand.u32 65535, %v4591_v62  ;;  %v2239_v2 = vcvt.s32.f32 %v2237_v58 }
0x2049   :  { %v4595_v16 = vcvt.s32.f32 %v4593_v0  ;;  %v4594_v41 = vcvt.s32.f32 %v4592_v63 }
0x204b   :  { %4598 = vadd.xlane.f32.xlu1 %v4595_v16  ;;  %v2204_v16 = vshll.u32 %v2203_v26, 16 }
0x204f   :  { %4596 = vadd.xlane.f32.xlu1 %v4594_v41  ;;  %v2218_v41 = vcvt.f32.s32 %v7622_v59 }
0x2053   :  { %2155 = vmin.xlane.f32.xlu1 %v7594_v38 }
0x2057   :  { %2170 = vmin.xlane.f32.xlu1 %v7604_v20  ;;  %v2158_v20 = vcvt.f32.s32 %v7587_v42 }
0x2059   :  { %v2159_v21 = vshll.u32 %v2158_v20, 16 }
0x205b   :  { %2185 = vmin.xlane.f32.xlu1 %v7611_v39 }
0x205f   :  { %2200 = vmin.xlane.f32.xlu1 %v7618_v53  ;;  %v2173_v53 = vcvt.f32.s32 %v7599_v57 }
0x2061   :  { %v2174_v29 = vshll.u32 %v2173_v53, 16 }
0x2063   :  { %2215 = vmin.xlane.f32.xlu1 %v7627_v8 }
0x2070   :  { %v2242_v48 = vpop.xlane.xlu0 %2241 }
0x2071   :  { %vm2243_vm12 = vcmp.eq.f32.partialorder %v7577_v4, %v2242_v48 }
0x2072   :  { %v2244_v9 = vsel %vm2243_vm12, %v2239_v2, inf }
0x2073   :  { %2245 = vmin.xlane.f32.xlu1 %v2244_v9 }
0x2092   :  { %v2231_v25 = vpop.xlane.xlu0 %2230 }
0x2093   :  { %v2232_v9 = vcvt.f32.s32 %v2231_v25 }
0x2096   :  { %v2261_v25 = vpop.xlane.xlu0 %2260 }
0x20d8   :  { %v4599_v3 = vpop.xlane.xlu1 %4598 }
0x20d9   :  { %v4601_v33 = vcvt.f32.s32 %v4599_v3 }
0x20db   :  { %v4602_v38 = vshll.u32 %v4601_v33, 16  ;;  %v2234_v33 = vshll.u32 %v2233_v34, 16 }
0x20dc   :  { %v4597_v35 = vpop.xlane.xlu1 %4596 }
0x20dd   :  { %v4600_v10 = vcvt.f32.s32 %v4597_v35 }
0x20df   :  { %v4603_v39 = vadd.s32 %v4602_v38, %v4600_v10  ;;  %v2219_v38 = vshll.u32 %v2218_v41, 16 }
0x20e0   :  { %v2156_v32 = vpop.xlane.xlu1 %2155 }
0x20e1   :  { %v2157_v55 = vcvt.f32.s32 %v2156_v32  ;;  %v4606_v4 = vsel %vm4605_vm13, %v4603_v39, %v7555_v12  ;;  %v2235_v39 = vadd.s32 %v2234_v33, %v2232_v9 }
0x20e2   :  { %v7722_v8 = vsel %vm4604_vm7, %v6885_v5, %v4606_v4  ;;  %v8117_v4 = vld [vmem:[#allocation24_spill] sm:$0xff] }
0x20e3   :  { %4616 = vperm.xlu1 %5077, %v7722_v8   ;;  %v2160_v23 = vadd.s32 %v2159_v21, %v2157_v55  ;;  %v4642_v59 = vrot.slane %v2235_v39, %v6015_v51  ;;  %v8118_v21 = vld [vmem:[#allocation17_spill] sm:$0xff]  ;;  %v1778_v39 = vand.u32 65535, %v7649_v36 }
0x20e4   :  { %v2171_v42 = vpop.xlane.xlu1 %2170  ;;  %vm1751_vm0 = vcmp.eq.f32.partialorder %v8118_v21, %v8117_v4  ;;  %v1823_v21 = vand.u32 65535, %v7678_v52 }
0x20e5   :  { %v2172_v18 = vcvt.f32.s32 %v2171_v42  ;;  %v4622_v60 = vrot.slane %v2160_v23, %v6015_v51  ;;  %v1759_v42 = vsel %vm1751_vm0, %v5263_v15, 8 }
0x20e6   :  { %v7744_v23 = vsel %vm1721_vm14, %v1759_v42, 2147483647 }
0x20e7   :  { %v2175_v54 = vadd.s32 %v2174_v29, %v2172_v18  ;;  %v2248_v29 = vcvt.f32.s32 %v2242_v48  ;;  %v2263_v48 = vcvt.f32.s32 %v7643_v6  ;;  %v1838_v52 = vand.u32 65535, %v7744_v23 }
0x20e8   :  { %v2186_v57 = vpop.xlane.xlu1 %2185 }
0x20e9   :  { %v4626_v40 = vrot.slane %v2175_v54, %v6015_v51  ;;  %v2187_v27 = vcvt.f32.s32 %v2186_v57  ;;  %v2249_v54 = vshll.u32 %v2248_v29, 16  ;;  %v1839_v57 = vshra.s32 %v7744_v23, 16 }
0x20eb   :  { %v4651_v62 = vsel %vm1928_vm15, %v4626_v40, %v4622_v60  ;;  %v2190_v0 = vadd.s32 %v2189_v1, %v2187_v27  ;;  %v7748_v40 = vcvt.s32.f32 %v1839_v57 }
0x20ec   :  { %v2201_v63 = vpop.xlane.xlu1 %2200 }
0x20ed   :  { %v4630_v58 = vrot.slane %v2190_v0, %v6015_v51  ;;  %v2202_v2 = vcvt.f32.s32 %v2201_v63  ;;  %v2264_v0 = vshll.u32 %v2263_v48, 16 }
0x20ef   :  { %v4652_v13 = vsel %vm1930_vm1, %v4630_v58, %v4651_v62  ;;  %v2205_v3 = vadd.s32 %v2204_v16, %v2202_v2  ;;  %v2262_v62 = vcvt.f32.s32 %v2261_v25  ;;  %v7754_v16 = vpop.xlane.xlu0 %1767 }
0x20f0   :  { %v2216_v35 = vpop.xlane.xlu1 %2215  ;;  %vm1769_vm9 = vcmp.eq.f32.partialorder %v7654_v7, %v7754_v16  ;;  %v1774_v48 = vcvt.f32.s32 %v7754_v16 }
0x20f1   :  { %v4634_v10 = vrot.slane %v2205_v3, %v6015_v51  ;;  %v2217_v20 = vcvt.f32.s32 %v2216_v35  ;;  %v2265_v34 = vadd.s32 %v2264_v0, %v2262_v62  ;;  %v1763_v35 = vand.u32 65535, %v7638_v56 }
0x20f2   :  { %v1793_v56 = vand.u32 65535, %v7658_v19 }
0x20f3   :  { %v4653_v30 = vsel %vm1932_vm2, %v4634_v10, %v4652_v13  ;;  %v2220_v32 = vadd.s32 %v2219_v38, %v2217_v20  ;;  %v4650_v63 = vrot.slane %v2265_v34, %v6015_v51  ;;  %v7759_v3 = vpop.xlane.xlu0 %1782  ;;  %v1765_v20 = vcvt.s32.f32 %v1763_v35 }
0x20f4   :  { %vm1784_vm10 = vcmp.eq.f32.partialorder %v7664_v22, %v7759_v3  ;;  %v1795_v7 = vcvt.s32.f32 %v1793_v56 }
0x20f5   :  { %v4638_v53 = vrot.slane %v2220_v32, %v6015_v51 }
0x20f7   :  { %v4654_v55 = vsel %vm1934_vm3, %v4638_v53, %v4653_v30  ;;  %v7762_v10 = vpop.xlane.xlu0 %1797  ;;  %v1770_v30 = vsel %vm1769_vm9, %v1765_v20, inf  ;;  %v1780_v53 = vcvt.s32.f32 %v1778_v39  ;;  %vm4673_vm9 = vcmp.gt.s32.totalorder %v6955_v49, 1 }
0x20f8   :  { %v4655_v50 = vsel %vm1936_vm4, %v4642_v59, %v4654_v55  ;;  %vm1799_vm11 = vcmp.eq.f32.partialorder %v7674_v17, %v7762_v10  ;;  %v1808_v55 = vand.u32 65535, %v7668_v44  ;;  %v1825_v17 = vcvt.s32.f32 %v1823_v21 }
0x20f9   :  { %v1785_v59 = vsel %vm1784_vm10, %v1780_v53, inf  ;;  %v1800_v36 = vsel %vm1799_vm11, %v1795_v7, inf  ;;  %v1853_v44 = vand.u32 65535, %v7688_v37  ;;  %vm4672_vm10 = vcmp.eq.s32.totalorder %v6955_v49, 1 }
0x20fa   :  { %v1810_v22 = vcvt.s32.f32 %v1808_v55  ;;  %vm4336_vm11 = vcmp.gt.s32.totalorder %v6952_v14, 6 }
0x20fb   :  { %v7769_v32 = vpop.xlane.xlu0 %1812 }
0x20fc   :  { %vm1814_vm12 = vcmp.eq.f32.partialorder %v7684_v45, %v7769_v32  ;;  %v1855_v45 = vcvt.s32.f32 %v1853_v44  ;;  %v1819_v35 = vcvt.f32.s32 %v7769_v32 }
0x20fe   :  { %v1820_v56 = vshll.u32 %v1819_v35, 16 }
0x20ff   :  { %v7775_v4 = vpop.xlane.xlu0 %1827 }
0x2100   :  { %v2246_v18 = vpop.xlane.xlu1 %2245  ;;  %vm1829_vm13 = vcmp.eq.f32.partialorder %v7692_v11, %v7775_v4  ;;  %v1840_v11 = vcvt.s32.f32 %v1838_v52 }
0x2101   :  { %v2247_v1 = vcvt.f32.s32 %v2246_v18  ;;  %v1830_v42 = vsel %vm1829_vm13, %v1825_v17, inf  ;;  %vm4608_vm13 = vcmp.gt.s32.totalorder %v6952_v14, 2 }
0x2102   :  { %v4609_v55 = vsel %vm4608_vm13, %v7722_v8, 0  ;;  %vm4746_vm13 = vcmp.eq.s32.totalorder %v5263_v15, 0 }
0x2103   :  { %v2250_v26 = vadd.s32 %v2249_v54, %v2247_v1  ;;  %v7782_v19 = vpop.xlane.xlu0 %1857  ;;  %v1868_v1 = vand.u32 65535, %v7696_v31 }
0x2104   :  { %vm1859_vm7 = vcmp.eq.f32.partialorder %v7699_v47, %v7782_v19  ;;  %v1864_v52 = vcvt.f32.s32 %v7782_v19 }
0x2105   :  { %v4646_v60 = vrot.slane %v2250_v26, %v6015_v51  ;;  %v1860_v29 = vsel %vm1859_vm7, %v1855_v45, inf  ;;  %v1870_v47 = vcvt.s32.f32 %v1868_v1  ;;  %vm4309_vm7 = vcmp.eq.s32.totalorder %v5263_v15, 7 }
0x2106   :  { %v1865_v1 = vshll.u32 %v1864_v52, 16 }
0x2107   :  { %1842 = vmin.xlane.f32.xlu1 %v7748_v40  ;;  %v4656_v27 = vsel %vm1938_vm5, %v4646_v60, %v4655_v50  ;;  %v1815_v50 = vsel %vm1814_vm12, %v1810_v22, inf  ;;  %v7788_v18 = vpop.xlane.xlu0 %1872  ;;  %vm4472_vm12 = vcmp.gt.s32.totalorder %v6952_v14, 4 }
0x2108   :  { %v4657_v58 = vsel %vm1940_vm6, %v4650_v63, %v4656_v27  ;;  %v1775_v63 = vshll.u32 %v1774_v48, 16  ;;  %v4473_v39 = vsel %vm4472_vm12, %v7404_v61, 0  ;;  %v1879_v19 = vcvt.f32.s32 %v7788_v18 }
0x2109   :  { %vm4678_vm12 = vcmp.eq.s32.totalorder %v5263_v15, 1 }
0x2162   :  { %v4617_v41 = vpop.permute.xlu1 %4616 }
0x2163   :  { %vm4618_vm8 = vcmp.eq.s32.totalorder %v5263_v15, %v4617_v41  ;;  %v1804_v41 = vcvt.f32.s32 %v7762_v10 }
0x2164   :  { %v4658_v2 = vsel %vm4618_vm8, %v4657_v58, 0  ;;  %vm1874_vm8 = vcmp.eq.f32.partialorder %v7703_v43, %v7788_v18 }
0x2165   :  { %v4659_v9 = vsel %vm1721_vm14, %v4658_v2, 0  ;;  %v1875_v57 = vsel %vm1874_vm8, %v1870_v47, inf  ;;  %vm4406_vm8 = vcmp.eq.s32.totalorder %v5263_v15, 5 }
0x2166   :  { %v4661_v13 = vshrl.u32 %v4659_v9, 16  ;;  %v4660_v33 = vand.u32 65535, %v4659_v9 }
0x2168   :  { %v4663_v6 = vcvt.s32.f32 %v4661_v13  ;;  %v4662_v38 = vcvt.s32.f32 %v4660_v33  ;;  %v4337_v13 = vsel %vm4336_vm11, %v7084_v24, 0  ;;  %v1805_v33 = vshll.u32 %v1804_v41, 16 }
0x2169   :  { %vm4610_vm11 = vcmp.eq.s32.totalorder %v5263_v15, 2 }
0x216a   :  { %4666 = vadd.xlane.f32.xlu0 %v4663_v6 }
0x216e   :  { %4664 = vadd.xlane.f32.xlu0 %v4662_v38 }
0x2172   :  { %1771 = vmin.xlane.f32.xlu0 %v1770_v30 }
0x2176   :  { %1786 = vmin.xlane.f32.xlu0 %v1785_v59  ;;  %v1834_v59 = vcvt.f32.s32 %v7775_v4 }
0x2178   :  { %v1835_v21 = vshll.u32 %v1834_v59, 16 }
0x217a   :  { %1801 = vmin.xlane.f32.xlu0 %v1800_v36 }
0x217e   :  { %1816 = vmin.xlane.f32.xlu0 %v1815_v50 }
0x2182   :  { %1831 = vmin.xlane.f32.xlu0 %v1830_v42 }
0x2186   :  { %1861 = vmin.xlane.f32.xlu0 %v1860_v29 }
0x2194   :  { %v7790_v54 = vpop.xlane.xlu1 %1842 }
0x2195   :  { %vm1844_vm0 = vcmp.eq.f32.partialorder %v7748_v40, %v7790_v54  ;;  %v1789_v40 = vcvt.f32.s32 %v7759_v3 }
0x2196   :  { %v1845_v37 = vsel %vm1844_vm0, %v1840_v11, inf  ;;  %vm4338_vm0 = vcmp.eq.s32.totalorder %v5263_v15, 6 }
0x2197   :  { %1846 = vmin.xlane.f32.xlu1 %v1845_v37  ;;  %v1790_v58 = vshll.u32 %v1789_v40, 16 }
0x219b   :  { %1876 = vmin.xlane.f32.xlu1 %v1875_v57 }
0x21f7   :  { %v4667_v26 = vpop.xlane.xlu0 %4666 }
0x21f8   :  { %v4669_v23 = vcvt.f32.s32 %v4667_v26 }
0x21fa   :  { %v4670_v27 = vshll.u32 %v4669_v23, 16 }
0x21fb   :  { %v4665_v60 = vpop.xlane.xlu0 %4664 }
0x21fc   :  { %v4668_v25 = vcvt.f32.s32 %v4665_v60 }
0x21fe   :  { %v4671_v62 = vadd.s32 %v4670_v27, %v4668_v25 }
0x21ff   :  { %v1772_v31 = vpop.xlane.xlu0 %1771 }
0x2200   :  { %v1773_v0 = vcvt.f32.s32 %v1772_v31  ;;  %v4674_v43 = vsel %vm4673_vm9, %v4671_v62, %v7722_v8  ;;  %v1849_v8 = vcvt.f32.s32 %v7790_v54  ;;  %v1880_v54 = vshll.u32 %v1879_v19, 16 }
0x2201   :  { %v7803_v34 = vsel %vm4672_vm10, %v6885_v5, %v4674_v43  ;;  %vm4474_vm9 = vcmp.eq.s32.totalorder %v5263_v15, 4  ;;  %vm4542_vm10 = vcmp.eq.s32.totalorder %v5263_v15, 3 }
0x2202   :  { %4684 = vperm.xlu0 %5076, %v7803_v34   ;;  %v1776_v2 = vadd.s32 %v1775_v63, %v1773_v0  ;;  %v1850_v47 = vshll.u32 %v1849_v8, 16 }
0x2203   :  { %v1787_v16 = vpop.xlane.xlu0 %1786 }
0x2204   :  { %v1788_v9 = vcvt.f32.s32 %v1787_v16  ;;  %v4690_v38 = vrot.slane %v1776_v2, %v6015_v51 }
0x2206   :  { %v1791_v3 = vadd.s32 %v1790_v58, %v1788_v9  ;;  %4340 = vperm.xlu0 %5076, %v4337_v13  }
0x2207   :  { %v1802_v6 = vpop.xlane.xlu0 %1801 }
0x2208   :  { %v4694_v10 = vrot.slane %v1791_v3, %v6015_v51  ;;  %v1803_v20 = vcvt.f32.s32 %v1802_v6 }
0x220a   :  { %v4719_v30 = vsel %vm1928_vm15, %v4694_v10, %v4690_v38  ;;  %v1806_v53 = vadd.s32 %v1805_v33, %v1803_v20  ;;  %4476 = vperm.xlu0 %5076, %v4473_v39  }
0x220b   :  { %v1817_v24 = vpop.xlane.xlu0 %1816 }
0x220c   :  { %v4698_v7 = vrot.slane %v1806_v53, %v6015_v51  ;;  %v1818_v32 = vcvt.f32.s32 %v1817_v24 }
0x220e   :  { %v4720_v36 = vsel %vm1930_vm1, %v4698_v7, %v4719_v30  ;;  %v1821_v22 = vadd.s32 %v1820_v56, %v1818_v32  ;;  %4612 = vperm.xlu0 %5076, %v4609_v55   ;;  %vm4307_vm1 = vcmp.gt.s32.totalorder %v6952_v14, 7 }
0x220f   :  { %v1832_v61 = vpop.xlane.xlu0 %1831  ;;  %v4308_v18 = vsel %vm4307_vm1, %v6963_v46, 0 }
0x2210   :  { %v4702_v50 = vrot.slane %v1821_v22, %v6015_v51  ;;  %v1833_v17 = vcvt.f32.s32 %v1832_v61 }
0x2212   :  { %v4721_v44 = vsel %vm1932_vm2, %v4702_v50, %v4720_v36  ;;  %v1836_v42 = vadd.s32 %v1835_v21, %v1833_v17  ;;  %vm4404_vm2 = vcmp.gt.s32.totalorder %v6952_v14, 5 }
0x2213   :  { %v1862_v29 = vpop.xlane.xlu0 %1861 }
0x2214   :  { %v4706_v45 = vrot.slane %v1836_v42, %v6015_v51  ;;  %v1863_v11 = vcvt.f32.s32 %v1862_v29 }
0x2216   :  { %v4722_v4 = vsel %vm1934_vm3, %v4706_v45, %v4721_v44  ;;  %v1866_v26 = vadd.s32 %v1865_v1, %v1863_v11  ;;  %vm4540_vm3 = vcmp.gt.s32.totalorder %v6952_v14, 3 }
0x2217   :  { %v4541_v3 = vsel %vm4540_vm3, %v7555_v12, 0 }
0x2218   :  { %v4714_v27 = vrot.slane %v1866_v26, %v6015_v51 }
0x2224   :  { %v1847_v37 = vpop.xlane.xlu1 %1846 }
0x2225   :  { %v1848_v57 = vcvt.f32.s32 %v1847_v37 }
0x2227   :  { %v1851_v23 = vadd.s32 %v1850_v47, %v1848_v57 }
0x2228   :  { %v1877_v62 = vpop.xlane.xlu1 %1876 }
0x2229   :  { %v4710_v60 = vrot.slane %v1851_v23, %v6015_v51  ;;  %v1878_v31 = vcvt.f32.s32 %v1877_v62 }
0x222b   :  { %v4723_v25 = vsel %vm1936_vm4, %v4710_v60, %v4722_v4  ;;  %v1881_v40 = vadd.s32 %v1880_v54, %v1878_v31  ;;  %vm4741_vm4 = vcmp.gt.s32.totalorder %v6955_v49, 0 }
0x222c   :  { %v4724_v48 = vsel %vm1938_vm5, %v4714_v27, %v4723_v25  ;;  %vm4740_vm5 = vcmp.eq.s32.totalorder %v6955_v49, 0 }
0x222d   :  { %v4718_v0 = vrot.slane %v1881_v40, %v6015_v51  ;;  %v4405_v51 = vsel %vm4404_vm2, %v7235_v28, 0 }
0x222f   :  { %v4725_v63 = vsel %vm1940_vm6, %v4718_v0, %v4724_v48  ;;  %vm4744_vm6 = vcmp.gt.s32.totalorder %v6952_v14, 0 }
0x2281   :  { %v4685_v43 = vpop.permute.xlu0 %4684 }
0x2282   :  { %vm4686_vm15 = vcmp.eq.s32.totalorder %v5263_v15, %v4685_v43 }
0x2283   :  { %v4726_v41 = vsel %vm4686_vm15, %v4725_v63, 0  ;;  %vm4753_vm15 = vcmask 60416  }
0x2284   :  { %v4727_v16 = vsel %vm1721_vm14, %v4726_v41, 0  ;;  %vm4676_vm14 = vcmp.gt.s32.totalorder %v6952_v14, 1 }
0x2285   :  { %v4729_v58 = vshrl.u32 %v4727_v16, 16  ;;  %v4728_v2 = vand.u32 65535, %v4727_v16  ;;  %v4677_v33 = vsel %vm4676_vm14, %v7803_v34, 0  ;;  %v4341_v53 = vpop.permute.xlu0 %4340 }
0x2287   :  { %v4731_v9 = vcvt.s32.f32 %v4729_v58  ;;  %v4730_v13 = vcvt.s32.f32 %v4728_v2 }
0x2289   :  { %4734 = vadd.xlane.f32.xlu1 %v4731_v9  ;;  %v4477_v59 = vpop.permute.xlu0 %4476 }
0x228d   :  { %4732 = vadd.xlane.f32.xlu1 %v4730_v13  ;;  %v4613_v14 = vpop.permute.xlu0 %4612 }
0x229e   :  { %4311 = vperm.xlu1 %5077, %v4308_v18  }
0x22a2   :  { %4408 = vperm.xlu1 %5077, %v4405_v51  }
0x22a6   :  { %4544 = vperm.xlu1 %5077, %v4541_v3  }
0x22aa   :  { %4680 = vperm.xlu1 %5077, %v4677_v33  }
0x2316   :  { %v4735_v6 = vpop.xlane.xlu1 %4734 }
0x2317   :  { %v4737_v35 = vcvt.f32.s32 %v4735_v6 }
0x2319   :  { %v4738_v46 = vshll.u32 %v4737_v35, 16 }
0x231a   :  { %v4733_v38 = vpop.xlane.xlu1 %4732 }
0x231b   :  { %v4736_v10 = vcvt.f32.s32 %v4733_v38 }
0x231d   :  { %v4739_v20 = vadd.s32 %v4738_v46, %v4736_v10 }
0x231e   :  { %v4312_v30 = vpop.permute.xlu1 %4311 }
0x231f   :  { %v4742_v28 = vsel %vm4741_vm4, %v4739_v20, %v7803_v34  ;;  %v4313_v56 = vsel %vm4309_vm7, %v4312_v30, 0 }
0x2320   :  { %v4743_v12 = vsel %vm4740_vm5, %v6885_v5, %v4742_v28  ;;  %v4342_v49 = vsel %vm4338_vm0, %v4341_v53, %v4313_v56 }
0x2321   :  { %v4745_v39 = vsel %vm4744_vm6, %v4743_v12, 0 }
0x2322   :  { %4748 = vperm.xlu0 %5076, %v4745_v39   ;;  %v4409_v24 = vpop.permute.xlu1 %4408 }
0x2323   :  { %v4410_v34 = vsel %vm4406_vm8, %v4409_v24, %v4342_v49 }
0x2324   :  { %v4478_v5 = vsel %vm4474_vm9, %v4477_v59, %v4410_v34 }
0x2326   :  { %v4545_v7 = vpop.permute.xlu1 %4544 }
0x2327   :  { %v4546_v32 = vsel %vm4542_vm10, %v4545_v7, %v4478_v5 }
0x2328   :  { %v4614_v36 = vsel %vm4610_vm11, %v4613_v14, %v4546_v32 }
0x232a   :  { %v4681_v55 = vpop.permute.xlu1 %4680 }
0x232b   :  { %v4682_v22 = vsel %vm4678_vm12, %v4681_v55, %v4614_v36 }
0x23a1   :  { %v4749_v61 = vpop.permute.xlu0 %4748 }
0x23a2   :  { %v4750_v21 = vsel %vm4746_vm13, %v4749_v61, %v4682_v22 }
0x23a3   :  { %4754 = vst.msk [vmem:[#allocation5] sm:$0xf] %vm4753_vm15, %v4750_v21 }
0x23a4   :  { %5187 = shalt.err (!%p5184_p4)
}
0x23a5   :  { %s5188_s10 = scalar_lea.hbm %s7872_s4, 64 }
0x23a6   :  { %p5189_p5 = scmp.ne.s32.totalorder %s7872_s4, %s5188_s10  ;;  %p5192_p6 = scmp.lt.u32.totalorder %s5188_s10, %s7872_s4 }
0x23a8   :  { %p5194_p7 = pnand %p5192_p6, %p5189_p5 }
0x23aa   :  { %5197 = shalt.err (!%p5194_p7)
}
0x23ab   :  { %4766 = dma.vmem_to_hbm [thread:$0]  %s4764_s6, 64, %s7872_s4, [#allocation6]  }
0x23ac   :  { %5198 = dma.done.wait [#allocation6], 64  }
0x23ad   :  { %5199 = vsyncadd [#allocation6], 4294967232 }
0x23ae   :  { %4772 = vsyncpa [#allocation6], 1 }

</bundles_post_ra>
